<compile_context>
chip_gen: v6e
topology: v6e:2x2x1
jax: 0.10.0
libtpu: 0.0.40
codegen_flags: <defaults>
</compile_context>

<pallas_src>
import functools

import numpy as np
import jax
import jax.numpy as jnp
from jax import lax
from jax.experimental import pallas as pl
from jax.experimental.pallas import tpu as pltpu


_FREQ_BLOCK = 256                 # frequency lanes per grid step (fills the 256-wide MXU)
_COMPUTE_DTYPE = jnp.bfloat16     # MXU input dtype (f32 accumulate); jnp.float32 = exact STFT


def _round_up(x, m):
    return ((x + m - 1) // m) * m


@functools.lru_cache(maxsize=None)
def _vmem_capacity_bytes():
    try:
        info = pltpu.get_tpu_info()
        cap = int(getattr(info, "vmem_capacity_bytes", 0) or 0)
        if cap > 0:
            return cap
    except Exception:
        pass
    return 64 * 1024 * 1024       # conservative fallback (v7x-sized per-core VMEM)


def _tile_config(n_fft):
    """(m_tile_target, vmem_limit_bytes), generation-selected."""
    if _vmem_capacity_bytes() >= 96 * 1024 * 1024:          # v5e / v6e: 128 MiB VMEM
        return {512: 2048, 1024: 1024, 2048: 512}.get(n_fft, 512), 96 * 1024 * 1024
    # v7x: 64 MiB VMEM per TensorCore
    return {512: 1024, 1024: 512, 2048: 256}.get(n_fft, 256), 48 * 1024 * 1024


@functools.lru_cache(maxsize=None)
def _windowed_dft_basis(n_fft, win_length):
    """Window-folded one-sided DFT bases (bins 0..n_fft/2-1) + the Nyquist cos column."""
    f_half = n_fft // 2
    n = np.arange(win_length, dtype=np.float64)
    w = 0.5 - 0.5 * np.cos(2.0 * np.pi * n / win_length)     # periodic Hann (torch default)
    wfull = np.zeros(n_fft, dtype=np.float64)
    lpad = (n_fft - win_length) // 2                          # torch.stft centre-pads the window
    wfull[lpad:lpad + win_length] = w
    k = np.arange(n_fft, dtype=np.int64)[:, None]
    f = np.arange(f_half, dtype=np.int64)[None, :]
    ang = (2.0 * np.pi / n_fft) * ((k * f) % n_fft).astype(np.float64)
    cosw = wfull[:, None] * np.cos(ang)
    sinw = wfull[:, None] * np.sin(ang)
    nyq = wfull * np.where(np.arange(n_fft) % 2 == 0, 1.0, -1.0)   # cos(pi*n); sin term is 0
    return (jnp.asarray(cosw, dtype=_COMPUTE_DTYPE),
            jnp.asarray(sinw, dtype=_COMPUTE_DTYPE),
            jnp.asarray(nyq, dtype=_COMPUTE_DTYPE))


def _plcpa_kernel(p, gamma, fb,
                  pfr_ref, tfr_ref, cosw_ref, sinw_ref, nyq_os_ref, nyq_pp_ref,
                  out_ref, acc_a, acc_p, acc_os, acc_pp):
    """Grid = (M_tiles, freq_blocks), frequency innermost.

    pfr/tfr    : (m_tile, n_fft) compute-dtype frames (resident across the j axis).
    cosw/sinw  : (n_fft, n_fft//2) full window-folded DFT bases (resident, fetched once).
    nyq_os/pp  : (m_tile, 1) f32 per-frame Nyquist [relu(d)^2, |P|^p] contributions.
    out        : (8, 128) per-tile partials; row 0 lanes 0..3 = [L_a, L_p, L_os, tsos_count].
    acc_*      : (m_tile, 1) f32 lane-reduced accumulators.
    """
    j = pl.program_id(1)

    @pl.when(j == 0)
    def _init():
        acc_a[...] = jnp.zeros_like(acc_a)
        acc_p[...] = jnp.zeros_like(acc_p)
        acc_os[...] = jnp.zeros_like(acc_os)
        acc_pp[...] = jnp.zeros_like(acc_pp)

    # STFT of this 256-lane frequency block: 4 MXU matmuls against the resident basis.
    c0 = pl.multiple_of(j * fb, fb)
    cosb = cosw_ref[:, pl.ds(c0, fb)]
    sinb = sinw_ref[:, pl.ds(c0, fb)]
    pfr = pfr_ref[...]
    tfr = tfr_ref[...]
    p_re = jnp.dot(pfr, cosb, preferred_element_type=jnp.float32)
    p_im = jnp.dot(pfr, sinb, preferred_element_type=jnp.float32)   # true imag = -this; sign cancels
    t_re = jnp.dot(tfr, cosb, preferred_element_type=jnp.float32)
    t_im = jnp.dot(tfr, sinb, preferred_element_type=jnp.float32)

    p_abs2 = p_re * p_re + p_im * p_im
    t_abs2 = t_re * t_re + t_im * t_im
    p_nz = p_abs2 > 0.0
    t_nz = t_abs2 > 0.0
    log_p2 = jnp.log(p_abs2)
    log_t2 = jnp.log(t_abs2)
    p_absp = jnp.where(p_nz, jnp.exp((0.5 * p) * log_p2), 0.0)      # |P|^p
    t_absp = jnp.where(t_nz, jnp.exp((0.5 * p) * log_t2), 0.0)      # |T|^p

    d = p_absp - t_absp
    la = d * d                                                       # L_a term
    r = jnp.maximum(d, 0.0)
    los = r * r                                                      # L_os term
    # L_p term via shared exp:
    #   | |P|^{p-1}P - |T|^{p-1}T |^2
    #     = |P|^{2p} + |T|^{2p} - 2 |P|^{p-1}|T|^{p-1} (ReP*ReT + ImP*ImT)
    cross = p_re * t_re + p_im * t_im
    rat = jnp.where(p_nz & t_nz,
                    jnp.exp((0.5 * (p - 1.0)) * (log_p2 + log_t2)), 0.0)
    lp = p_absp * p_absp + t_absp * t_absp - 2.0 * rat * cross

    # Lane-reduced (XLU) per-frame columns -> tiny accumulator RMW per step.
    acc_a[...] += jnp.sum(la, axis=1, keepdims=True)
    acc_p[...] += jnp.sum(lp, axis=1, keepdims=True)
    acc_os[...] += jnp.sum(los, axis=1, keepdims=True)
    acc_pp[...] += jnp.sum(p_absp, axis=1, keepdims=True)

    @pl.when(j == pl.num_programs(1) - 1)
    def _final():
        s_a = jnp.sum(acc_a[...])
        s_p = jnp.sum(acc_p[...])
        s_os = jnp.sum(acc_os[...])
        row_os = acc_os[...] + nyq_os_ref[...]     # add per-frame Nyquist contributions
        row_pp = acc_pp[...] + nyq_pp_ref[...]
        l_d = row_os - gamma * row_pp
        s_ts = jnp.sum(jnp.where(l_d > 0.0, 1.0, 0.0))
        rows = lax.broadcasted_iota(jnp.int32, out_ref.shape, 0)
        lanes = lax.broadcasted_iota(jnp.int32, out_ref.shape, 1)
        blk = jnp.where((rows == 0) & (lanes == 0), s_a,
              jnp.where((rows == 0) & (lanes == 1), s_p,
              jnp.where((rows == 0) & (lanes == 2), s_os,
              jnp.where((rows == 0) & (lanes == 3), s_ts, 0.0))))
        out_ref[...] = blk


@functools.partial(jax.jit, static_argnums=(4, 5, 6, 7, 8, 9, 10))
def _plcpa_asym_res(preds, targets, lengths_arr, total_frames,
                    n_fft, hop, win_length, p, alpha, beta, gamma):
    """One resolution of the loss (equivalent to PLCPA_ASYM.forward)."""
    B, L = preds.shape
    f_bins = n_fft // 2 + 1
    f_half = n_fft // 2
    fb = _FREQ_BLOCK
    n_fblocks = f_half // fb

    # masking (preds *= mask; targets *= mask), emitted directly in compute dtype
    mask = (jnp.arange(L)[None, :] < lengths_arr[:, None]).astype(preds.dtype)
    pm = (preds * mask).astype(_COMPUTE_DTYPE)
    tm = (targets * mask).astype(_COMPUTE_DTYPE)

    # torch.stft framing: center=True reflect padding, hop-strided frames.
    # TODO(synk): build frames inside the kernel from hop-strided slices of a DMA'd
    # waveform slab (memory_space=pl.ANY) to avoid the ~n_fft/hop HBM blow-up here.
    half = n_fft // 2
    T = L // hop + 1
    idx = (jnp.arange(T) * hop)[:, None] + jnp.arange(n_fft)[None, :]          # (T, n_fft)
    pframes = jnp.pad(pm, ((0, 0), (half, half)), mode="reflect")[:, idx].reshape(B * T, n_fft)
    tframes = jnp.pad(tm, ((0, 0), (half, half)), mode="reflect")[:, idx].reshape(B * T, n_fft)

    # M (frame) tiling: generation-selected target, >= 2 tiles when possible (megacore).
    M = B * T
    m_target, vmem_limit = _tile_config(n_fft)
    m_tile = min(m_target, max(8, _round_up((M + 1) // 2, 8)))
    m_pad = _round_up(M, m_tile)
    m_tiles = m_pad // m_tile
    if m_pad > M:
        pframes = jnp.pad(pframes, ((0, m_pad - M), (0, 0)))
        tframes = jnp.pad(tframes, ((0, m_pad - M), (0, 0)))

    cosw, sinw, nyq_col = _windowed_dft_basis(n_fft, win_length)

    # Nyquist bin (f = n_fft/2, imag == 0): tiny JAX-side matvec so the in-kernel
    # frequency extent stays an exact multiple of the 256-lane block (no padded lanes).
    nyq_p = jnp.dot(pframes, nyq_col, preferred_element_type=jnp.float32)      # (m_pad,)
    nyq_t = jnp.dot(tframes, nyq_col, preferred_element_type=jnp.float32)
    ap = jnp.abs(nyq_p)
    at = jnp.abs(nyq_t)
    ap_p = jnp.power(ap, p)                                    # |P_nyq|^p
    at_p = jnp.power(at, p)
    d_ny = ap_p - at_p
    la_ny = jnp.sum(d_ny * d_ny)
    dp_ny = jnp.sign(nyq_p) * ap_p - jnp.sign(nyq_t) * at_p    # |X|^{p-1} X == sign(X)|X|^p
    lp_ny = jnp.sum(dp_ny * dp_ny)
    os_ny = jnp.square(jnp.maximum(d_ny, 0.0))                 # per-frame, feeds the L_d test
    los_ny = jnp.sum(os_ny)
    nyq_os_arr = os_ny[:, None].astype(jnp.float32)            # (m_pad, 1)
    nyq_pp_arr = ap_p[:, None].astype(jnp.float32)             # (m_pad, 1)

    kernel = functools.partial(_plcpa_kernel, float(p), float(gamma), fb)
    out = pl.pallas_call(
        kernel,
        out_shape=jax.ShapeDtypeStruct((m_tiles * 8, 128), jnp.float32),
        grid_spec=pltpu.PrefetchScalarGridSpec(
            num_scalar_prefetch=0,
            grid=(m_tiles, n_fblocks),                                   # frequency innermost
            in_specs=[
                pl.BlockSpec((m_tile, n_fft), lambda i, j: (i, 0)),      # pred frames (resident over j)
                pl.BlockSpec((m_tile, n_fft), lambda i, j: (i, 0)),      # target frames (resident over j)
                pl.BlockSpec((n_fft, f_half), lambda i, j: (0, 0)),      # full cos basis (fetched once)
                pl.BlockSpec((n_fft, f_half), lambda i, j: (0, 0)),      # full sin basis (fetched once)
                pl.BlockSpec((m_tile, 1), lambda i, j: (i, 0)),          # per-frame Nyquist L_os
                pl.BlockSpec((m_tile, 1), lambda i, j: (i, 0)),          # per-frame Nyquist |P|^p
            ],
            out_specs=pl.BlockSpec((8, 128), lambda i, j: (i, 0)),       # per-tile partials (lane-dense)
            scratch_shapes=[pltpu.VMEM((m_tile, 1), jnp.float32) for _ in range(4)],
        ),
        compiler_params=pltpu.CompilerParams(
            dimension_semantics=("parallel", "arbitrary"),
            vmem_limit_bytes=vmem_limit,
        ),
    )(pframes, tframes, cosw, sinw, nyq_os_arr, nyq_pp_arr)

    stats = out.reshape(m_tiles, 8, 128).sum(axis=(0, 1))   # reduce per-tile partials in JAX
    denom = total_frames * float(f_bins)
    L_a = (stats[0] + la_ny) / denom
    L_p = (stats[1] + lp_ny) / denom
    L_ossum = (stats[2] + los_ny) / denom
    tsos = stats[3] / total_frames
    loss = alpha * L_a + (1.0 - alpha) * L_p + beta * L_ossum
    return loss, tsos


def multires_plcpa_asym(preds, targets, lengths,
                        p=0.3, alpha=0.5, beta=0.2, gamma=0.1):
    """Equivalent of MultiResPLCPA_ASYM.forward -> (loss, tsos)."""
    fft_sizes = [1024, 2048, 512]
    hop_sizes = [120, 240, 50]
    win_lengths = [600, 1200, 240]

    # total_frames needs concrete lengths (same as the PyTorch reference's Python loop).
    lengths_np = np.asarray(lengths, dtype=np.int64)
    lengths_arr = jnp.asarray(lengths_np, dtype=jnp.int32)

    loss = jnp.float32(0.0)
    tsos = jnp.float32(0.0)
    for fs, ss, wl in zip(fft_sizes, hop_sizes, win_lengths):
        total_frames = float(sum(int(l) // ss + 1 for l in lengths_np))
        l_r, t_r = _plcpa_asym_res(preds, targets, lengths_arr, total_frames,
                                   fs, ss, wl,
                                   float(p), float(alpha), float(beta), float(gamma))
        loss = loss + l_r
        tsos = tsos + t_r
    return loss, tsos


if __name__ == "__main__":
    key = jax.random.PRNGKey(0)
    k1, k2 = jax.random.split(key)

    B, L = 2, 2048                      # smallest length compatible with n_fft=2048 framing
    preds = jax.random.normal(k1, (B, L), dtype=jnp.float32)
    targets = jax.random.normal(k2, (B, L), dtype=jnp.float32)
    lengths = [2048, 1984]              # second utterance slightly shorter (masked tail)

    loss, tsos = multires_plcpa_asym(preds, targets, lengths,
                                     p=0.3, alpha=0.5, beta=0.2, gamma=0.1)
    jax.block_until_ready((loss, tsos))
    print("KERNEL_OK")
</pallas_src>

<mosaic_0001>
module attributes {stable_mosaic.version = 11 : i64} {
  func.func @_plcpa_kernel(%arg0: i32, %arg1: i32, %arg2: memref<24x1024xbf16, #tpu.memory_space<vmem>>, %arg3: memref<24x1024xbf16, #tpu.memory_space<vmem>>, %arg4: memref<1024x512xbf16, #tpu.memory_space<vmem>>, %arg5: memref<1024x512xbf16, #tpu.memory_space<vmem>>, %arg6: memref<24x1xf32, #tpu.memory_space<vmem>>, %arg7: memref<24x1xf32, #tpu.memory_space<vmem>>, %arg8: memref<8x128xf32, #tpu.memory_space<vmem>>, %arg9: memref<24x1xf32, #tpu.memory_space<vmem>>, %arg10: memref<24x1xf32, #tpu.memory_space<vmem>>, %arg11: memref<24x1xf32, #tpu.memory_space<vmem>>, %arg12: memref<24x1xf32, #tpu.memory_space<vmem>>) attributes {dimension_semantics = [#tpu.dimension_semantics<parallel>, #tpu.dimension_semantics<arbitrary>], iteration_bounds = array<i64: 2, 2>, scalar_prefetch = 0 : i64, scratch_operands = 4 : i64, tpu.core_type = #tpu.core_type<tc>, window_params = [{transform_indices = @transform_0, window_bounds = array<i64: 24, 1024>}, {transform_indices = @transform_1, window_bounds = array<i64: 24, 1024>}, {pipeline_mode = #tpu.pipeline_mode<synchronous>, transform_indices = @transform_2, window_bounds = array<i64: 1024, 512>}, {pipeline_mode = #tpu.pipeline_mode<synchronous>, transform_indices = @transform_3, window_bounds = array<i64: 1024, 512>}, {transform_indices = @transform_4, window_bounds = array<i64: 24, 1>}, {transform_indices = @transform_5, window_bounds = array<i64: 24, 1>}, {transform_indices = @transform_6, window_bounds = array<i64: 8, 128>}]} {
    %c0_i32 = arith.constant 0 : i32
    %0 = arith.cmpi eq, %arg1, %c0_i32 : i32
    %1 = arith.extui %0 : i1 to i32
    %c0_i32_0 = arith.constant 0 : i32
    %2 = arith.cmpi ne, %1, %c0_i32_0 : i32
    scf.if %2 {
      %cst_40 = arith.constant 0.000000e+00 : f32
      %82 = vector.broadcast %cst_40 : f32 to vector<24x1xf32>
      %c0_41 = arith.constant 0 : index
      %c0_42 = arith.constant 0 : index
      %83 = vector.load %arg9[%c0_41, %c0_42] : memref<24x1xf32, #tpu.memory_space<vmem>>, vector<24x1xf32>
      tpu.vector_store %arg9[%c0_41, %c0_42], %82 {strides = array<i32>} : memref<24x1xf32, #tpu.memory_space<vmem>>, vector<24x1xf32>,
      %cst_43 = arith.constant 0.000000e+00 : f32
      %84 = vector.broadcast %cst_43 : f32 to vector<24x1xf32>
      %c0_44 = arith.constant 0 : index
      %c0_45 = arith.constant 0 : index
      %85 = vector.load %arg10[%c0_44, %c0_45] : memref<24x1xf32, #tpu.memory_space<vmem>>, vector<24x1xf32>
      tpu.vector_store %arg10[%c0_44, %c0_45], %84 {strides = array<i32>} : memref<24x1xf32, #tpu.memory_space<vmem>>, vector<24x1xf32>,
      %cst_46 = arith.constant 0.000000e+00 : f32
      %86 = vector.broadcast %cst_46 : f32 to vector<24x1xf32>
      %c0_47 = arith.constant 0 : index
      %c0_48 = arith.constant 0 : index
      %87 = vector.load %arg11[%c0_47, %c0_48] : memref<24x1xf32, #tpu.memory_space<vmem>>, vector<24x1xf32>
      tpu.vector_store %arg11[%c0_47, %c0_48], %86 {strides = array<i32>} : memref<24x1xf32, #tpu.memory_space<vmem>>, vector<24x1xf32>,
      %cst_49 = arith.constant 0.000000e+00 : f32
      %88 = vector.broadcast %cst_49 : f32 to vector<24x1xf32>
      %c0_50 = arith.constant 0 : index
      %c0_51 = arith.constant 0 : index
      %89 = vector.load %arg12[%c0_50, %c0_51] : memref<24x1xf32, #tpu.memory_space<vmem>>, vector<24x1xf32>
      tpu.vector_store %arg12[%c0_50, %c0_51], %88 {strides = array<i32>} : memref<24x1xf32, #tpu.memory_space<vmem>>, vector<24x1xf32>,
    } else {
    }
    %c256_i32 = arith.constant 256 : i32
    %3 = arith.muli %arg1, %c256_i32 : i32
    %4 = tpu.assume_multiple %3, 256 : i32
    %c0 = arith.constant 0 : index
    %5 = arith.index_cast %4 : i32 to index
    %6 = vector.load %arg4[%c0, %5] : memref<1024x512xbf16, #tpu.memory_space<vmem>>, vector<1024x256xbf16>
    %c0_1 = arith.constant 0 : index
    %7 = arith.index_cast %4 : i32 to index
    %8 = vector.load %arg5[%c0_1, %7] : memref<1024x512xbf16, #tpu.memory_space<vmem>>, vector<1024x256xbf16>
    %c0_2 = arith.constant 0 : index
    %c0_3 = arith.constant 0 : index
    %9 = vector.load %arg2[%c0_2, %c0_3] : memref<24x1024xbf16, #tpu.memory_space<vmem>>, vector<24x1024xbf16>
    %c0_4 = arith.constant 0 : index
    %c0_5 = arith.constant 0 : index
    %10 = vector.load %arg3[%c0_4, %c0_5] : memref<24x1024xbf16, #tpu.memory_space<vmem>>, vector<24x1024xbf16>
    %cst = arith.constant dense<0.000000e+00> : vector<24x256xf32>
    %11 = tpu.matmul %9, %6, %cst {dimension_numbers = #tpu.dot_dimension_numbers<[1], [0], [0], [1], [0, 0, 1, 1], [], []>} : vector<24x1024xbf16>, vector<1024x256xbf16>, vector<24x256xf32> -> vector<24x256xf32>
    %cst_6 = arith.constant dense<0.000000e+00> : vector<24x256xf32>
    %12 = tpu.matmul %9, %8, %cst_6 {dimension_numbers = #tpu.dot_dimension_numbers<[1], [0], [0], [1], [0, 0, 1, 1], [], []>} : vector<24x1024xbf16>, vector<1024x256xbf16>, vector<24x256xf32> -> vector<24x256xf32>
    %cst_7 = arith.constant dense<0.000000e+00> : vector<24x256xf32>
    %13 = tpu.matmul %10, %6, %cst_7 {dimension_numbers = #tpu.dot_dimension_numbers<[1], [0], [0], [1], [0, 0, 1, 1], [], []>} : vector<24x1024xbf16>, vector<1024x256xbf16>, vector<24x256xf32> -> vector<24x256xf32>
    %cst_8 = arith.constant dense<0.000000e+00> : vector<24x256xf32>
    %14 = tpu.matmul %10, %8, %cst_8 {dimension_numbers = #tpu.dot_dimension_numbers<[1], [0], [0], [1], [0, 0, 1, 1], [], []>} : vector<24x1024xbf16>, vector<1024x256xbf16>, vector<24x256xf32> -> vector<24x256xf32>
    %15 = arith.mulf %11, %11 : vector<24x256xf32>
    %16 = arith.mulf %12, %12 : vector<24x256xf32>
    %17 = arith.addf %15, %16 : vector<24x256xf32>
    %18 = arith.mulf %13, %13 : vector<24x256xf32>
    %19 = arith.mulf %14, %14 : vector<24x256xf32>
    %20 = arith.addf %18, %19 : vector<24x256xf32>
    %cst_9 = arith.constant 0.000000e+00 : f32
    %21 = vector.broadcast %cst_9 : f32 to vector<24x256xf32>
    %22 = arith.cmpf ogt, %17, %21 : vector<24x256xf32>
    %cst_10 = arith.constant 0.000000e+00 : f32
    %23 = vector.broadcast %cst_10 : f32 to vector<24x256xf32>
    %24 = arith.cmpf ogt, %20, %23 : vector<24x256xf32>
    %25 = math.log %17 : vector<24x256xf32>
    %26 = math.log %20 : vector<24x256xf32>
    %cst_11 = arith.constant 1.500000e-01 : f32
    %27 = vector.broadcast %cst_11 : f32 to vector<24x256xf32>
    %28 = arith.mulf %27, %25 : vector<24x256xf32>
    %29 = math.exp %28 : vector<24x256xf32>
    %cst_12 = arith.constant 0.000000e+00 : f32
    %30 = vector.broadcast %cst_12 : f32 to vector<24x256xf32>
    %31 = arith.select %22, %29, %30 : vector<24x256xi1>, vector<24x256xf32>
    %cst_13 = arith.constant 1.500000e-01 : f32
    %32 = vector.broadcast %cst_13 : f32 to vector<24x256xf32>
    %33 = arith.mulf %32, %26 : vector<24x256xf32>
    %34 = math.exp %33 : vector<24x256xf32>
    %cst_14 = arith.constant 0.000000e+00 : f32
    %35 = vector.broadcast %cst_14 : f32 to vector<24x256xf32>
    %36 = arith.select %24, %34, %35 : vector<24x256xi1>, vector<24x256xf32>
    %37 = arith.subf %31, %36 : vector<24x256xf32>
    %38 = arith.mulf %37, %37 : vector<24x256xf32>
    %cst_15 = arith.constant 0.000000e+00 : f32
    %39 = vector.broadcast %cst_15 : f32 to vector<24x256xf32>
    %40 = arith.maximumf %37, %39 : vector<24x256xf32>
    %41 = arith.mulf %40, %40 : vector<24x256xf32>
    %42 = arith.mulf %11, %13 : vector<24x256xf32>
    %43 = arith.mulf %12, %14 : vector<24x256xf32>
    %44 = arith.addf %42, %43 : vector<24x256xf32>
    %45 = arith.andi %22, %24 : vector<24x256xi1>
    %46 = arith.addf %25, %26 : vector<24x256xf32>
    %cst_16 = arith.constant -3.500000e-01 : f32
    %47 = vector.broadcast %cst_16 : f32 to vector<24x256xf32>
    %48 = arith.mulf %47, %46 : vector<24x256xf32>
    %49 = math.exp %48 : vector<24x256xf32>
    %cst_17 = arith.constant 0.000000e+00 : f32
    %50 = vector.broadcast %cst_17 : f32 to vector<24x256xf32>
    %51 = arith.select %45, %49, %50 : vector<24x256xi1>, vector<24x256xf32>
    %52 = arith.mulf %31, %31 : vector<24x256xf32>
    %53 = arith.mulf %36, %36 : vector<24x256xf32>
    %54 = arith.addf %52, %53 : vector<24x256xf32>
    %cst_18 = arith.constant 2.000000e+00 : f32
    %55 = vector.broadcast %cst_18 : f32 to vector<24x256xf32>
    %56 = arith.mulf %55, %51 : vector<24x256xf32>
    %57 = arith.mulf %56, %44 : vector<24x256xf32>
    %58 = arith.subf %54, %57 : vector<24x256xf32>
    %c0_19 = arith.constant 0 : index
    %c0_20 = arith.constant 0 : index
    %59 = vector.load %arg9[%c0_19, %c0_20] : memref<24x1xf32, #tpu.memory_space<vmem>>, vector<24x1xf32>
    %cst_21 = arith.constant dense<0.000000e+00> : vector<24xf32>
    %60 = vector.multi_reduction <add>, %38, %cst_21 [1] : vector<24x256xf32> to vector<24xf32>
    %61 = vector.shape_cast %60 : vector<24xf32> to vector<24x1xf32>
    %62 = arith.addf %59, %61 : vector<24x1xf32>
    %c0_22 = arith.constant 0 : index
    %c0_23 = arith.constant 0 : index
    %63 = vector.load %arg9[%c0_22, %c0_23] : memref<24x1xf32, #tpu.memory_space<vmem>>, vector<24x1xf32>
    tpu.vector_store %arg9[%c0_22, %c0_23], %62 {strides = array<i32>} : memref<24x1xf32, #tpu.memory_space<vmem>>, vector<24x1xf32>,
    %c0_24 = arith.constant 0 : index
    %c0_25 = arith.constant 0 : index
    %64 = vector.load %arg10[%c0_24, %c0_25] : memref<24x1xf32, #tpu.memory_space<vmem>>, vector<24x1xf32>
    %cst_26 = arith.constant dense<0.000000e+00> : vector<24xf32>
    %65 = vector.multi_reduction <add>, %58, %cst_26 [1] : vector<24x256xf32> to vector<24xf32>
    %66 = vector.shape_cast %65 : vector<24xf32> to vector<24x1xf32>
    %67 = arith.addf %64, %66 : vector<24x1xf32>
    %c0_27 = arith.constant 0 : index
    %c0_28 = arith.constant 0 : index
    %68 = vector.load %arg10[%c0_27, %c0_28] : memref<24x1xf32, #tpu.memory_space<vmem>>, vector<24x1xf32>
    tpu.vector_store %arg10[%c0_27, %c0_28], %67 {strides = array<i32>} : memref<24x1xf32, #tpu.memory_space<vmem>>, vector<24x1xf32>,
    %c0_29 = arith.constant 0 : index
    %c0_30 = arith.constant 0 : index
    %69 = vector.load %arg11[%c0_29, %c0_30] : memref<24x1xf32, #tpu.memory_space<vmem>>, vector<24x1xf32>
    %cst_31 = arith.constant dense<0.000000e+00> : vector<24xf32>
    %70 = vector.multi_reduction <add>, %41, %cst_31 [1] : vector<24x256xf32> to vector<24xf32>
    %71 = vector.shape_cast %70 : vector<24xf32> to vector<24x1xf32>
    %72 = arith.addf %69, %71 : vector<24x1xf32>
    %c0_32 = arith.constant 0 : index
    %c0_33 = arith.constant 0 : index
    %73 = vector.load %arg11[%c0_32, %c0_33] : memref<24x1xf32, #tpu.memory_space<vmem>>, vector<24x1xf32>
    tpu.vector_store %arg11[%c0_32, %c0_33], %72 {strides = array<i32>} : memref<24x1xf32, #tpu.memory_space<vmem>>, vector<24x1xf32>,
    %c0_34 = arith.constant 0 : index
    %c0_35 = arith.constant 0 : index
    %74 = vector.load %arg12[%c0_34, %c0_35] : memref<24x1xf32, #tpu.memory_space<vmem>>, vector<24x1xf32>
    %cst_36 = arith.constant dense<0.000000e+00> : vector<24xf32>
    %75 = vector.multi_reduction <add>, %31, %cst_36 [1] : vector<24x256xf32> to vector<24xf32>
    %76 = vector.shape_cast %75 : vector<24xf32> to vector<24x1xf32>
    %77 = arith.addf %74, %76 : vector<24x1xf32>
    %c0_37 = arith.constant 0 : index
    %c0_38 = arith.constant 0 : index
    %78 = vector.load %arg12[%c0_37, %c0_38] : memref<24x1xf32, #tpu.memory_space<vmem>>, vector<24x1xf32>
    tpu.vector_store %arg12[%c0_37, %c0_38], %77 {strides = array<i32>} : memref<24x1xf32, #tpu.memory_space<vmem>>, vector<24x1xf32>,
    %c1_i32 = arith.constant 1 : i32
    %79 = arith.cmpi eq, %arg1, %c1_i32 : i32
    %80 = arith.extui %79 : i1 to i32
    %c0_i32_39 = arith.constant 0 : i32
    %81 = arith.cmpi ne, %80, %c0_i32_39 : i32
    scf.if %81 {
      %c0_40 = arith.constant 0 : index
      %c0_41 = arith.constant 0 : index
      %82 = vector.load %arg9[%c0_40, %c0_41] : memref<24x1xf32, #tpu.memory_space<vmem>>, vector<24x1xf32>
      %83 = vector.shape_cast %82 : vector<24x1xf32> to vector<1x24x1xf32>
      %cst_42 = arith.constant dense<0.000000e+00> : vector<1xf32>
      %84 = vector.multi_reduction <add>, %83, %cst_42 [1, 2] : vector<1x24x1xf32> to vector<1xf32>
      %85 = vector.shape_cast %84 : vector<1xf32> to vector<1x1x1xf32>
      %86 = vector.extract %85[0, 0, 0] : f32 from vector<1x1x1xf32>
      %c0_43 = arith.constant 0 : index
      %c0_44 = arith.constant 0 : index
      %87 = vector.load %arg10[%c0_43, %c0_44] : memref<24x1xf32, #tpu.memory_space<vmem>>, vector<24x1xf32>
      %88 = vector.shape_cast %87 : vector<24x1xf32> to vector<1x24x1xf32>
      %cst_45 = arith.constant dense<0.000000e+00> : vector<1xf32>
      %89 = vector.multi_reduction <add>, %88, %cst_45 [1, 2] : vector<1x24x1xf32> to vector<1xf32>
      %90 = vector.shape_cast %89 : vector<1xf32> to vector<1x1x1xf32>
      %91 = vector.extract %90[0, 0, 0] : f32 from vector<1x1x1xf32>
      %c0_46 = arith.constant 0 : index
      %c0_47 = arith.constant 0 : index
      %92 = vector.load %arg11[%c0_46, %c0_47] : memref<24x1xf32, #tpu.memory_space<vmem>>, vector<24x1xf32>
      %93 = vector.shape_cast %92 : vector<24x1xf32> to vector<1x24x1xf32>
      %cst_48 = arith.constant dense<0.000000e+00> : vector<1xf32>
      %94 = vector.multi_reduction <add>, %93, %cst_48 [1, 2] : vector<1x24x1xf32> to vector<1xf32>
      %95 = vector.shape_cast %94 : vector<1xf32> to vector<1x1x1xf32>
      %96 = vector.extract %95[0, 0, 0] : f32 from vector<1x1x1xf32>
      %c0_49 = arith.constant 0 : index
      %c0_50 = arith.constant 0 : index
      %97 = vector.load %arg11[%c0_49, %c0_50] : memref<24x1xf32, #tpu.memory_space<vmem>>, vector<24x1xf32>
      %c0_51 = arith.constant 0 : index
      %c0_52 = arith.constant 0 : index
      %98 = vector.load %arg6[%c0_51, %c0_52] : memref<24x1xf32, #tpu.memory_space<vmem>>, vector<24x1xf32>
      %99 = arith.addf %97, %98 : vector<24x1xf32>
      %c0_53 = arith.constant 0 : index
      %c0_54 = arith.constant 0 : index
      %100 = vector.load %arg12[%c0_53, %c0_54] : memref<24x1xf32, #tpu.memory_space<vmem>>, vector<24x1xf32>
      %c0_55 = arith.constant 0 : index
      %c0_56 = arith.constant 0 : index
      %101 = vector.load %arg7[%c0_55, %c0_56] : memref<24x1xf32, #tpu.memory_space<vmem>>, vector<24x1xf32>
      %102 = arith.addf %100, %101 : vector<24x1xf32>
      %cst_57 = arith.constant 1.000000e-01 : f32
      %103 = vector.broadcast %cst_57 : f32 to vector<24x1xf32>
      %104 = arith.mulf %103, %102 : vector<24x1xf32>
      %105 = arith.subf %99, %104 : vector<24x1xf32>
      %cst_58 = arith.constant 0.000000e+00 : f32
      %106 = vector.broadcast %cst_58 : f32 to vector<24x1xf32>
      %107 = arith.cmpf ogt, %105, %106 : vector<24x1xf32>
      %cst_59 = arith.constant 1.000000e+00 : f32
      %cst_60 = arith.constant 0.000000e+00 : f32
      %108 = vector.broadcast %cst_59 : f32 to vector<24x1xf32>
      %109 = vector.broadcast %cst_60 : f32 to vector<24x1xf32>
      %110 = arith.select %107, %108, %109 : vector<24x1xi1>, vector<24x1xf32>
      %111 = vector.shape_cast %110 : vector<24x1xf32> to vector<1x24x1xf32>
      %cst_61 = arith.constant dense<0.000000e+00> : vector<1xf32>
      %112 = vector.multi_reduction <add>, %111, %cst_61 [1, 2] : vector<1x24x1xf32> to vector<1xf32>
      %113 = vector.shape_cast %112 : vector<1xf32> to vector<1x1x1xf32>
      %114 = vector.extract %113[0, 0, 0] : f32 from vector<1x1x1xf32>
      %115 = tpu.iota {dimensions = array<i32: 0>} : vector<8x128xi32>
      %116 = tpu.iota {dimensions = array<i32: 1>} : vector<8x128xi32>
      %c0_i32_62 = arith.constant 0 : i32
      %117 = vector.broadcast %c0_i32_62 : i32 to vector<8x128xi32>
      %118 = arith.cmpi eq, %115, %117 : vector<8x128xi32>
      %c0_i32_63 = arith.constant 0 : i32
      %119 = vector.broadcast %c0_i32_63 : i32 to vector<8x128xi32>
      %120 = arith.cmpi eq, %116, %119 : vector<8x128xi32>
      %121 = arith.andi %118, %120 : vector<8x128xi1>
      %c0_i32_64 = arith.constant 0 : i32
      %122 = vector.broadcast %c0_i32_64 : i32 to vector<8x128xi32>
      %123 = arith.cmpi eq, %115, %122 : vector<8x128xi32>
      %c1_i32_65 = arith.constant 1 : i32
      %124 = vector.broadcast %c1_i32_65 : i32 to vector<8x128xi32>
      %125 = arith.cmpi eq, %116, %124 : vector<8x128xi32>
      %126 = arith.andi %123, %125 : vector<8x128xi1>
      %c0_i32_66 = arith.constant 0 : i32
      %127 = vector.broadcast %c0_i32_66 : i32 to vector<8x128xi32>
      %128 = arith.cmpi eq, %115, %127 : vector<8x128xi32>
      %c2_i32 = arith.constant 2 : i32
      %129 = vector.broadcast %c2_i32 : i32 to vector<8x128xi32>
      %130 = arith.cmpi eq, %116, %129 : vector<8x128xi32>
      %131 = arith.andi %128, %130 : vector<8x128xi1>
      %c0_i32_67 = arith.constant 0 : i32
      %132 = vector.broadcast %c0_i32_67 : i32 to vector<8x128xi32>
      %133 = arith.cmpi eq, %115, %132 : vector<8x128xi32>
      %c3_i32 = arith.constant 3 : i32
      %134 = vector.broadcast %c3_i32 : i32 to vector<8x128xi32>
      %135 = arith.cmpi eq, %116, %134 : vector<8x128xi32>
      %136 = arith.andi %133, %135 : vector<8x128xi1>
      %cst_68 = arith.constant 0.000000e+00 : f32
      %137 = vector.broadcast %114 : f32 to vector<8x128xf32>
      %138 = vector.broadcast %cst_68 : f32 to vector<8x128xf32>
      %139 = arith.select %136, %137, %138 : vector<8x128xi1>, vector<8x128xf32>
      %140 = vector.broadcast %96 : f32 to vector<8x128xf32>
      %141 = arith.select %131, %140, %139 : vector<8x128xi1>, vector<8x128xf32>
      %142 = vector.broadcast %91 : f32 to vector<8x128xf32>
      %143 = arith.select %126, %142, %141 : vector<8x128xi1>, vector<8x128xf32>
      %144 = vector.broadcast %86 : f32 to vector<8x128xf32>
      %145 = arith.select %121, %144, %143 : vector<8x128xi1>, vector<8x128xf32>
      %c0_69 = arith.constant 0 : index
      %c0_70 = arith.constant 0 : index
      %146 = vector.load %arg8[%c0_69, %c0_70] : memref<8x128xf32, #tpu.memory_space<vmem>>, vector<8x128xf32>
      tpu.vector_store %arg8[%c0_69, %c0_70], %145 {strides = array<i32>} : memref<8x128xf32, #tpu.memory_space<vmem>>, vector<8x128xf32>,
    } else {
    }
    return
  }
  func.func @transform_0(%arg0: i32, %arg1: i32) -> (i32, i32) {
    %c0_i32 = arith.constant 0 : i32
    %c0_i32_0 = arith.constant 0 : i32
    return %arg0, %c0_i32 : i32, i32
  }
  func.func @transform_1(%arg0: i32, %arg1: i32) -> (i32, i32) {
    %c0_i32 = arith.constant 0 : i32
    %c0_i32_0 = arith.constant 0 : i32
    return %arg0, %c0_i32 : i32, i32
  }
  func.func @transform_2(%arg0: i32, %arg1: i32) -> (i32, i32) {
    %c0_i32 = arith.constant 0 : i32
    %c0_i32_0 = arith.constant 0 : i32
    %c0_i32_1 = arith.constant 0 : i32
    return %c0_i32, %c0_i32_0 : i32, i32
  }
  func.func @transform_3(%arg0: i32, %arg1: i32) -> (i32, i32) {
    %c0_i32 = arith.constant 0 : i32
    %c0_i32_0 = arith.constant 0 : i32
    %c0_i32_1 = arith.constant 0 : i32
    return %c0_i32, %c0_i32_0 : i32, i32
  }
  func.func @transform_4(%arg0: i32, %arg1: i32) -> (i32, i32) {
    %c0_i32 = arith.constant 0 : i32
    %c0_i32_0 = arith.constant 0 : i32
    return %arg0, %c0_i32 : i32, i32
  }
  func.func @transform_5(%arg0: i32, %arg1: i32) -> (i32, i32) {
    %c0_i32 = arith.constant 0 : i32
    %c0_i32_0 = arith.constant 0 : i32
    return %arg0, %c0_i32 : i32, i32
  }
  func.func @transform_6(%arg0: i32, %arg1: i32) -> (i32, i32) {
    %c0_i32 = arith.constant 0 : i32
    %c0_i32_0 = arith.constant 0 : i32
    return %arg0, %c0_i32 : i32, i32
  }
}

</mosaic_0001>

<bundles_post_ra>
// kernel: _plcpa_asym_res.1
= control target key start
LH: loop header
LB: loop body
LE: loop exit
PB: predicated region body
PF: predicated region fallthrough
CT: control target
= control target key end

     0   :  { %s4456_s21 = smov 0   ;;  %s4458_s22 = smov 0   ;;  %s5926_s0 = inlined_call_operand.vmem [shape: bf16[48,1024], index: 0, kind: input, shape index: {}]   ;;  %s5927_s1 = inlined_call_operand.vmem [shape: bf16[48,1024], index: 1, kind: input, shape index: {}]   ;;  %s5928_s2 = inlined_call_operand.vmem [shape: bf16[1024,512], index: 2, kind: input, shape index: {}]   ;;  %s5929_s3 = inlined_call_operand.vmem [shape: bf16[1024,512], index: 3, kind: input, shape index: {}]   ;;  %s5930_s4 = inlined_call_operand.vmem [shape: f32[48,1], index: 4, kind: input, shape index: {}]   ;;  %s5931_s5 = inlined_call_operand.vmem [shape: f32[48,1], index: 5, kind: input, shape index: {}]   ;;  %s5932_s6 = inlined_call_operand.vmem [shape: f32[16,128], index: 6, kind: output, shape index: {}]  }
   0x1   :  { %s4460_s23 = smov 0   ;;  %s4462_s24 = smov 0  }
   0x2   :  { %s4464_s25 = smov 0  }
   0x3 LB: > { %s25_s26 = sadd.s32 1, %s4409_s23  ;;  %s28_s27 = sadd.s32 1, %s4413_s24  ;;  %s4417_s25 = sphi %s4464_s25, %s16_s25   ;;  %s4413_s24 = sphi %s4462_s24, %s6154_s24   ;;  %s4409_s23 = sphi %s4460_s23, %s6153_s23   ;;  %s4405_s22 = sphi %s4458_s22, %s6152_s22   ;;  %s4401_s21 = sphi %s4456_s21, %s6151_s21  }
   0x4   : > { %p26_p0 = scmp.ge.s32.totalorder %s25_s26, 2  ;;  %p3405_p1 = scmp.ge.s32.totalorder %s4417_s25, 1 }
   0x5   : > { %p260_p2 = scmp.lt.s32.totalorder %s4417_s25, 5 }
   0x6   : > { %s6156_s26 = smov (%p26_p0, %s25_s26), 0  ;;  %s6158_s27 = smov (!%p26_p0, %s28_s27), %s4413_s24 }
   0x7   : > { %p261_p3 = pnand %p3405_p1, %p260_p2  ;;  %p30_p4 = scmp.ge.s32.totalorder %s6158_s27, 2 }
   0x9   : > { %s6160_s27 = smov (%p30_p4, %s6158_s27), 0  ;;  %264 = sbr.rel (%p261_p3) target bundleno = 1180 (0x49c), region = 44 }
   0xe   : > { %s306_s28 = smul.u32 3, %s4405_s22  ;;  %p332_p5 = scmp.lt.s32.totalorder %s4405_s22, 1 }
   0xf   : > { %p3413_p7 = scmp.ne.s32.totalorder %s4401_s21, 0 }
  0x10   : > { %p307_p6 = scmp.lt.s32.totalorder %s306_s28, 5  ;;  %s6162_s22 = smov (!%p332_p5, %s4405_s22), 1 }
  0x11   : > { %s3412_s29 = sshll.u32 %s6162_s22, 3 }
  0x12   : > { %s6164_s28 = smov (!%p307_p6, %s306_s28), 5  ;;  %339 = sbr.rel (%p3413_p7) target bundleno = 30 (0x1e), region = 48 }
  0x13   : > { %s3708_s30 = sshll.u32 %s6164_s28, 5  ;;  %s3410_s7 = sshll.u32 %s6164_s28, 3 }
  0x14   : > { %s4491_s10 = scalar_lea.vmem %s5926_s0, %s3708_s30  ;;  %s4496_s13 = scalar_lea.vmem %s5927_s1, %s3708_s30 }
  0x15   : > { %s4501_s16 = scalar_lea.vmem %s5930_s4, %s3410_s7  ;;  %s4506_s19 = scalar_lea.vmem %s5931_s5, %s3410_s7 }
  0x16   : > { %s4511_s28 = scalar_lea.vmem %s5932_s6, %s3412_s29 }
  0x17   : > { %vm340_vm0 = vcmask 7168   ;;  %v4419_v0 = vmov 0.0  }
  0x18   : > { %341 = vst.msk [vmem:[#allocation2] sm:$0xff] %vm340_vm0, %v4419_v0  ;;  %342 = vst.msk [vmem:[#allocation2 + $0x8] sm:$0xff] %vm340_vm0, %v4419_v0 }
  0x19   : > { %343 = vst.msk [vmem:[#allocation2 + $0x10] sm:$0xff] %vm340_vm0, %v4419_v0  ;;  %344 = vst.msk [vmem:[#allocation3] sm:$0xff] %vm340_vm0, %v4419_v0 }
  0x1a   : > { %345 = vst.msk [vmem:[#allocation3 + $0x8] sm:$0xff] %vm340_vm0, %v4419_v0  ;;  %346 = vst.msk [vmem:[#allocation3 + $0x10] sm:$0xff] %vm340_vm0, %v4419_v0 }
  0x1b   : > { %347 = vst.msk [vmem:[#allocation4] sm:$0xff] %vm340_vm0, %v4419_v0  ;;  %348 = vst.msk [vmem:[#allocation4 + $0x8] sm:$0xff] %vm340_vm0, %v4419_v0 }
  0x1c   : > { %349 = vst.msk [vmem:[#allocation4 + $0x10] sm:$0xff] %vm340_vm0, %v4419_v0  ;;  %350 = vst.msk [vmem:[#allocation5] sm:$0xff] %vm340_vm0, %v4419_v0 }
  0x1d   : > { %351 = vst.msk [vmem:[#allocation5 + $0x8] sm:$0xff] %vm340_vm0, %v4419_v0  ;;  %352 = vst.msk [vmem:[#allocation5 + $0x10] sm:$0xff] %vm340_vm0, %v4419_v0 }
  0x1e PF: > { %s3414_s29 = sshll.u32 %s4401_s21, 8  ;;  %v616_v1 = vld [vmem:[%s4491_s10] sm:$0xff]  ;;  %v617_v3 = vld [vmem:[%s4491_s10 + $0x8] sm:$0xff]  ;;  %vm3121_vm7 = vcmask 7168   ;;  %p3705_p8 = scmp.ne.s32.totalorder %s4401_s21, 1 }
  0x1f   : > { %v620_v2 = vld [vmem:[%s4491_s10 + $0x20] sm:$0xff]  ;;  %s4518_s30 = sshra.s32 %s3414_s29, 7  ;;  %v621_v6 = vld [vmem:[%s4491_s10 + $0x28] sm:$0xff] }
  0x20   : > { %v4520_v4 = vcombine.low %v616_v1, %v620_v2  ;;  %v4522_v5 = vcombine.high %v616_v1, %v620_v2  ;;  %s3415_s7 = sshll.u32 %s4518_s30, 2  ;;  %v4526_v7 = vcombine.low %v617_v3, %v621_v6  ;;  %v4528_v8 = vcombine.high %v617_v3, %v621_v6 }
  0x21   : > { %s4535_s11 = scalar_lea.vmem %s5928_s2, %s3415_s7  ;;  %s4662_s15 = scalar_lea.vmem %s5929_s3, %s3415_s7 }
  0x22   : > { %1380 = vmatprep.mubr.bf16.mxu0 %v4522_v5  ;;  %v3760_v9 = vld [vmem:[%s4535_s11 + $0xe4] ss:$16 sps:$4 sm:$0xff]   ;;  %1431 = vmatprep.mubr.bf16.mxu1 %v4528_v8  ;;  %v3764_v11 = vld [vmem:[%s4535_s11 + $0xe0] ss:$16 sps:$4 sm:$0xff]  }
  0x23   : > { %v3762_v10 = vld [vmem:[%s4535_s11 + $0x2e4] ss:$16 sps:$4 sm:$0xff]   ;;  %1348 = vmatprep.subr.bf16.mxu0 %v3760_v9  ;;  %v3765_v12 = vld [vmem:[%s4535_s11 + $0x2e0] ss:$16 sps:$4 sm:$0xff]  }
  0x24   : > { %1399 = vmatprep.subr.bf16.mxu1 %v3762_v10  ;;  %v3766_v13 = vld [vmem:[%s4535_s11 + $0xc4] ss:$16 sps:$4 sm:$0xff]   ;;  %1349 = vmatpush1.bf16.msra.mxu0 %v3764_v11  ;;  %v3770_v15 = vld [vmem:[%s4535_s11 + $0xc0] ss:$16 sps:$4 sm:$0xff]  }
  0x25   : > { %1400 = vmatpush1.bf16.msra.mxu1 %v3765_v12  ;;  %v3768_v14 = vld [vmem:[%s4535_s11 + $0x2c4] ss:$16 sps:$4 sm:$0xff]   ;;  %1350 = vmatprep.subr.bf16.mxu0 %v3766_v13  ;;  %v3771_v16 = vld [vmem:[%s4535_s11 + $0x2c0] ss:$16 sps:$4 sm:$0xff]  }
  0x26   : > { %1401 = vmatprep.subr.bf16.mxu1 %v3768_v14  ;;  %v3772_v17 = vld [vmem:[%s4535_s11 + $0xa4] ss:$16 sps:$4 sm:$0xff]   ;;  %v3776_v19 = vld [vmem:[%s4535_s11 + $0xa0] ss:$16 sps:$4 sm:$0xff]  }
  0x27   : > { %v3774_v18 = vld [vmem:[%s4535_s11 + $0x2a4] ss:$16 sps:$4 sm:$0xff]   ;;  %v3777_v20 = vld [vmem:[%s4535_s11 + $0x2a0] ss:$16 sps:$4 sm:$0xff]  }
  0x28   : > { %1351 = vmatpush1.bf16.msra.mxu0 %v3770_v15  ;;  %v3778_v21 = vld [vmem:[%s4535_s11 + $0x84] ss:$16 sps:$4 sm:$0xff]   ;;  %v3782_v23 = vld [vmem:[%s4535_s11 + $0x80] ss:$16 sps:$4 sm:$0xff]  }
  0x29   : > { %1402 = vmatpush1.bf16.msra.mxu1 %v3771_v16  ;;  %1352 = vmatprep.subr.bf16.mxu0 %v3772_v17  ;;  %v3780_v22 = vld [vmem:[%s4535_s11 + $0x284] ss:$16 sps:$4 sm:$0xff]   ;;  %v3783_v24 = vld [vmem:[%s4535_s11 + $0x280] ss:$16 sps:$4 sm:$0xff]   ;;  %v625_v16 = vld [vmem:[%s4491_s10 + $0x48] sm:$0xff] }
  0x2a   : > { %1403 = vmatprep.subr.bf16.mxu1 %v3774_v18  ;;  %v3784_v25 = vld [vmem:[%s4535_s11 + $0x64] ss:$16 sps:$4 sm:$0xff]   ;;  %v3788_v27 = vld [vmem:[%s4535_s11 + $0x60] ss:$16 sps:$4 sm:$0xff]  }
  0x2b   : > { %v3786_v26 = vld [vmem:[%s4535_s11 + $0x264] ss:$16 sps:$4 sm:$0xff]   ;;  %v3789_v28 = vld [vmem:[%s4535_s11 + $0x260] ss:$16 sps:$4 sm:$0xff]  }
  0x2c   : > { %1353 = vmatpush1.bf16.msra.mxu0 %v3776_v19  ;;  %v3790_v29 = vld [vmem:[%s4535_s11 + $0x44] ss:$16 sps:$4 sm:$0xff]   ;;  %v3794_v31 = vld [vmem:[%s4535_s11 + $0x40] ss:$16 sps:$4 sm:$0xff]  }
  0x2d   : > { %1404 = vmatpush1.bf16.msra.mxu1 %v3777_v20  ;;  %1354 = vmatprep.subr.bf16.mxu0 %v3778_v21  ;;  %v3792_v30 = vld [vmem:[%s4535_s11 + $0x244] ss:$16 sps:$4 sm:$0xff]   ;;  %v3795_v32 = vld [vmem:[%s4535_s11 + $0x240] ss:$16 sps:$4 sm:$0xff]  }
  0x2e   : > { %1405 = vmatprep.subr.bf16.mxu1 %v3780_v22  ;;  %v3796_v33 = vld [vmem:[%s4535_s11 + $0x24] ss:$16 sps:$4 sm:$0xff]   ;;  %v3800_v35 = vld [vmem:[%s4535_s11 + $0x20] ss:$16 sps:$4 sm:$0xff]   ;;  %v4613_v22 = vcombine.high %v625_v16, %v625_v16 }
  0x2f   : > { %v3798_v34 = vld [vmem:[%s4535_s11 + $0x224] ss:$16 sps:$4 sm:$0xff]   ;;  %v3801_v36 = vld [vmem:[%s4535_s11 + $0x220] ss:$16 sps:$4 sm:$0xff]  }
  0x30   : > { %1355 = vmatpush1.bf16.msra.mxu0 %v3782_v23  ;;  %v3802_v37 = vld [vmem:[%s4535_s11 + $0x4] ss:$16 sps:$4 sm:$0xff]   ;;  %v3806_v39 = vld [vmem:[%s4535_s11] ss:$16 sps:$4 sm:$0xff]  }
  0x31   : > { %1406 = vmatpush1.bf16.msra.mxu1 %v3783_v24  ;;  %1356 = vmatprep.subr.bf16.mxu0 %v3784_v25  ;;  %v3804_v38 = vld [vmem:[%s4535_s11 + $0x204] ss:$16 sps:$4 sm:$0xff]   ;;  %v3807_v40 = vld [vmem:[%s4535_s11 + $0x200] ss:$16 sps:$4 sm:$0xff]  }
  0x32   : > { %1407 = vmatprep.subr.bf16.mxu1 %v3786_v26  ;;  %v3808_v41 = vld [vmem:[%s4535_s11 + $0x1e4] ss:$16 sps:$4 sm:$0xff]   ;;  %v3812_v43 = vld [vmem:[%s4535_s11 + $0x1e0] ss:$16 sps:$4 sm:$0xff]  }
  0x33   : > { %v3810_v42 = vld [vmem:[%s4535_s11 + $0x3e4] ss:$16 sps:$4 sm:$0xff]   ;;  %v3813_v44 = vld [vmem:[%s4535_s11 + $0x3e0] ss:$16 sps:$4 sm:$0xff]  }
  0x34   : > { %1357 = vmatpush1.bf16.msra.mxu0 %v3788_v27  ;;  %v3814_v45 = vld [vmem:[%s4535_s11 + $0x1c4] ss:$16 sps:$4 sm:$0xff]   ;;  %v3818_v47 = vld [vmem:[%s4535_s11 + $0x1c0] ss:$16 sps:$4 sm:$0xff]  }
  0x35   : > { %1408 = vmatpush1.bf16.msra.mxu1 %v3789_v28  ;;  %1358 = vmatprep.subr.bf16.mxu0 %v3790_v29  ;;  %v3816_v46 = vld [vmem:[%s4535_s11 + $0x3c4] ss:$16 sps:$4 sm:$0xff]   ;;  %v3819_v48 = vld [vmem:[%s4535_s11 + $0x3c0] ss:$16 sps:$4 sm:$0xff]  }
  0x36   : > { %1409 = vmatprep.subr.bf16.mxu1 %v3792_v30  ;;  %v3820_v49 = vld [vmem:[%s4535_s11 + $0x1a4] ss:$16 sps:$4 sm:$0xff]   ;;  %v3824_v51 = vld [vmem:[%s4535_s11 + $0x1a0] ss:$16 sps:$4 sm:$0xff]  }
  0x37   : > { %v3822_v50 = vld [vmem:[%s4535_s11 + $0x3a4] ss:$16 sps:$4 sm:$0xff]   ;;  %v3825_v52 = vld [vmem:[%s4535_s11 + $0x3a0] ss:$16 sps:$4 sm:$0xff]  }
  0x38   : > { %1359 = vmatpush1.bf16.msra.mxu0 %v3794_v31  ;;  %v3826_v53 = vld [vmem:[%s4535_s11 + $0x184] ss:$16 sps:$4 sm:$0xff]   ;;  %v3830_v55 = vld [vmem:[%s4535_s11 + $0x180] ss:$16 sps:$4 sm:$0xff]  }
  0x39   : > { %1410 = vmatpush1.bf16.msra.mxu1 %v3795_v32  ;;  %1360 = vmatprep.subr.bf16.mxu0 %v3796_v33  ;;  %v3828_v54 = vld [vmem:[%s4535_s11 + $0x384] ss:$16 sps:$4 sm:$0xff]   ;;  %v3831_v56 = vld [vmem:[%s4535_s11 + $0x380] ss:$16 sps:$4 sm:$0xff]   ;;  %v4633_v32 = vcombine.low %v625_v16, %v625_v16 }
  0x3a   : > { %1411 = vmatprep.subr.bf16.mxu1 %v3798_v34  ;;  %v3832_v57 = vld [vmem:[%s4535_s11 + $0x164] ss:$16 sps:$4 sm:$0xff]   ;;  %v3836_v59 = vld [vmem:[%s4535_s11 + $0x160] ss:$16 sps:$4 sm:$0xff]  }
  0x3b   : > { %v3834_v58 = vld [vmem:[%s4535_s11 + $0x364] ss:$16 sps:$4 sm:$0xff]   ;;  %v3837_v60 = vld [vmem:[%s4535_s11 + $0x360] ss:$16 sps:$4 sm:$0xff]  }
  0x3c   : > { %1361 = vmatpush1.bf16.msra.mxu0 %v3800_v35  ;;  %v3838_v61 = vld [vmem:[%s4535_s11 + $0x144] ss:$16 sps:$4 sm:$0xff]   ;;  %v3842_v63 = vld [vmem:[%s4535_s11 + $0x140] ss:$16 sps:$4 sm:$0xff]  }
  0x3d   : > { %1412 = vmatpush1.bf16.msra.mxu1 %v3801_v36  ;;  %1362 = vmatprep.subr.bf16.mxu0 %v3802_v37  ;;  %v3840_v62 = vld [vmem:[%s4535_s11 + $0x344] ss:$16 sps:$4 sm:$0xff]   ;;  %v3843_v0 = vld [vmem:[%s4535_s11 + $0x340] ss:$16 sps:$4 sm:$0xff]  }
  0x3e   : > { %1413 = vmatprep.subr.bf16.mxu1 %v3804_v38  ;;  %v3844_v1 = vld [vmem:[%s4535_s11 + $0x124] ss:$16 sps:$4 sm:$0xff]   ;;  %v3848_v3 = vld [vmem:[%s4535_s11 + $0x120] ss:$16 sps:$4 sm:$0xff]  }
  0x3f   : > { %v3846_v2 = vld [vmem:[%s4535_s11 + $0x324] ss:$16 sps:$4 sm:$0xff]   ;;  %v3849_v6 = vld [vmem:[%s4535_s11 + $0x320] ss:$16 sps:$4 sm:$0xff]  }
  0x40   : > { %1363 = vmatpush1.bf16.msra.mxu0 %v3806_v39  ;;  %v3850_v9 = vld [vmem:[%s4535_s11 + $0x104] ss:$16 sps:$4 sm:$0xff]   ;;  %v3854_v11 = vld [vmem:[%s4535_s11 + $0x100] ss:$16 sps:$4 sm:$0xff]  }
  0x41   : > { %1414 = vmatpush1.bf16.msra.mxu1 %v3807_v40  ;;  %1364 = vmatprep.subr.bf16.mxu0 %v3808_v41  ;;  %v3852_v10 = vld [vmem:[%s4535_s11 + $0x304] ss:$16 sps:$4 sm:$0xff]   ;;  %v3855_v12 = vld [vmem:[%s4535_s11 + $0x300] ss:$16 sps:$4 sm:$0xff]  }
  0x42   : > { %1415 = vmatprep.subr.bf16.mxu1 %v3810_v42  ;;  %v3858_v13 = vld [vmem:[%s4535_s11 + $0x4e4] ss:$16 sps:$4 sm:$0xff]   ;;  %v3856_v17 = vld [vmem:[%s4535_s11 + $0x4e0] ss:$16 sps:$4 sm:$0xff]  }
  0x43   : > { %v3861_v14 = vld [vmem:[%s4535_s11 + $0x6e4] ss:$16 sps:$4 sm:$0xff]   ;;  %v3859_v18 = vld [vmem:[%s4535_s11 + $0x6e0] ss:$16 sps:$4 sm:$0xff]  }
  0x44   : > { %1365 = vmatpush2.bf16.msra.mxu0 %v3812_v43  ;;  %v624_v15 = vld [vmem:[%s4491_s10 + $0x40] sm:$0xff]  ;;  %v4624_v27 = vld [vmem:[%s4491_s10 + $0x10] sm:$0xff] }
  0x45   : > { %1416 = vmatpush2.bf16.msra.mxu1 %v3813_v44  ;;  %1366 = vmatprep.subr.bf16.mxu0 %v3814_v45  ;;  %v3864_v19 = vld [vmem:[%s4535_s11 + $0x4c4] ss:$16 sps:$4 sm:$0xff]   ;;  %v4611_v21 = vcombine.high %v624_v15, %v624_v15  ;;  %v3862_v23 = vld [vmem:[%s4535_s11 + $0x4c0] ss:$16 sps:$4 sm:$0xff]   ;;  %v4631_v31 = vcombine.low %v624_v15, %v624_v15  ;;  %v4653_v44 = vld [vmem:[%s4491_s10 + $0x18] sm:$0xff] }
  0x46   : > { %1417 = vmatprep.subr.bf16.mxu1 %v3816_v46  ;;  %v3867_v20 = vld [vmem:[%s4535_s11 + $0x6c4] ss:$16 sps:$4 sm:$0xff]   ;;  %v3865_v24 = vld [vmem:[%s4535_s11 + $0x6c0] ss:$16 sps:$4 sm:$0xff]  }
  0x47   : > { %v3870_v25 = vld [vmem:[%s4535_s11 + $0x4a4] ss:$16 sps:$4 sm:$0xff]   ;;  %v3868_v29 = vld [vmem:[%s4535_s11 + $0x4a0] ss:$16 sps:$4 sm:$0xff]  }
  0x48   : > { %1367 = vmatpush2.bf16.msra.mxu0 %v3818_v47  ;;  %v3873_v26 = vld [vmem:[%s4535_s11 + $0x6a4] ss:$16 sps:$4 sm:$0xff]   ;;  %v3871_v30 = vld [vmem:[%s4535_s11 + $0x6a0] ss:$16 sps:$4 sm:$0xff]  }
  0x49   : > { %1418 = vmatpush2.bf16.msra.mxu1 %v3819_v48  ;;  %1368 = vmatprep.subr.bf16.mxu0 %v3820_v49  ;;  %v4627_v28 = vld [vmem:[%s4491_s10 + $0x30] sm:$0xff]  ;;  %v4667_v49 = vld [vmem:[%s4491_s10 + $0x38] sm:$0xff] }
  0x4a   : > { %1419 = vmatprep.subr.bf16.mxu1 %v3822_v50  ;;  %v3876_v33 = vld [vmem:[%s4535_s11 + $0x484] ss:$16 sps:$4 sm:$0xff]   ;;  %v4639_v35 = vcombine.high %v4624_v27, %v4627_v28  ;;  %v3874_v36 = vld [vmem:[%s4535_s11 + $0x480] ss:$16 sps:$4 sm:$0xff]   ;;  %v4671_v50 = vcombine.high %v4653_v44, %v4667_v49 }
  0x4b   : > { %v3879_v34 = vld [vmem:[%s4535_s11 + $0x684] ss:$16 sps:$4 sm:$0xff]   ;;  %v3877_v37 = vld [vmem:[%s4535_s11 + $0x680] ss:$16 sps:$4 sm:$0xff]  }
  0x4c   : > { %1369 = vmatpush2.bf16.msra.mxu0 %v3824_v51  ;;  %v3882_v38 = vld [vmem:[%s4535_s11 + $0x464] ss:$16 sps:$4 sm:$0xff]   ;;  %v3880_v40 = vld [vmem:[%s4535_s11 + $0x460] ss:$16 sps:$4 sm:$0xff]  }
  0x4d   : > { %1420 = vmatpush2.bf16.msra.mxu1 %v3825_v52  ;;  %1370 = vmatprep.subr.bf16.mxu0 %v3826_v53  ;;  %v3885_v39 = vld [vmem:[%s4535_s11 + $0x664] ss:$16 sps:$4 sm:$0xff]   ;;  %v3883_v41 = vld [vmem:[%s4535_s11 + $0x660] ss:$16 sps:$4 sm:$0xff]  }
  0x4e   : > { %1421 = vmatprep.subr.bf16.mxu1 %v3828_v54  ;;  %v3888_v42 = vld [vmem:[%s4535_s11 + $0x444] ss:$16 sps:$4 sm:$0xff]   ;;  %v3886_v45 = vld [vmem:[%s4535_s11 + $0x440] ss:$16 sps:$4 sm:$0xff]  }
  0x4f   : > { %v3891_v43 = vld [vmem:[%s4535_s11 + $0x644] ss:$16 sps:$4 sm:$0xff]   ;;  %v3889_v46 = vld [vmem:[%s4535_s11 + $0x640] ss:$16 sps:$4 sm:$0xff]  }
  0x50   : > { %1371 = vmatpush2.bf16.msra.mxu0 %v3830_v55  ;;  %v3894_v47 = vld [vmem:[%s4535_s11 + $0x424] ss:$16 sps:$4 sm:$0xff]   ;;  %v3892_v51 = vld [vmem:[%s4535_s11 + $0x420] ss:$16 sps:$4 sm:$0xff]  }
  0x51   : > { %1422 = vmatpush2.bf16.msra.mxu1 %v3831_v56  ;;  %1372 = vmatprep.subr.bf16.mxu0 %v3832_v57  ;;  %v3897_v48 = vld [vmem:[%s4535_s11 + $0x624] ss:$16 sps:$4 sm:$0xff]   ;;  %v3895_v52 = vld [vmem:[%s4535_s11 + $0x620] ss:$16 sps:$4 sm:$0xff]  }
  0x52   : > { %1423 = vmatprep.subr.bf16.mxu1 %v3834_v58  ;;  %v3900_v53 = vld [vmem:[%s4535_s11 + $0x404] ss:$16 sps:$4 sm:$0xff]   ;;  %v3898_v55 = vld [vmem:[%s4535_s11 + $0x400] ss:$16 sps:$4 sm:$0xff]  }
  0x53   : > { %v3903_v54 = vld [vmem:[%s4535_s11 + $0x604] ss:$16 sps:$4 sm:$0xff]   ;;  %v3901_v56 = vld [vmem:[%s4535_s11 + $0x600] ss:$16 sps:$4 sm:$0xff]  }
  0x54   : > { %1373 = vmatpush2.bf16.msra.mxu0 %v3836_v59  ;;  %v3906_v57 = vld [vmem:[%s4535_s11 + $0x5e4] ss:$16 sps:$4 sm:$0xff]   ;;  %v3904_v59 = vld [vmem:[%s4535_s11 + $0x5e0] ss:$16 sps:$4 sm:$0xff]  }
  0x55   : > { %1424 = vmatpush2.bf16.msra.mxu1 %v3837_v60  ;;  %1374 = vmatprep.subr.bf16.mxu0 %v3838_v61  ;;  %v3909_v58 = vld [vmem:[%s4535_s11 + $0x7e4] ss:$16 sps:$4 sm:$0xff]   ;;  %v3907_v60 = vld [vmem:[%s4535_s11 + $0x7e0] ss:$16 sps:$4 sm:$0xff]  }
  0x56   : > { %1425 = vmatprep.subr.bf16.mxu1 %v3840_v62  ;;  %v3912_v61 = vld [vmem:[%s4535_s11 + $0x5c4] ss:$16 sps:$4 sm:$0xff]   ;;  %v3928_v15 = vld [vmem:[%s4535_s11 + $0x560] ss:$16 sps:$4 sm:$0xff]  }
  0x57   : > { %v3915_v62 = vld [vmem:[%s4535_s11 + $0x7c4] ss:$16 sps:$4 sm:$0xff]   ;;  %v3931_v16 = vld [vmem:[%s4535_s11 + $0x760] ss:$16 sps:$4 sm:$0xff]  }
  0x58   : > { %1375 = vmatpush2.bf16.msra.mxu0 %v3842_v63  ;;  %v3910_v63 = vld [vmem:[%s4535_s11 + $0x5c0] ss:$16 sps:$4 sm:$0xff]  }
  0x59   : > { %1426 = vmatpush2.bf16.msra.mxu1 %v3843_v0  ;;  %1376 = vmatprep.subr.bf16.mxu0 %v3844_v1  ;;  %v3913_v0 = vld [vmem:[%s4535_s11 + $0x7c0] ss:$16 sps:$4 sm:$0xff]   ;;  %v3918_v1 = vld [vmem:[%s4535_s11 + $0x5a4] ss:$16 sps:$4 sm:$0xff]  }
  0x5a   : > { %1427 = vmatprep.subr.bf16.mxu1 %v3846_v2  ;;  %v3921_v2 = vld [vmem:[%s4535_s11 + $0x7a4] ss:$16 sps:$4 sm:$0xff]  }
  0x5c   : > { %1377 = vmatpush2.bf16.msra.mxu0 %v3848_v3  ;;  %v3916_v3 = vld [vmem:[%s4535_s11 + $0x5a0] ss:$16 sps:$4 sm:$0xff]  }
  0x5d   : > { %1428 = vmatpush2.bf16.msra.mxu1 %v3849_v6  ;;  %1378 = vmatprep.subr.bf16.mxu0 %v3850_v9  ;;  %v3919_v6 = vld [vmem:[%s4535_s11 + $0x7a0] ss:$16 sps:$4 sm:$0xff]   ;;  %v3924_v9 = vld [vmem:[%s4535_s11 + $0x584] ss:$16 sps:$4 sm:$0xff]  }
  0x5e   : > { %1429 = vmatprep.subr.bf16.mxu1 %v3852_v10  ;;  %v3927_v10 = vld [vmem:[%s4535_s11 + $0x784] ss:$16 sps:$4 sm:$0xff]  }
  0x60   : > { %1379 = vmatpush2.bf16.msra.mxu0 %v3854_v11  ;;  %v3922_v11 = vld [vmem:[%s4535_s11 + $0x580] ss:$16 sps:$4 sm:$0xff]  }
  0x61   : > { %1430 = vmatpush2.bf16.msra.mxu1 %v3855_v12  ;;  %1450 = vmatprep.subr.bf16.mxu0 %v3858_v13  ;;  %v3925_v12 = vld [vmem:[%s4535_s11 + $0x780] ss:$16 sps:$4 sm:$0xff]   ;;  %v3930_v13 = vld [vmem:[%s4535_s11 + $0x564] ss:$16 sps:$4 sm:$0xff]  }
  0x62   : > { %1501 = vmatprep.subr.bf16.mxu1 %v3861_v14  ;;  %v3933_v14 = vld [vmem:[%s4535_s11 + $0x764] ss:$16 sps:$4 sm:$0xff]  }
  0x63   : > { %1381 = vmatmul.mubr.bf16.vlgmr.msra.gmra.mxu0 %v4520_v4 }
  0x64   : > { %1432 = vmatmul.mubr.bf16.vlgmr.msra.gmra.mxu1 %v4526_v7  ;;  %1451 = vmatpush1.bf16.msra.mxu0 %v3856_v17  ;;  %v3939_v17 = vld [vmem:[%s4535_s11 + $0x544] ss:$16 sps:$4 sm:$0xff]  }
  0x65   : > { %1502 = vmatpush1.bf16.msra.mxu1 %v3859_v18  ;;  %1452 = vmatprep.subr.bf16.mxu0 %v3864_v19  ;;  %v3942_v18 = vld [vmem:[%s4535_s11 + $0x744] ss:$16 sps:$4 sm:$0xff]   ;;  %v3937_v19 = vld [vmem:[%s4535_s11 + $0x540] ss:$16 sps:$4 sm:$0xff]  }
  0x66   : > { %1503 = vmatprep.subr.bf16.mxu1 %v3867_v20  ;;  %1390 = vmatprep.mubr.bf16.mxu0 %v4611_v21  ;;  %v3940_v20 = vld [vmem:[%s4535_s11 + $0x740] ss:$16 sps:$4 sm:$0xff]  }
  0x67   : > { %1441 = vmatprep.mubr.bf16.mxu1 %v4613_v22 }
  0x68   : > { %1453 = vmatpush1.bf16.msra.mxu0 %v3862_v23  ;;  %v3946_v23 = vld [vmem:[%s4535_s11 + $0x524] ss:$16 sps:$4 sm:$0xff]  }
  0x69   : > { %1504 = vmatpush1.bf16.msra.mxu1 %v3865_v24  ;;  %1454 = vmatprep.subr.bf16.mxu0 %v3870_v25  ;;  %v3949_v24 = vld [vmem:[%s4535_s11 + $0x724] ss:$16 sps:$4 sm:$0xff]   ;;  %v3944_v25 = vld [vmem:[%s4535_s11 + $0x520] ss:$16 sps:$4 sm:$0xff]  }
  0x6a   : > { %1505 = vmatprep.subr.bf16.mxu1 %v3873_v26  ;;  %v3947_v26 = vld [vmem:[%s4535_s11 + $0x720] ss:$16 sps:$4 sm:$0xff]  }
  0x6b   : > { %1391 = vmatmul.mubr.bf16.gmra.mxu0 %v4631_v31 }
  0x6c   : > { %1442 = vmatmul.mubr.bf16.gmra.mxu1 %v4633_v32  ;;  %1455 = vmatpush1.bf16.msra.mxu0 %v3868_v29  ;;  %v3952_v29 = vld [vmem:[%s4535_s11 + $0x504] ss:$16 sps:$4 sm:$0xff]  }
  0x6d   : > { %1506 = vmatpush1.bf16.msra.mxu1 %v3871_v30  ;;  %1456 = vmatprep.subr.bf16.mxu0 %v3876_v33  ;;  %v3955_v30 = vld [vmem:[%s4535_s11 + $0x704] ss:$16 sps:$4 sm:$0xff]   ;;  %v3950_v33 = vld [vmem:[%s4535_s11 + $0x500] ss:$16 sps:$4 sm:$0xff]  }
  0x6e   : > { %1507 = vmatprep.subr.bf16.mxu1 %v3879_v34  ;;  %1482 = vmatprep.mubr.bf16.mxu0 %v4639_v35  ;;  %v3953_v34 = vld [vmem:[%s4535_s11 + $0x700] ss:$16 sps:$4 sm:$0xff]  }
  0x6f   : > { %1533 = vmatprep.mubr.bf16.mxu1 %v4671_v50 }
  0x70   : > { %1457 = vmatpush1.bf16.msra.mxu0 %v3874_v36  ;;  %v3958_v36 = vld [vmem:[%s4662_s15 + $0xe4] ss:$16 sps:$4 sm:$0xff]  }
  0x71   : > { %1508 = vmatpush1.bf16.msra.mxu1 %v3877_v37  ;;  %1458 = vmatprep.subr.bf16.mxu0 %v3882_v38  ;;  %v3961_v37 = vld [vmem:[%s4662_s15 + $0x2e4] ss:$16 sps:$4 sm:$0xff]   ;;  %v3956_v38 = vld [vmem:[%s4662_s15 + $0xe0] ss:$16 sps:$4 sm:$0xff]  }
  0x72   : > { %1509 = vmatprep.subr.bf16.mxu1 %v3885_v39  ;;  %v4717_v39 = vcombine.low %v4624_v27, %v4627_v28  ;;  %v3962_v28 = vld [vmem:[%s4662_s15 + $0xc0] ss:$16 sps:$4 sm:$0xff]  }
  0x74   : > { %1459 = vmatpush1.bf16.msra.mxu0 %v3880_v40  ;;  %v4721_v40 = vcombine.low %v4653_v44, %v4667_v49  ;;  %v3965_v44 = vld [vmem:[%s4662_s15 + $0x2c0] ss:$16 sps:$4 sm:$0xff]   ;;  %v3975_v49 = vld [vmem:[%s4662_s15 + $0x2a4] ss:$16 sps:$4 sm:$0xff]  }
  0x75   : > { %1510 = vmatpush1.bf16.msra.mxu1 %v3883_v41  ;;  %1460 = vmatprep.subr.bf16.mxu0 %v3888_v42  ;;  %v626_v41 = vld [vmem:[%s4491_s10 + $0x50] sm:$0xff]  ;;  %v627_v42 = vld [vmem:[%s4491_s10 + $0x58] sm:$0xff] }
  0x76   : > { %1511 = vmatprep.subr.bf16.mxu1 %v3891_v43  ;;  %v3959_v43 = vld [vmem:[%s4662_s15 + $0x2e0] ss:$16 sps:$4 sm:$0xff]   ;;  %v4730_v27 = vcombine.high %v627_v42, %v627_v42 }
  0x78   : > { %1461 = vmatpush1.bf16.msra.mxu0 %v3886_v45  ;;  %v3964_v45 = vld [vmem:[%s4662_s15 + $0xc4] ss:$16 sps:$4 sm:$0xff]  }
  0x79   : > { %1512 = vmatpush1.bf16.msra.mxu1 %v3889_v46  ;;  %1462 = vmatprep.subr.bf16.mxu0 %v3894_v47  ;;  %v3967_v46 = vld [vmem:[%s4662_s15 + $0x2c4] ss:$16 sps:$4 sm:$0xff]   ;;  %v4728_v47 = vcombine.high %v626_v41, %v626_v41 }
  0x7a   : > { %1513 = vmatprep.subr.bf16.mxu1 %v3897_v48  ;;  %v3972_v48 = vld [vmem:[%s4662_s15 + $0xa4] ss:$16 sps:$4 sm:$0xff]  }
  0x7c   : > { %1463 = vmatpush1.bf16.msra.mxu0 %v3892_v51  ;;  %v4740_v51 = vcombine.low %v626_v41, %v626_v41  ;;  %v4847_v41 = vld [vmem:[%s4662_s15 + $0x360] ss:$16 sps:$4 sm:$0xff]  }
  0x7d   : > { %1514 = vmatpush1.bf16.msra.mxu1 %v3895_v52  ;;  %1464 = vmatprep.subr.bf16.mxu0 %v3900_v53  ;;  %v3970_v52 = vld [vmem:[%s4662_s15 + $0xa0] ss:$16 sps:$4 sm:$0xff]   ;;  %v4743_v53 = vcombine.low %v627_v42, %v627_v42  ;;  %v4852_v42 = vld [vmem:[%s4662_s15 + $0x144] ss:$16 sps:$4 sm:$0xff]  }
  0x7e   : > { %1515 = vmatprep.subr.bf16.mxu1 %v3903_v54  ;;  %v3973_v54 = vld [vmem:[%s4662_s15 + $0x2a0] ss:$16 sps:$4 sm:$0xff]  }
  0x80   : > { %1465 = vmatpush1.bf16.msra.mxu0 %v3898_v55  ;;  %v3980_v55 = vld [vmem:[%s4662_s15 + $0x84] ss:$16 sps:$4 sm:$0xff]  }
  0x81   : > { %1516 = vmatpush1.bf16.msra.mxu1 %v3901_v56  ;;  %1466 = vmatprep.subr.bf16.mxu0 %v3906_v57  ;;  %v3983_v56 = vld [vmem:[%s4662_s15 + $0x284] ss:$16 sps:$4 sm:$0xff]   ;;  %v3978_v57 = vld [vmem:[%s4662_s15 + $0x80] ss:$16 sps:$4 sm:$0xff]  }
  0x82   : > { %1517 = vmatprep.subr.bf16.mxu1 %v3909_v58  ;;  %v3981_v58 = vld [vmem:[%s4662_s15 + $0x280] ss:$16 sps:$4 sm:$0xff]  }
  0x84   : > { %1467 = vmatpush2.bf16.msra.mxu0 %v3904_v59  ;;  %v3986_v59 = vld [vmem:[%s4662_s15 + $0x64] ss:$16 sps:$4 sm:$0xff]  }
  0x85   : > { %1518 = vmatpush2.bf16.msra.mxu1 %v3907_v60  ;;  %1468 = vmatprep.subr.bf16.mxu0 %v3912_v61  ;;  %v3989_v60 = vld [vmem:[%s4662_s15 + $0x264] ss:$16 sps:$4 sm:$0xff]   ;;  %v3984_v61 = vld [vmem:[%s4662_s15 + $0x60] ss:$16 sps:$4 sm:$0xff]  }
  0x86   : > { %1519 = vmatprep.subr.bf16.mxu1 %v3915_v62  ;;  %v3987_v62 = vld [vmem:[%s4662_s15 + $0x260] ss:$16 sps:$4 sm:$0xff]  }
  0x88   : > { %1469 = vmatpush2.bf16.msra.mxu0 %v3910_v63  ;;  %v3992_v63 = vld [vmem:[%s4662_s15 + $0x44] ss:$16 sps:$4 sm:$0xff]  }
  0x89   : > { %1520 = vmatpush2.bf16.msra.mxu1 %v3913_v0  ;;  %1470 = vmatprep.subr.bf16.mxu0 %v3918_v1  ;;  %v3995_v0 = vld [vmem:[%s4662_s15 + $0x244] ss:$16 sps:$4 sm:$0xff]   ;;  %v3990_v1 = vld [vmem:[%s4662_s15 + $0x40] ss:$16 sps:$4 sm:$0xff]  }
  0x8a   : > { %1521 = vmatprep.subr.bf16.mxu1 %v3921_v2  ;;  %v4001_v2 = vld [vmem:[%s4662_s15 + $0x224] ss:$16 sps:$4 sm:$0xff]  }
  0x8c   : > { %1471 = vmatpush2.bf16.msra.mxu0 %v3916_v3  ;;  %v3996_v3 = vld [vmem:[%s4662_s15 + $0x20] ss:$16 sps:$4 sm:$0xff]  }
  0x8d   : > { %1522 = vmatpush2.bf16.msra.mxu1 %v3919_v6  ;;  %1472 = vmatprep.subr.bf16.mxu0 %v3924_v9  ;;  %v3999_v6 = vld [vmem:[%s4662_s15 + $0x220] ss:$16 sps:$4 sm:$0xff]   ;;  %v4004_v9 = vld [vmem:[%s4662_s15 + $0x4] ss:$16 sps:$4 sm:$0xff]  }
  0x8e   : > { %1523 = vmatprep.subr.bf16.mxu1 %v3927_v10  ;;  %v4007_v10 = vld [vmem:[%s4662_s15 + $0x204] ss:$16 sps:$4 sm:$0xff]  }
  0x90   : > { %1473 = vmatpush2.bf16.msra.mxu0 %v3922_v11  ;;  %v4002_v11 = vld [vmem:[%s4662_s15] ss:$16 sps:$4 sm:$0xff]  }
  0x91   : > { %1524 = vmatpush2.bf16.msra.mxu1 %v3925_v12  ;;  %1474 = vmatprep.subr.bf16.mxu0 %v3930_v13  ;;  %v4770_v12 = vld [vmem:[%s4662_s15 + $0x200] ss:$16 sps:$4 sm:$0xff]   ;;  %v4773_v13 = vld [vmem:[%s4662_s15 + $0x1e4] ss:$16 sps:$4 sm:$0xff]  }
  0x92   : > { %1525 = vmatprep.subr.bf16.mxu1 %v3933_v14  ;;  %v4776_v14 = vld [vmem:[%s4662_s15 + $0x3e4] ss:$16 sps:$4 sm:$0xff]  }
  0x94   : > { %1475 = vmatpush2.bf16.msra.mxu0 %v3928_v15  ;;  %v4779_v15 = vld [vmem:[%s4662_s15 + $0x1e0] ss:$16 sps:$4 sm:$0xff]  }
  0x95   : > { %1526 = vmatpush2.bf16.msra.mxu1 %v3931_v16  ;;  %1476 = vmatprep.subr.bf16.mxu0 %v3939_v17  ;;  %v4783_v16 = vld [vmem:[%s4662_s15 + $0x3e0] ss:$16 sps:$4 sm:$0xff]   ;;  %v4786_v17 = vld [vmem:[%s4662_s15 + $0x1c4] ss:$16 sps:$4 sm:$0xff]  }
  0x96   : > { %1527 = vmatprep.subr.bf16.mxu1 %v3942_v18  ;;  %v4791_v18 = vld [vmem:[%s4662_s15 + $0x3c4] ss:$16 sps:$4 sm:$0xff]  }
  0x98   : > { %1477 = vmatpush2.bf16.msra.mxu0 %v3937_v19  ;;  %v4794_v19 = vld [vmem:[%s4662_s15 + $0x1c0] ss:$16 sps:$4 sm:$0xff]  }
  0x99   : > { %1528 = vmatpush2.bf16.msra.mxu1 %v3940_v20  ;;  %1478 = vmatprep.subr.bf16.mxu0 %v3946_v23  ;;  %v4799_v20 = vld [vmem:[%s4662_s15 + $0x3c0] ss:$16 sps:$4 sm:$0xff]   ;;  %v4802_v23 = vld [vmem:[%s4662_s15 + $0x1a4] ss:$16 sps:$4 sm:$0xff]  }
  0x9a   : > { %1529 = vmatprep.subr.bf16.mxu1 %v3949_v24  ;;  %v4807_v24 = vld [vmem:[%s4662_s15 + $0x3a4] ss:$16 sps:$4 sm:$0xff]  }
  0x9c   : > { %1479 = vmatpush2.bf16.msra.mxu0 %v3944_v25  ;;  %v4810_v25 = vld [vmem:[%s4662_s15 + $0x1a0] ss:$16 sps:$4 sm:$0xff]  }
  0x9d   : > { %1530 = vmatpush2.bf16.msra.mxu1 %v3947_v26  ;;  %1480 = vmatprep.subr.bf16.mxu0 %v3952_v29  ;;  %v4815_v26 = vld [vmem:[%s4662_s15 + $0x3a0] ss:$16 sps:$4 sm:$0xff]   ;;  %v4818_v29 = vld [vmem:[%s4662_s15 + $0x184] ss:$16 sps:$4 sm:$0xff]  }
  0x9e   : > { %1531 = vmatprep.subr.bf16.mxu1 %v3955_v30  ;;  %v4823_v30 = vld [vmem:[%s4662_s15 + $0x384] ss:$16 sps:$4 sm:$0xff]  }
  0xa0   : > { %1481 = vmatpush2.bf16.msra.mxu0 %v3950_v33  ;;  %v4828_v33 = vld [vmem:[%s4662_s15 + $0x180] ss:$16 sps:$4 sm:$0xff]  }
  0xa1   : > { %1532 = vmatpush2.bf16.msra.mxu1 %v3953_v34  ;;  %2192 = vmatprep.subr.bf16.mxu0 %v3958_v36  ;;  %v4831_v34 = vld [vmem:[%s4662_s15 + $0x380] ss:$16 sps:$4 sm:$0xff]   ;;  %v4836_v36 = vld [vmem:[%s4662_s15 + $0x164] ss:$16 sps:$4 sm:$0xff]  }
  0xa2   : > { %2243 = vmatprep.subr.bf16.mxu1 %v3961_v37  ;;  %v4839_v37 = vld [vmem:[%s4662_s15 + $0x364] ss:$16 sps:$4 sm:$0xff]  }
  0xa3   : > { %1483 = vmatmul.mubr.bf16.vlgmr.msra.gmra.mxu0 %v4717_v39 }
  0xa4   : > { %1534 = vmatmul.mubr.bf16.vlgmr.msra.gmra.mxu1 %v4721_v40  ;;  %2193 = vmatpush1.bf16.msra.mxu0 %v3956_v38  ;;  %v4844_v38 = vld [vmem:[%s4662_s15 + $0x160] ss:$16 sps:$4 sm:$0xff]  }
  0xa5   : > { %2244 = vmatpush1.bf16.msra.mxu1 %v3959_v43  ;;  %2194 = vmatprep.subr.bf16.mxu0 %v3964_v45  ;;  %v4855_v43 = vld [vmem:[%s4662_s15 + $0x344] ss:$16 sps:$4 sm:$0xff]   ;;  %v4860_v45 = vld [vmem:[%s4662_s15 + $0x140] ss:$16 sps:$4 sm:$0xff]  }
  0xa6   : > { %2245 = vmatprep.subr.bf16.mxu1 %v3967_v46  ;;  %1492 = vmatprep.mubr.bf16.mxu0 %v4728_v47  ;;  %v4863_v46 = vld [vmem:[%s4662_s15 + $0x340] ss:$16 sps:$4 sm:$0xff]  }
  0xa7   : > { %1543 = vmatprep.mubr.bf16.mxu1 %v4730_v27 }
  0xa8   : > { %2195 = vmatpush1.bf16.msra.mxu0 %v3962_v28  ;;  %v4868_v28 = vld [vmem:[%s4662_s15 + $0x124] ss:$16 sps:$4 sm:$0xff]  }
  0xa9   : > { %2246 = vmatpush1.bf16.msra.mxu1 %v3965_v44  ;;  %2196 = vmatprep.subr.bf16.mxu0 %v3972_v48  ;;  %v4871_v44 = vld [vmem:[%s4662_s15 + $0x324] ss:$16 sps:$4 sm:$0xff]   ;;  %v4876_v48 = vld [vmem:[%s4662_s15 + $0x120] ss:$16 sps:$4 sm:$0xff]  }
  0xaa   : > { %2247 = vmatprep.subr.bf16.mxu1 %v3975_v49  ;;  %v4879_v49 = vld [vmem:[%s4662_s15 + $0x320] ss:$16 sps:$4 sm:$0xff]  }
  0xab   : > { %1493 = vmatmul.mubr.bf16.gmra.mxu0 %v4740_v51 }
  0xac   : > { %1544 = vmatmul.mubr.bf16.gmra.mxu1 %v4743_v53  ;;  %2197 = vmatpush1.bf16.msra.mxu0 %v3970_v52  ;;  %v4884_v52 = vld [vmem:[%s4662_s15 + $0x104] ss:$16 sps:$4 sm:$0xff]  }
  0xad   : > { %2248 = vmatpush1.bf16.msra.mxu1 %v3973_v54  ;;  %2198 = vmatprep.subr.bf16.mxu0 %v3980_v55  ;;  %v4887_v54 = vld [vmem:[%s4662_s15 + $0x304] ss:$16 sps:$4 sm:$0xff]   ;;  %v4892_v55 = vld [vmem:[%s4662_s15 + $0x100] ss:$16 sps:$4 sm:$0xff]  }
  0xae   : > { %2249 = vmatprep.subr.bf16.mxu1 %v3983_v56  ;;  %2224 = vmatprep.mubr.bf16.mxu0 %v4522_v5  ;;  %v3993_v5 = vld [vmem:[%s4662_s15 + $0x240] ss:$16 sps:$4 sm:$0xff]  }
  0xaf   : > { %2275 = vmatprep.mubr.bf16.mxu1 %v4528_v8  ;;  %v3998_v8 = vld [vmem:[%s4662_s15 + $0x24] ss:$16 sps:$4 sm:$0xff]   ;;  %v4895_v56 = vld [vmem:[%s4662_s15 + $0x300] ss:$16 sps:$4 sm:$0xff]  }
  0xb0   : > { %2199 = vmatpush1.bf16.msra.mxu0 %v3978_v57  ;;  %v4900_v57 = vld [vmem:[%s4662_s15 + $0x4e4] ss:$16 sps:$4 sm:$0xff]  }
  0xb1   : > { %2250 = vmatpush1.bf16.msra.mxu1 %v3981_v58  ;;  %2200 = vmatprep.subr.bf16.mxu0 %v3986_v59  ;;  %v4903_v58 = vld [vmem:[%s4662_s15 + $0x6e4] ss:$16 sps:$4 sm:$0xff]   ;;  %v4908_v59 = vld [vmem:[%s4662_s15 + $0x4e0] ss:$16 sps:$4 sm:$0xff]  }
  0xb2   : > { %2251 = vmatprep.subr.bf16.mxu1 %v3989_v60  ;;  %v4911_v60 = vld [vmem:[%s4662_s15 + $0x6e0] ss:$16 sps:$4 sm:$0xff]  }
  0xb4   : > { %2201 = vmatpush1.bf16.msra.mxu0 %v3984_v61  ;;  %v4916_v61 = vld [vmem:[%s4662_s15 + $0x4c4] ss:$16 sps:$4 sm:$0xff]  }
  0xb5   : > { %2252 = vmatpush1.bf16.msra.mxu1 %v3987_v62  ;;  %2202 = vmatprep.subr.bf16.mxu0 %v3992_v63  ;;  %6003 = vst [vmem:[#allocation6_spill] sm:$0xff] %v4916_v61  ;;  %v4919_v62 = vld [vmem:[%s4662_s15 + $0x6c4] ss:$16 sps:$4 sm:$0xff]   ;;  %v4926_v63 = vld [vmem:[%s4662_s15 + $0x4c0] ss:$16 sps:$4 sm:$0xff]  }
  0xb6   : > { %2253 = vmatprep.subr.bf16.mxu1 %v3995_v0  ;;  %6004 = vst [vmem:[#allocation7_spill] sm:$0xff] %v4919_v62  ;;  %6005 = vst [vmem:[#allocation8_spill] sm:$0xff] %v4926_v63  ;;  %v4929_v0 = vld [vmem:[%s4662_s15 + $0x6c0] ss:$16 sps:$4 sm:$0xff]  }
  0xb7   : > { %6006 = vst [vmem:[#allocation9_spill] sm:$0xff] %v4929_v0 }
  0xb8   : > { %2203 = vmatpush1.bf16.msra.mxu0 %v3990_v1  ;;  %v4934_v1 = vld [vmem:[%s4662_s15 + $0x4a4] ss:$16 sps:$4 sm:$0xff]  }
  0xb9   : > { %2254 = vmatpush1.bf16.msra.mxu1 %v3993_v5  ;;  %2204 = vmatprep.subr.bf16.mxu0 %v3998_v8  ;;  %6007 = vst [vmem:[#allocation10_spill] sm:$0xff] %v4934_v1  ;;  %v4947_v5 = vld [vmem:[%s4662_s15 + $0x6a0] ss:$16 sps:$4 sm:$0xff]   ;;  %v4952_v8 = vld [vmem:[%s4662_s15 + $0x484] ss:$16 sps:$4 sm:$0xff]  }
  0xba   : > { %2255 = vmatprep.subr.bf16.mxu1 %v4001_v2  ;;  %6010 = vst [vmem:[#allocation13_spill] sm:$0xff] %v4947_v5  ;;  %6011 = vst [vmem:[#allocation14_spill] sm:$0xff] %v4952_v8  ;;  %v4965_v2 = vld [vmem:[%s4662_s15 + $0x680] ss:$16 sps:$4 sm:$0xff]  }
  0xbb   : > { %6014 = vst [vmem:[#allocation17_spill] sm:$0xff] %v4965_v2 }
  0xbc   : > { %2205 = vmatpush1.bf16.msra.mxu0 %v3996_v3  ;;  %v4970_v3 = vld [vmem:[%s4662_s15 + $0x464] ss:$16 sps:$4 sm:$0xff]  }
  0xbd   : > { %2256 = vmatpush1.bf16.msra.mxu1 %v3999_v6  ;;  %2206 = vmatprep.subr.bf16.mxu0 %v4004_v9  ;;  %6015 = vst [vmem:[#allocation18_spill] sm:$0xff] %v4970_v3  ;;  %v4983_v6 = vld [vmem:[%s4662_s15 + $0x660] ss:$16 sps:$4 sm:$0xff]   ;;  %v4988_v9 = vld [vmem:[%s4662_s15 + $0x444] ss:$16 sps:$4 sm:$0xff]  }
  0xbe   : > { %2257 = vmatprep.subr.bf16.mxu1 %v4007_v10  ;;  %6018 = vst [vmem:[#allocation21_spill] sm:$0xff] %v4983_v6  ;;  %6019 = vst [vmem:[#allocation22_spill] sm:$0xff] %v4988_v9  ;;  %v4999_v10 = vld [vmem:[%s4662_s15 + $0x640] ss:$16 sps:$4 sm:$0xff]  }
  0xbf   : > { %6022 = vst [vmem:[#allocation25_spill] sm:$0xff] %v4999_v10 }
  0xc0   : > { %2207 = vmatpush1.bf16.msra.mxu0 %v4002_v11  ;;  %v5004_v11 = vld [vmem:[%s4662_s15 + $0x424] ss:$16 sps:$4 sm:$0xff]  }
  0xc1   : > { %2258 = vmatpush1.bf16.msra.mxu1 %v4770_v12  ;;  %2208 = vmatprep.subr.bf16.mxu0 %v4773_v13  ;;  %6023 = vst [vmem:[#allocation26_spill] sm:$0xff] %v5004_v11 }
  0xc2   : > { %2259 = vmatprep.subr.bf16.mxu1 %v4776_v14 }
  0xc4   : > { %2209 = vmatpush2.bf16.msra.mxu0 %v4779_v15 }
  0xc5   : > { %2260 = vmatpush2.bf16.msra.mxu1 %v4783_v16  ;;  %2210 = vmatprep.subr.bf16.mxu0 %v4786_v17 }
  0xc6   : > { %2261 = vmatprep.subr.bf16.mxu1 %v4791_v18 }
  0xc8   : > { %2211 = vmatpush2.bf16.msra.mxu0 %v4794_v19 }
  0xc9   : > { %2262 = vmatpush2.bf16.msra.mxu1 %v4799_v20  ;;  %2212 = vmatprep.subr.bf16.mxu0 %v4802_v23 }
  0xca   : > { %2263 = vmatprep.subr.bf16.mxu1 %v4807_v24 }
  0xcc   : > { %2213 = vmatpush2.bf16.msra.mxu0 %v4810_v25 }
  0xcd   : > { %2264 = vmatpush2.bf16.msra.mxu1 %v4815_v26  ;;  %2214 = vmatprep.subr.bf16.mxu0 %v4818_v29 }
  0xce   : > { %2265 = vmatprep.subr.bf16.mxu1 %v4823_v30 }
  0xd0   : > { %2215 = vmatpush2.bf16.msra.mxu0 %v4828_v33 }
  0xd1   : > { %2266 = vmatpush2.bf16.msra.mxu1 %v4831_v34  ;;  %2216 = vmatprep.subr.bf16.mxu0 %v4836_v36 }
  0xd2   : > { %2267 = vmatprep.subr.bf16.mxu1 %v4839_v37 }
  0xd4   : > { %2217 = vmatpush2.bf16.msra.mxu0 %v4844_v38 }
  0xd5   : > { %2268 = vmatpush2.bf16.msra.mxu1 %v4847_v41  ;;  %2218 = vmatprep.subr.bf16.mxu0 %v4852_v42 }
  0xd6   : > { %2269 = vmatprep.subr.bf16.mxu1 %v4855_v43 }
  0xd8   : > { %2219 = vmatpush2.bf16.msra.mxu0 %v4860_v45 }
  0xd9   : > { %2270 = vmatpush2.bf16.msra.mxu1 %v4863_v46  ;;  %2220 = vmatprep.subr.bf16.mxu0 %v4868_v28 }
  0xda   : > { %2271 = vmatprep.subr.bf16.mxu1 %v4871_v44 }
  0xdc   : > { %2221 = vmatpush2.bf16.msra.mxu0 %v4876_v48 }
  0xdd   : > { %2272 = vmatpush2.bf16.msra.mxu1 %v4879_v49  ;;  %2222 = vmatprep.subr.bf16.mxu0 %v4884_v52 }
  0xde   : > { %2273 = vmatprep.subr.bf16.mxu1 %v4887_v54 }
  0xe0   : > { %2223 = vmatpush2.bf16.msra.mxu0 %v4892_v55 }
  0xe1   : > { %2274 = vmatpush2.bf16.msra.mxu1 %v4895_v56  ;;  %2294 = vmatprep.subr.bf16.mxu0 %v4900_v57 }
  0xe2   : > { %2345 = vmatprep.subr.bf16.mxu1 %v4903_v58 }
  0xe3   : > { %2225 = vmatmul.mubr.bf16.vlgmr.msra.gmra.mxu0 %v4520_v4  ;;  %v4937_v4 = vld [vmem:[%s4662_s15 + $0x6a4] ss:$16 sps:$4 sm:$0xff]  }
  0xe4   : > { %2276 = vmatmul.mubr.bf16.vlgmr.msra.gmra.mxu1 %v4526_v7  ;;  %2295 = vmatpush1.bf16.msra.mxu0 %v4908_v59  ;;  %6008 = vst [vmem:[#allocation11_spill] sm:$0xff] %v4937_v4  ;;  %v4944_v7 = vld [vmem:[%s4662_s15 + $0x4a0] ss:$16 sps:$4 sm:$0xff]  }
  0xe5   : > { %2346 = vmatpush1.bf16.msra.mxu1 %v4911_v60  ;;  %2296 = vmatprep.subr.bf16.mxu0 %v4916_v61  ;;  %6009 = vst [vmem:[#allocation12_spill] sm:$0xff] %v4944_v7 }
  0xe6   : > { %2347 = vmatprep.subr.bf16.mxu1 %v4919_v62  ;;  %2234 = vmatprep.mubr.bf16.mxu0 %v4611_v21  ;;  %v4955_v21 = vld [vmem:[%s4662_s15 + $0x684] ss:$16 sps:$4 sm:$0xff]  }
  0xe7   : > { %2285 = vmatprep.mubr.bf16.mxu1 %v4613_v22  ;;  %6012 = vst [vmem:[#allocation15_spill] sm:$0xff] %v4955_v21  ;;  %v4962_v22 = vld [vmem:[%s4662_s15 + $0x480] ss:$16 sps:$4 sm:$0xff]   ;;  %v4292_v62 = vld [vmem:[%s4535_s11 + $0x4a4] ss:$16 sps:$4 sm:$0xff]  }
  0xe8   : > { %2297 = vmatpush1.bf16.msra.mxu0 %v4926_v63  ;;  %6013 = vst [vmem:[#allocation16_spill] sm:$0xff] %v4962_v22 }
  0xe9   : > { %2348 = vmatpush1.bf16.msra.mxu1 %v4929_v0  ;;  %2298 = vmatprep.subr.bf16.mxu0 %v4934_v1  ;;  %v4289_v1 = vld [vmem:[%s4535_s11 + $0x6c4] ss:$16 sps:$4 sm:$0xff]  }
  0xea   : > { %2349 = vmatprep.subr.bf16.mxu1 %v4937_v4  ;;  %v4288_v4 = vld [vmem:[%s4535_s11 + $0x4c4] ss:$16 sps:$4 sm:$0xff]  }
  0xeb   : > { %2235 = vmatmul.mubr.bf16.gmra.mxu0 %v4631_v31  ;;  %v4973_v31 = vld [vmem:[%s4662_s15 + $0x664] ss:$16 sps:$4 sm:$0xff]  }
  0xec   : > { %2286 = vmatmul.mubr.bf16.gmra.mxu1 %v4633_v32  ;;  %2299 = vmatpush1.bf16.msra.mxu0 %v4944_v7  ;;  %6016 = vst [vmem:[#allocation19_spill] sm:$0xff] %v4973_v31  ;;  %v4980_v32 = vld [vmem:[%s4662_s15 + $0x460] ss:$16 sps:$4 sm:$0xff]  }
  0xed   : > { %2350 = vmatpush1.bf16.msra.mxu1 %v4947_v5  ;;  %2300 = vmatprep.subr.bf16.mxu0 %v4952_v8  ;;  %6017 = vst [vmem:[#allocation20_spill] sm:$0xff] %v4980_v32  ;;  %v4233_v8 = vld [vmem:[%s4535_s11 + $0x284] ss:$16 sps:$4 sm:$0xff]   ;;  %v4238_v7 = vld [vmem:[%s4535_s11 + $0x60] ss:$16 sps:$4 sm:$0xff]  }
  0xee   : > { %2351 = vmatprep.subr.bf16.mxu1 %v4955_v21  ;;  %2326 = vmatprep.mubr.bf16.mxu0 %v4639_v35  ;;  %v4991_v35 = vld [vmem:[%s4662_s15 + $0x644] ss:$16 sps:$4 sm:$0xff]  }
  0xef   : > { %2377 = vmatprep.mubr.bf16.mxu1 %v4671_v50  ;;  %6020 = vst [vmem:[#allocation23_spill] sm:$0xff] %v4991_v35  ;;  %v4996_v50 = vld [vmem:[%s4662_s15 + $0x440] ss:$16 sps:$4 sm:$0xff]  }
  0xf0   : > { %2301 = vmatpush1.bf16.msra.mxu0 %v4962_v22  ;;  %6021 = vst [vmem:[#allocation24_spill] sm:$0xff] %v4996_v50  ;;  %v4229_v22 = vld [vmem:[%s4535_s11 + $0x2a4] ss:$16 sps:$4 sm:$0xff]  }
  0xf1   : > { %2352 = vmatpush1.bf16.msra.mxu1 %v4965_v2  ;;  %2302 = vmatprep.subr.bf16.mxu0 %v4970_v3  ;;  %v4225_v3 = vld [vmem:[%s4535_s11 + $0x2c4] ss:$16 sps:$4 sm:$0xff]   ;;  %v5189_v2 = vld [vmem:[%s4496_s13 + $0x28] sm:$0xff] }
  0xf2   : > { %2353 = vmatprep.subr.bf16.mxu1 %v4973_v31  ;;  %v5007_v31 = vld [vmem:[%s4662_s15 + $0x624] ss:$16 sps:$4 sm:$0xff]  }
  0xf3   : > { %6024 = vst [vmem:[#allocation27_spill] sm:$0xff] %v5007_v31 }
  0xf4   : > { %2303 = vmatpush1.bf16.msra.mxu0 %v4980_v32  ;;  %v5015_v32 = vld [vmem:[%s4662_s15 + $0x620] ss:$16 sps:$4 sm:$0xff]  }
  0xf5   : > { %2354 = vmatpush1.bf16.msra.mxu1 %v4983_v6  ;;  %2304 = vmatprep.subr.bf16.mxu0 %v4988_v9  ;;  %v5012_v6 = vld [vmem:[%s4662_s15 + $0x420] ss:$16 sps:$4 sm:$0xff]   ;;  %6026 = vst [vmem:[#allocation29_spill] sm:$0xff] %v5015_v32  ;;  %v5023_v9 = vld [vmem:[%s4662_s15 + $0x604] ss:$16 sps:$4 sm:$0xff]  }
  0xf6   : > { %2355 = vmatprep.subr.bf16.mxu1 %v4991_v35  ;;  %6025 = vst [vmem:[#allocation28_spill] sm:$0xff] %v5012_v6  ;;  %v5020_v35 = vld [vmem:[%s4662_s15 + $0x404] ss:$16 sps:$4 sm:$0xff]   ;;  %6028 = vst [vmem:[#allocation31_spill] sm:$0xff] %v5023_v9 }
  0xf7   : > { %6027 = vst [vmem:[#allocation30_spill] sm:$0xff] %v5020_v35 }
  0xf8   : > { %2305 = vmatpush1.bf16.msra.mxu0 %v4996_v50  ;;  %v5031_v50 = vld [vmem:[%s4662_s15 + $0x600] ss:$16 sps:$4 sm:$0xff]  }
  0xf9   : > { %2356 = vmatpush1.bf16.msra.mxu1 %v4999_v10  ;;  %2306 = vmatprep.subr.bf16.mxu0 %v5004_v11  ;;  %v5028_v10 = vld [vmem:[%s4662_s15 + $0x400] ss:$16 sps:$4 sm:$0xff]   ;;  %6030 = vst [vmem:[#allocation33_spill] sm:$0xff] %v5031_v50  ;;  %v5039_v11 = vld [vmem:[%s4662_s15 + $0x7e4] ss:$16 sps:$4 sm:$0xff]  }
  0xfa   : > { %2357 = vmatprep.subr.bf16.mxu1 %v5007_v31  ;;  %6029 = vst [vmem:[#allocation32_spill] sm:$0xff] %v5028_v10  ;;  %v5036_v31 = vld [vmem:[%s4662_s15 + $0x5e4] ss:$16 sps:$4 sm:$0xff]   ;;  %6032 = vst [vmem:[#allocation35_spill] sm:$0xff] %v5039_v11 }
  0xfb   : > { %6031 = vst [vmem:[#allocation34_spill] sm:$0xff] %v5036_v31 }
  0xfc   : > { %2307 = vmatpush1.bf16.msra.mxu0 %v5012_v6  ;;  %v5047_v6 = vld [vmem:[%s4662_s15 + $0x7e0] ss:$16 sps:$4 sm:$0xff]  }
  0xfd   : > { %2358 = vmatpush1.bf16.msra.mxu1 %v5015_v32  ;;  %2308 = vmatprep.subr.bf16.mxu0 %v5020_v35  ;;  %v5044_v32 = vld [vmem:[%s4662_s15 + $0x5e0] ss:$16 sps:$4 sm:$0xff]   ;;  %6034 = vst [vmem:[#allocation37_spill] sm:$0xff] %v5047_v6  ;;  %v5055_v35 = vld [vmem:[%s4662_s15 + $0x7c4] ss:$16 sps:$4 sm:$0xff]  }
  0xfe   : > { %2359 = vmatprep.subr.bf16.mxu1 %v5023_v9  ;;  %6033 = vst [vmem:[#allocation36_spill] sm:$0xff] %v5044_v32  ;;  %v5052_v9 = vld [vmem:[%s4662_s15 + $0x5c4] ss:$16 sps:$4 sm:$0xff]   ;;  %6036 = vst [vmem:[#allocation39_spill] sm:$0xff] %v5055_v35 }
  0xff   : > { %6035 = vst [vmem:[#allocation38_spill] sm:$0xff] %v5052_v9 }
 0x100   : > { %2309 = vmatpush1.bf16.msra.mxu0 %v5028_v10  ;;  %v5063_v10 = vld [vmem:[%s4662_s15 + $0x7c0] ss:$16 sps:$4 sm:$0xff]  }
 0x101   : > { %2360 = vmatpush1.bf16.msra.mxu1 %v5031_v50  ;;  %2310 = vmatprep.subr.bf16.mxu0 %v5036_v31  ;;  %v5060_v50 = vld [vmem:[%s4662_s15 + $0x5c0] ss:$16 sps:$4 sm:$0xff]   ;;  %6038 = vst [vmem:[#allocation41_spill] sm:$0xff] %v5063_v10  ;;  %v5071_v31 = vld [vmem:[%s4662_s15 + $0x7a4] ss:$16 sps:$4 sm:$0xff]  }
 0x102   : > { %2361 = vmatprep.subr.bf16.mxu1 %v5039_v11  ;;  %6037 = vst [vmem:[#allocation40_spill] sm:$0xff] %v5060_v50  ;;  %v5068_v11 = vld [vmem:[%s4662_s15 + $0x5a4] ss:$16 sps:$4 sm:$0xff]   ;;  %6040 = vst [vmem:[#allocation43_spill] sm:$0xff] %v5071_v31 }
 0x103   : > { %6039 = vst [vmem:[#allocation42_spill] sm:$0xff] %v5068_v11 }
 0x104   : > { %2311 = vmatpush2.bf16.msra.mxu0 %v5044_v32  ;;  %v5079_v32 = vld [vmem:[%s4662_s15 + $0x7a0] ss:$16 sps:$4 sm:$0xff]  }
 0x105   : > { %2362 = vmatpush2.bf16.msra.mxu1 %v5047_v6  ;;  %2312 = vmatprep.subr.bf16.mxu0 %v5052_v9  ;;  %v5076_v6 = vld [vmem:[%s4662_s15 + $0x5a0] ss:$16 sps:$4 sm:$0xff]   ;;  %6042 = vst [vmem:[#allocation45_spill] sm:$0xff] %v5079_v32  ;;  %v5087_v9 = vld [vmem:[%s4662_s15 + $0x784] ss:$16 sps:$4 sm:$0xff]  }
 0x106   : > { %2363 = vmatprep.subr.bf16.mxu1 %v5055_v35  ;;  %6041 = vst [vmem:[#allocation44_spill] sm:$0xff] %v5076_v6  ;;  %v5084_v35 = vld [vmem:[%s4662_s15 + $0x584] ss:$16 sps:$4 sm:$0xff]   ;;  %6044 = vst [vmem:[#allocation47_spill] sm:$0xff] %v5087_v9 }
 0x107   : > { %6043 = vst [vmem:[#allocation46_spill] sm:$0xff] %v5084_v35 }
 0x108   : > { %2313 = vmatpush2.bf16.msra.mxu0 %v5060_v50  ;;  %v5095_v50 = vld [vmem:[%s4662_s15 + $0x780] ss:$16 sps:$4 sm:$0xff]  }
 0x109   : > { %2364 = vmatpush2.bf16.msra.mxu1 %v5063_v10  ;;  %2314 = vmatprep.subr.bf16.mxu0 %v5068_v11  ;;  %v5092_v10 = vld [vmem:[%s4662_s15 + $0x580] ss:$16 sps:$4 sm:$0xff]   ;;  %6046 = vst [vmem:[#allocation49_spill] sm:$0xff] %v5095_v50  ;;  %v5103_v11 = vld [vmem:[%s4662_s15 + $0x764] ss:$16 sps:$4 sm:$0xff]  }
 0x10a   : > { %2365 = vmatprep.subr.bf16.mxu1 %v5071_v31  ;;  %6045 = vst [vmem:[#allocation48_spill] sm:$0xff] %v5092_v10  ;;  %v5100_v31 = vld [vmem:[%s4662_s15 + $0x564] ss:$16 sps:$4 sm:$0xff]   ;;  %6048 = vst [vmem:[#allocation51_spill] sm:$0xff] %v5103_v11 }
 0x10b   : > { %6047 = vst [vmem:[#allocation50_spill] sm:$0xff] %v5100_v31 }
 0x10c   : > { %2315 = vmatpush2.bf16.msra.mxu0 %v5076_v6  ;;  %v5111_v6 = vld [vmem:[%s4662_s15 + $0x760] ss:$16 sps:$4 sm:$0xff]  }
 0x10d   : > { %2366 = vmatpush2.bf16.msra.mxu1 %v5079_v32  ;;  %2316 = vmatprep.subr.bf16.mxu0 %v5084_v35  ;;  %v5108_v32 = vld [vmem:[%s4662_s15 + $0x560] ss:$16 sps:$4 sm:$0xff]   ;;  %6050 = vst [vmem:[#allocation53_spill] sm:$0xff] %v5111_v6  ;;  %v5119_v35 = vld [vmem:[%s4662_s15 + $0x744] ss:$16 sps:$4 sm:$0xff]  }
 0x10e   : > { %2367 = vmatprep.subr.bf16.mxu1 %v5087_v9  ;;  %6049 = vst [vmem:[#allocation52_spill] sm:$0xff] %v5108_v32  ;;  %v5116_v9 = vld [vmem:[%s4662_s15 + $0x544] ss:$16 sps:$4 sm:$0xff]   ;;  %6052 = vst [vmem:[#allocation55_spill] sm:$0xff] %v5119_v35 }
 0x10f   : > { %6051 = vst [vmem:[#allocation54_spill] sm:$0xff] %v5116_v9 }
 0x110   : > { %2317 = vmatpush2.bf16.msra.mxu0 %v5092_v10  ;;  %v5127_v10 = vld [vmem:[%s4662_s15 + $0x740] ss:$16 sps:$4 sm:$0xff]  }
 0x111   : > { %2368 = vmatpush2.bf16.msra.mxu1 %v5095_v50  ;;  %2318 = vmatprep.subr.bf16.mxu0 %v5100_v31  ;;  %v5124_v50 = vld [vmem:[%s4662_s15 + $0x540] ss:$16 sps:$4 sm:$0xff]   ;;  %6054 = vst [vmem:[#allocation57_spill] sm:$0xff] %v5127_v10  ;;  %v5135_v31 = vld [vmem:[%s4662_s15 + $0x724] ss:$16 sps:$4 sm:$0xff]  }
 0x112   : > { %2369 = vmatprep.subr.bf16.mxu1 %v5103_v11  ;;  %6053 = vst [vmem:[#allocation56_spill] sm:$0xff] %v5124_v50  ;;  %v5132_v11 = vld [vmem:[%s4662_s15 + $0x524] ss:$16 sps:$4 sm:$0xff]   ;;  %6056 = vst [vmem:[#allocation59_spill] sm:$0xff] %v5135_v31 }
 0x113   : > { %6055 = vst [vmem:[#allocation58_spill] sm:$0xff] %v5132_v11 }
 0x114   : > { %2319 = vmatpush2.bf16.msra.mxu0 %v5108_v32  ;;  %v5143_v32 = vld [vmem:[%s4662_s15 + $0x720] ss:$16 sps:$4 sm:$0xff]  }
 0x115   : > { %2370 = vmatpush2.bf16.msra.mxu1 %v5111_v6  ;;  %2320 = vmatprep.subr.bf16.mxu0 %v5116_v9  ;;  %v5140_v6 = vld [vmem:[%s4662_s15 + $0x520] ss:$16 sps:$4 sm:$0xff]   ;;  %6058 = vst [vmem:[#allocation61_spill] sm:$0xff] %v5143_v32  ;;  %v5148_v9 = vld [vmem:[%s4662_s15 + $0x504] ss:$16 sps:$4 sm:$0xff]  }
 0x116   : > { %2371 = vmatprep.subr.bf16.mxu1 %v5119_v35  ;;  %6057 = vst [vmem:[#allocation60_spill] sm:$0xff] %v5140_v6  ;;  %6059 = vst [vmem:[#allocation62_spill] sm:$0xff] %v5148_v9  ;;  %v5151_v35 = vld [vmem:[%s4662_s15 + $0x704] ss:$16 sps:$4 sm:$0xff]  }
 0x117   : > { %6060 = vst [vmem:[#allocation63_spill] sm:$0xff] %v5151_v35 }
 0x118   : > { %2321 = vmatpush2.bf16.msra.mxu0 %v5124_v50  ;;  %v5156_v50 = vld [vmem:[%s4662_s15 + $0x500] ss:$16 sps:$4 sm:$0xff]  }
 0x119   : > { %2372 = vmatpush2.bf16.msra.mxu1 %v5127_v10  ;;  %2322 = vmatprep.subr.bf16.mxu0 %v5132_v11  ;;  %6061 = vst [vmem:[#allocation64_spill] sm:$0xff] %v5156_v50  ;;  %v5159_v10 = vld [vmem:[%s4662_s15 + $0x700] ss:$16 sps:$4 sm:$0xff]  }
 0x11a   : > { %2373 = vmatprep.subr.bf16.mxu1 %v5135_v31  ;;  %6062 = vst [vmem:[#allocation65_spill] sm:$0xff] %v5159_v10  ;;  %v4220_v31 = vld [vmem:[%s4535_s11 + $0xe4] ss:$16 sps:$4 sm:$0xff]  }
 0x11c   : > { %2323 = vmatpush2.bf16.msra.mxu0 %v5140_v6  ;;  %v4221_v6 = vld [vmem:[%s4535_s11 + $0x2e4] ss:$16 sps:$4 sm:$0xff]  }
 0x11d   : > { %2374 = vmatpush2.bf16.msra.mxu1 %v5143_v32  ;;  %2324 = vmatprep.subr.bf16.mxu0 %v5148_v9 }
 0x11e   : > { %2375 = vmatprep.subr.bf16.mxu1 %v5151_v35  ;;  %v4222_v35 = vld [vmem:[%s4535_s11 + $0xe0] ss:$16 sps:$4 sm:$0xff]  }
 0x120   : > { %2325 = vmatpush2.bf16.msra.mxu0 %v5156_v50 }
 0x121   : > { %2376 = vmatpush2.bf16.msra.mxu1 %v5159_v10  ;;  %2464 = vmatprep.subr.bf16.mxu0 %v4220_v31  ;;  %v4223_v10 = vld [vmem:[%s4535_s11 + $0x2e0] ss:$16 sps:$4 sm:$0xff]  }
 0x122   : > { %2515 = vmatprep.subr.bf16.mxu1 %v4221_v6  ;;  %v4224_v6 = vld [vmem:[%s4535_s11 + $0xc4] ss:$16 sps:$4 sm:$0xff]  }
 0x123   : > { %v1382_v32 = vpop.f32.mrf.mxu0  ;;  %2327 = vmatmul.mubr.bf16.vlgmr.msra.gmra.mxu0 %v4717_v39 }
 0x124   : > { %v1433_v11 = vpop.f32.mrf.mxu1  ;;  %2378 = vmatmul.mubr.bf16.vlgmr.msra.gmra.mxu1 %v4721_v40  ;;  %2465 = vmatpush1.bf16.msra.mxu0 %v4222_v35  ;;  %v5180_v40 = vld [vmem:[%s4496_s13] sm:$0xff] }
 0x125   : > { %v5169_v9 = vadd.f32 %v1433_v11, %v1382_v32  ;;  %2516 = vmatpush1.bf16.msra.mxu1 %v4223_v10  ;;  %v1384_v31 = vpop.f32.mrf.mxu0  ;;  %2466 = vmatprep.subr.bf16.mxu0 %v4224_v6  ;;  %v5183_v10 = vld [vmem:[%s4496_s13 + $0x20] sm:$0xff]  ;;  %v5186_v11 = vld [vmem:[%s4496_s13 + $0x8] sm:$0xff] }
 0x126   : > { %v1435_v50 = vpop.f32.mrf.mxu1  ;;  %2517 = vmatprep.subr.bf16.mxu1 %v4225_v3  ;;  %2336 = vmatprep.mubr.bf16.mxu0 %v4728_v47  ;;  %v4226_v3 = vld [vmem:[%s4535_s11 + $0xc0] ss:$16 sps:$4 sm:$0xff]  }
 0x127   : > { %v5175_v39 = vadd.f32 %v1435_v50, %v1384_v31  ;;  %2387 = vmatprep.mubr.bf16.mxu1 %v4730_v27  ;;  %v1386_v32 = vpop.f32.mrf.mxu0  ;;  %v4227_v50 = vld [vmem:[%s4535_s11 + $0x2c0] ss:$16 sps:$4 sm:$0xff]   ;;  %v4228_v31 = vld [vmem:[%s4535_s11 + $0xa4] ss:$16 sps:$4 sm:$0xff]  }
 0x128   : > { %v1437_v35 = vpop.f32.mrf.mxu1  ;;  %2467 = vmatpush1.bf16.msra.mxu0 %v4226_v3 }
 0x129   : > { %v5191_v6 = vadd.f32 %v1437_v35, %v1386_v32  ;;  %2518 = vmatpush1.bf16.msra.mxu1 %v4227_v50  ;;  %v1388_v47 = vpop.f32.mrf.mxu0  ;;  %2468 = vmatprep.subr.bf16.mxu0 %v4228_v31  ;;  %v5201_v32 = vcombine.high %v5180_v40, %v5183_v10  ;;  %v5205_v35 = vcombine.high %v5186_v11, %v5189_v2  ;;  %v4230_v31 = vld [vmem:[%s4535_s11 + $0xa0] ss:$16 sps:$4 sm:$0xff]  }
 0x12a   : > { %v1439_v27 = vpop.f32.mrf.mxu1  ;;  %2519 = vmatprep.subr.bf16.mxu1 %v4229_v22  ;;  %v4231_v22 = vld [vmem:[%s4535_s11 + $0x2a0] ss:$16 sps:$4 sm:$0xff]  }
 0x12b   : > { %v5197_v21 = vadd.f32 %v1439_v27, %v1388_v47  ;;  %2337 = vmatmul.mubr.bf16.gmra.mxu0 %v4740_v51  ;;  %v1392_v3 = vpop.f32.mrf.mxu0  ;;  %v4232_v27 = vld [vmem:[%s4535_s11 + $0x84] ss:$16 sps:$4 sm:$0xff]  }
 0x12c   : > { %2388 = vmatmul.mubr.bf16.gmra.mxu1 %v4743_v53  ;;  %v1443_v50 = vpop.f32.mrf.mxu1  ;;  %2469 = vmatpush1.bf16.msra.mxu0 %v4230_v31 }
 0x12d   : > { %2520 = vmatpush1.bf16.msra.mxu1 %v4231_v22  ;;  %v5211_v47 = vadd.f32 %v1443_v50, %v1392_v3  ;;  %2470 = vmatprep.subr.bf16.mxu0 %v4232_v27  ;;  %v1394_v5 = vpop.f32.mrf.mxu0  ;;  %v4234_v50 = vld [vmem:[%s4535_s11 + $0x80] ss:$16 sps:$4 sm:$0xff]   ;;  %v4237_v27 = vld [vmem:[%s4535_s11 + $0x264] ss:$16 sps:$4 sm:$0xff]  }
 0x12e   : > { %2521 = vmatprep.subr.bf16.mxu1 %v4233_v8  ;;  %v1445_v51 = vpop.f32.mrf.mxu1  ;;  %2496 = vmatprep.mubr.bf16.mxu0 %v5201_v32  ;;  %v4235_v22 = vld [vmem:[%s4535_s11 + $0x280] ss:$16 sps:$4 sm:$0xff]   ;;  %v4236_v8 = vld [vmem:[%s4535_s11 + $0x64] ss:$16 sps:$4 sm:$0xff]  }
 0x12f   : > { %v5215_v53 = vadd.f32 %v1445_v51, %v1394_v5  ;;  %2547 = vmatprep.mubr.bf16.mxu1 %v5205_v35  ;;  %v1396_v31 = vpop.f32.mrf.mxu0 }
 0x130   : > { %v1447_v3 = vpop.f32.mrf.mxu1  ;;  %2471 = vmatpush1.bf16.msra.mxu0 %v4234_v50  ;;  %v4239_v31 = vld [vmem:[%s4535_s11 + $0x260] ss:$16 sps:$4 sm:$0xff]   ;;  %v4241_v50 = vld [vmem:[%s4535_s11 + $0x244] ss:$16 sps:$4 sm:$0xff]  }
 0x131   : > { %2522 = vmatpush1.bf16.msra.mxu1 %v4235_v22  ;;  %2472 = vmatprep.subr.bf16.mxu0 %v4236_v8  ;;  %v1397_v5 = vpop.f32.mrf.mxu0  ;;  %v4240_v3 = vld [vmem:[%s4535_s11 + $0x44] ss:$16 sps:$4 sm:$0xff]   ;;  %v4242_v22 = vld [vmem:[%s4535_s11 + $0x40] ss:$16 sps:$4 sm:$0xff]  }
 0x132   : > { %2523 = vmatprep.subr.bf16.mxu1 %v4237_v27  ;;  %v1448_v51 = vpop.f32.mrf.mxu1  ;;  %v4243_v8 = vld [vmem:[%s4535_s11 + $0x240] ss:$16 sps:$4 sm:$0xff]   ;;  %v4244_v27 = vld [vmem:[%s4535_s11 + $0x24] ss:$16 sps:$4 sm:$0xff]  }
 0x133   : > { %v4245_v5 = vld [vmem:[%s4535_s11 + $0x224] ss:$16 sps:$4 sm:$0xff]   ;;  %v4247_v51 = vld [vmem:[%s4535_s11 + $0x220] ss:$16 sps:$4 sm:$0xff]  }
 0x134   : > { %2473 = vmatpush1.bf16.msra.mxu0 %v4238_v7  ;;  %v4246_v7 = vld [vmem:[%s4535_s11 + $0x20] ss:$16 sps:$4 sm:$0xff]  }
 0x135   : > { %2524 = vmatpush1.bf16.msra.mxu1 %v4239_v31  ;;  %2474 = vmatprep.subr.bf16.mxu0 %v4240_v3  ;;  %v4248_v31 = vld [vmem:[%s4535_s11 + $0x4] ss:$16 sps:$4 sm:$0xff]  }
 0x136   : > { %2525 = vmatprep.subr.bf16.mxu1 %v4241_v50  ;;  %v4249_v3 = vld [vmem:[%s4535_s11 + $0x204] ss:$16 sps:$4 sm:$0xff]   ;;  %v4250_v50 = vld [vmem:[%s4535_s11] ss:$16 sps:$4 sm:$0xff]  }
 0x138   : > { %2475 = vmatpush1.bf16.msra.mxu0 %v4242_v22  ;;  %v4251_v22 = vld [vmem:[%s4535_s11 + $0x200] ss:$16 sps:$4 sm:$0xff]  }
 0x139   : > { %2526 = vmatpush1.bf16.msra.mxu1 %v4243_v8  ;;  %2476 = vmatprep.subr.bf16.mxu0 %v4244_v27  ;;  %v4252_v8 = vld [vmem:[%s4535_s11 + $0x1e4] ss:$16 sps:$4 sm:$0xff]  }
 0x13a   : > { %2527 = vmatprep.subr.bf16.mxu1 %v4245_v5  ;;  %v4253_v27 = vld [vmem:[%s4535_s11 + $0x3e4] ss:$16 sps:$4 sm:$0xff]   ;;  %v4254_v5 = vld [vmem:[%s4535_s11 + $0x1e0] ss:$16 sps:$4 sm:$0xff]  }
 0x13c   : > { %2477 = vmatpush1.bf16.msra.mxu0 %v4246_v7  ;;  %v4255_v7 = vld [vmem:[%s4535_s11 + $0x3e0] ss:$16 sps:$4 sm:$0xff]  }
 0x13d   : > { %2528 = vmatpush1.bf16.msra.mxu1 %v4247_v51  ;;  %2478 = vmatprep.subr.bf16.mxu0 %v4248_v31  ;;  %v4256_v51 = vld [vmem:[%s4535_s11 + $0x1c4] ss:$16 sps:$4 sm:$0xff]  }
 0x13e   : > { %2529 = vmatprep.subr.bf16.mxu1 %v4249_v3  ;;  %v4257_v31 = vld [vmem:[%s4535_s11 + $0x3c4] ss:$16 sps:$4 sm:$0xff]   ;;  %v4258_v3 = vld [vmem:[%s4535_s11 + $0x1c0] ss:$16 sps:$4 sm:$0xff]  }
 0x140   : > { %2479 = vmatpush1.bf16.msra.mxu0 %v4250_v50  ;;  %v4259_v50 = vld [vmem:[%s4535_s11 + $0x3c0] ss:$16 sps:$4 sm:$0xff]  }
 0x141   : > { %2530 = vmatpush1.bf16.msra.mxu1 %v4251_v22  ;;  %2480 = vmatprep.subr.bf16.mxu0 %v4252_v8  ;;  %v4260_v22 = vld [vmem:[%s4535_s11 + $0x1a4] ss:$16 sps:$4 sm:$0xff]  }
 0x142   : > { %2531 = vmatprep.subr.bf16.mxu1 %v4253_v27  ;;  %v4261_v8 = vld [vmem:[%s4535_s11 + $0x3a4] ss:$16 sps:$4 sm:$0xff]   ;;  %v4262_v27 = vld [vmem:[%s4535_s11 + $0x1a0] ss:$16 sps:$4 sm:$0xff]  }
 0x144   : > { %2481 = vmatpush2.bf16.msra.mxu0 %v4254_v5  ;;  %v4263_v5 = vld [vmem:[%s4535_s11 + $0x3a0] ss:$16 sps:$4 sm:$0xff]  }
 0x145   : > { %2532 = vmatpush2.bf16.msra.mxu1 %v4255_v7  ;;  %2482 = vmatprep.subr.bf16.mxu0 %v4256_v51  ;;  %v4264_v7 = vld [vmem:[%s4535_s11 + $0x184] ss:$16 sps:$4 sm:$0xff]  }
 0x146   : > { %2533 = vmatprep.subr.bf16.mxu1 %v4257_v31  ;;  %v4265_v51 = vld [vmem:[%s4535_s11 + $0x384] ss:$16 sps:$4 sm:$0xff]   ;;  %v4266_v31 = vld [vmem:[%s4535_s11 + $0x180] ss:$16 sps:$4 sm:$0xff]  }
 0x148   : > { %2483 = vmatpush2.bf16.msra.mxu0 %v4258_v3  ;;  %v4267_v3 = vld [vmem:[%s4535_s11 + $0x380] ss:$16 sps:$4 sm:$0xff]  }
 0x149   : > { %2534 = vmatpush2.bf16.msra.mxu1 %v4259_v50  ;;  %2484 = vmatprep.subr.bf16.mxu0 %v4260_v22  ;;  %v4268_v50 = vld [vmem:[%s4535_s11 + $0x164] ss:$16 sps:$4 sm:$0xff]  }
 0x14a   : > { %2535 = vmatprep.subr.bf16.mxu1 %v4261_v8  ;;  %v4269_v22 = vld [vmem:[%s4535_s11 + $0x364] ss:$16 sps:$4 sm:$0xff]   ;;  %v4270_v8 = vld [vmem:[%s4535_s11 + $0x160] ss:$16 sps:$4 sm:$0xff]  }
 0x14c   : > { %2485 = vmatpush2.bf16.msra.mxu0 %v4262_v27  ;;  %v4271_v27 = vld [vmem:[%s4535_s11 + $0x360] ss:$16 sps:$4 sm:$0xff]  }
 0x14d   : > { %2536 = vmatpush2.bf16.msra.mxu1 %v4263_v5  ;;  %2486 = vmatprep.subr.bf16.mxu0 %v4264_v7  ;;  %v4272_v5 = vld [vmem:[%s4535_s11 + $0x144] ss:$16 sps:$4 sm:$0xff]  }
 0x14e   : > { %2537 = vmatprep.subr.bf16.mxu1 %v4265_v51  ;;  %v4273_v7 = vld [vmem:[%s4535_s11 + $0x344] ss:$16 sps:$4 sm:$0xff]   ;;  %v4274_v51 = vld [vmem:[%s4535_s11 + $0x140] ss:$16 sps:$4 sm:$0xff]  }
 0x150   : > { %2487 = vmatpush2.bf16.msra.mxu0 %v4266_v31  ;;  %v4275_v31 = vld [vmem:[%s4535_s11 + $0x340] ss:$16 sps:$4 sm:$0xff]  }
 0x151   : > { %2538 = vmatpush2.bf16.msra.mxu1 %v4267_v3  ;;  %2488 = vmatprep.subr.bf16.mxu0 %v4268_v50  ;;  %v4276_v3 = vld [vmem:[%s4535_s11 + $0x124] ss:$16 sps:$4 sm:$0xff]  }
 0x152   : > { %2539 = vmatprep.subr.bf16.mxu1 %v4269_v22  ;;  %v4277_v50 = vld [vmem:[%s4535_s11 + $0x324] ss:$16 sps:$4 sm:$0xff]   ;;  %v4278_v22 = vld [vmem:[%s4535_s11 + $0x120] ss:$16 sps:$4 sm:$0xff]  }
 0x154   : > { %2489 = vmatpush2.bf16.msra.mxu0 %v4270_v8  ;;  %v4279_v8 = vld [vmem:[%s4535_s11 + $0x320] ss:$16 sps:$4 sm:$0xff]  }
 0x155   : > { %2540 = vmatpush2.bf16.msra.mxu1 %v4271_v27  ;;  %2490 = vmatprep.subr.bf16.mxu0 %v4272_v5  ;;  %v4280_v27 = vld [vmem:[%s4535_s11 + $0x104] ss:$16 sps:$4 sm:$0xff]  }
 0x156   : > { %2541 = vmatprep.subr.bf16.mxu1 %v4273_v7  ;;  %v4281_v5 = vld [vmem:[%s4535_s11 + $0x304] ss:$16 sps:$4 sm:$0xff]   ;;  %v5269_v7 = vcombine.low %v5180_v40, %v5183_v10 }
 0x158   : > { %2491 = vmatpush2.bf16.msra.mxu0 %v4274_v51  ;;  %v5273_v51 = vcombine.low %v5186_v11, %v5189_v2 }
 0x159   : > { %2542 = vmatpush2.bf16.msra.mxu1 %v4275_v31  ;;  %2492 = vmatprep.subr.bf16.mxu0 %v4276_v3  ;;  %v636_v31 = vld [vmem:[%s4496_s13 + $0x40] sm:$0xff]  ;;  %v637_v3 = vld [vmem:[%s4496_s13 + $0x48] sm:$0xff] }
 0x15a   : > { %2543 = vmatprep.subr.bf16.mxu1 %v4277_v50  ;;  %v4282_v50 = vld [vmem:[%s4535_s11 + $0x100] ss:$16 sps:$4 sm:$0xff]   ;;  %v5281_v40 = vcombine.high %v636_v31, %v636_v31  ;;  %v5283_v10 = vcombine.high %v637_v3, %v637_v3 }
 0x15c   : > { %2493 = vmatpush2.bf16.msra.mxu0 %v4278_v22  ;;  %v4283_v22 = vld [vmem:[%s4535_s11 + $0x300] ss:$16 sps:$4 sm:$0xff]   ;;  %6063 = vst [vmem:[#allocation66_spill] sm:$0xff] %v5281_v40  ;;  %6064 = vst [vmem:[#allocation67_spill] sm:$0xff] %v5283_v10 }
 0x15d   : > { %2544 = vmatpush2.bf16.msra.mxu1 %v4279_v8  ;;  %2494 = vmatprep.subr.bf16.mxu0 %v4280_v27  ;;  %v4284_v8 = vld [vmem:[%s4535_s11 + $0x4e4] ss:$16 sps:$4 sm:$0xff]  }
 0x15e   : > { %2545 = vmatprep.subr.bf16.mxu1 %v4281_v5  ;;  %v4285_v27 = vld [vmem:[%s4535_s11 + $0x6e4] ss:$16 sps:$4 sm:$0xff]  }
 0x160   : > { %2495 = vmatpush2.bf16.msra.mxu0 %v4282_v50  ;;  %v4286_v50 = vld [vmem:[%s4535_s11 + $0x4e0] ss:$16 sps:$4 sm:$0xff]  }
 0x161   : > { %2546 = vmatpush2.bf16.msra.mxu1 %v4283_v22  ;;  %2566 = vmatprep.subr.bf16.mxu0 %v4284_v8  ;;  %v4287_v22 = vld [vmem:[%s4535_s11 + $0x6e0] ss:$16 sps:$4 sm:$0xff]  }
 0x162   : > { %2617 = vmatprep.subr.bf16.mxu1 %v4285_v27 }
 0x163   : > { %v1484_v2 = vpop.f32.mrf.mxu0  ;;  %2497 = vmatmul.mubr.bf16.vlgmr.msra.gmra.mxu0 %v5269_v7 }
 0x164   : > { %v1535_v11 = vpop.f32.mrf.mxu1  ;;  %2548 = vmatmul.mubr.bf16.vlgmr.msra.gmra.mxu1 %v5273_v51  ;;  %v1485_v5 = vadd.f32 %v1484_v2, %v5169_v9  ;;  %2567 = vmatpush1.bf16.msra.mxu0 %v4286_v50  ;;  %v5298_v9 = vld [vmem:[%s4496_s13 + $0x10] sm:$0xff] }
 0x165   : > { %2618 = vmatpush1.bf16.msra.mxu1 %v4287_v22  ;;  %v1486_v8 = vpop.f32.mrf.mxu0  ;;  %2568 = vmatprep.subr.bf16.mxu0 %v4288_v4  ;;  %v5300_v22 = vcombine.low %v636_v31, %v636_v31  ;;  %v5302_v4 = vcombine.low %v637_v3, %v637_v3  ;;  %v4293_v3 = vld [vmem:[%s4535_s11 + $0x6a4] ss:$16 sps:$4 sm:$0xff]  }
 0x166   : > { %v1537_v27 = vpop.f32.mrf.mxu1  ;;  %2619 = vmatprep.subr.bf16.mxu1 %v4289_v1  ;;  %v5292_v0 = vadd.f32 %v1535_v11, %v1485_v5  ;;  %v1487_v63 = vadd.f32 %v1486_v8, %v5175_v39  ;;  %2506 = vmatprep.mubr.bf16.mxu0 %v5281_v40  ;;  %v5305_v1 = vld [vmem:[%s4496_s13 + $0x30] sm:$0xff]  ;;  %v5308_v11 = vld [vmem:[%s4496_s13 + $0x18] sm:$0xff] }
 0x167   : > { %2557 = vmatprep.mubr.bf16.mxu1 %v5283_v10  ;;  %v1488_v2 = vpop.f32.mrf.mxu0  ;;  %6066 = vst [vmem:[#allocation69_spill] sm:$0xff] %v5302_v4  ;;  %v5311_v5 = vld [vmem:[%s4496_s13 + $0x38] sm:$0xff]  ;;  %v4291_v10 = vld [vmem:[%s4535_s11 + $0x6c0] ss:$16 sps:$4 sm:$0xff]  }
 0x168   : > { %6065 = vst [vmem:[#allocation68_spill] sm:$0xff] %v5292_v0  ;;  %v1539_v50 = vpop.f32.mrf.mxu1  ;;  %v5313_v39 = vadd.f32 %v1537_v27, %v1487_v63  ;;  %v1489_v8 = vadd.f32 %v1488_v2, %v5191_v6  ;;  %v4290_v0 = vld [vmem:[%s4535_s11 + $0x4c0] ss:$16 sps:$4 sm:$0xff]   ;;  %v5325_v6 = vcombine.high %v5298_v9, %v5305_v1 }
 0x169   : > { %2569 = vmatpush1.bf16.msra.mxu0 %v4290_v0  ;;  %2620 = vmatpush1.bf16.msra.mxu1 %v4291_v10  ;;  %v1490_v40 = vpop.f32.mrf.mxu0  ;;  %v5329_v0 = vcombine.high %v5308_v11, %v5311_v5 }
 0x16a   : > { %v1541_v31 = vpop.f32.mrf.mxu1  ;;  %2570 = vmatprep.subr.bf16.mxu0 %v4292_v62  ;;  %2621 = vmatprep.subr.bf16.mxu1 %v4293_v3  ;;  %v5320_v61 = vadd.f32 %v1539_v50, %v1489_v8  ;;  %v1491_v63 = vadd.f32 %v1490_v40, %v5197_v21  ;;  %v4294_v21 = vld [vmem:[%s4535_s11 + $0x4a0] ss:$16 sps:$4 sm:$0xff]   ;;  %v4296_v3 = vld [vmem:[%s4535_s11 + $0x484] ss:$16 sps:$4 sm:$0xff]  }
 0x16b   : > { %v1494_v10 = vpop.f32.mrf.mxu0  ;;  %2507 = vmatmul.mubr.bf16.gmra.mxu0 %v5300_v22  ;;  %v4295_v40 = vld [vmem:[%s4535_s11 + $0x6a0] ss:$16 sps:$4 sm:$0xff]  }
 0x16c   : > { %6067 = vst [vmem:[#allocation70_spill] sm:$0xff] %v5320_v61  ;;  %v1545_v27 = vpop.f32.mrf.mxu1  ;;  %2558 = vmatmul.mubr.bf16.gmra.mxu1 %v5302_v4  ;;  %v5333_v62 = vadd.f32 %v1541_v31, %v1491_v63  ;;  %v1495_v2 = vadd.f32 %v1494_v10, %v5211_v47  ;;  %v4297_v61 = vld [vmem:[%s4535_s11 + $0x684] ss:$16 sps:$4 sm:$0xff]   ;;  %2598 = vmatprep.mubr.bf16.mxu0 %v5325_v6 }
 0x16d   : > { %2571 = vmatpush1.bf16.msra.mxu0 %v4294_v21  ;;  %2622 = vmatpush1.bf16.msra.mxu1 %v4295_v40  ;;  %v1496_v50 = vpop.f32.mrf.mxu0  ;;  %v4298_v21 = vld [vmem:[%s4535_s11 + $0x480] ss:$16 sps:$4 sm:$0xff]  }
 0x16e   : > { %v1547_v8 = vpop.f32.mrf.mxu1  ;;  %2572 = vmatprep.subr.bf16.mxu0 %v4296_v3  ;;  %2623 = vmatprep.subr.bf16.mxu1 %v4297_v61  ;;  %v1497_v4 = vadd.f32 %v1496_v50, %v5215_v53  ;;  %v5341_v31 = vadd.f32 %v1545_v27, %v1495_v2  ;;  %v4299_v40 = vld [vmem:[%s4535_s11 + $0x680] ss:$16 sps:$4 sm:$0xff]   ;;  %v4300_v61 = vld [vmem:[%s4535_s11 + $0x464] ss:$16 sps:$4 sm:$0xff]  }
 0x16f   : > { %2649 = vmatprep.mubr.bf16.mxu1 %v5329_v0  ;;  %v1498_v47 = vpop.f32.mrf.mxu0  ;;  %v4301_v53 = vld [vmem:[%s4535_s11 + $0x664] ss:$16 sps:$4 sm:$0xff]   ;;  %v4302_v50 = vld [vmem:[%s4535_s11 + $0x460] ss:$16 sps:$4 sm:$0xff]  }
 0x170   : > { %v1549_v63 = vpop.f32.mrf.mxu1  ;;  %v5345_v10 = vadd.f32 %v1547_v8, %v1497_v4  ;;  %v4303_v4 = vld [vmem:[%s4535_s11 + $0x660] ss:$16 sps:$4 sm:$0xff]   ;;  %v4304_v8 = vld [vmem:[%s4535_s11 + $0x444] ss:$16 sps:$4 sm:$0xff]  }
 0x171   : > { %2573 = vmatpush1.bf16.msra.mxu0 %v4298_v21  ;;  %2624 = vmatpush1.bf16.msra.mxu1 %v4299_v40  ;;  %v1499_v27 = vpop.f32.mrf.mxu0  ;;  %v4305_v3 = vld [vmem:[%s4535_s11 + $0x644] ss:$16 sps:$4 sm:$0xff]   ;;  %v4306_v47 = vld [vmem:[%s4535_s11 + $0x440] ss:$16 sps:$4 sm:$0xff]  }
 0x172   : > { %2574 = vmatprep.subr.bf16.mxu0 %v4300_v61  ;;  %2625 = vmatprep.subr.bf16.mxu1 %v4301_v53  ;;  %v1550_v2 = vpop.f32.mrf.mxu1  ;;  %v4307_v63 = vld [vmem:[%s4535_s11 + $0x640] ss:$16 sps:$4 sm:$0xff]   ;;  %v4308_v21 = vld [vmem:[%s4535_s11 + $0x424] ss:$16 sps:$4 sm:$0xff]  }
 0x173   : > { %v4309_v40 = vld [vmem:[%s4535_s11 + $0x624] ss:$16 sps:$4 sm:$0xff]   ;;  %v4310_v61 = vld [vmem:[%s4535_s11 + $0x420] ss:$16 sps:$4 sm:$0xff]  }
 0x174   : > { %v4311_v53 = vld [vmem:[%s4535_s11 + $0x620] ss:$16 sps:$4 sm:$0xff]   ;;  %v4312_v27 = vld [vmem:[%s4535_s11 + $0x404] ss:$16 sps:$4 sm:$0xff]  }
 0x175   : > { %2575 = vmatpush1.bf16.msra.mxu0 %v4302_v50  ;;  %2626 = vmatpush1.bf16.msra.mxu1 %v4303_v4  ;;  %v4313_v2 = vld [vmem:[%s4535_s11 + $0x604] ss:$16 sps:$4 sm:$0xff]   ;;  %v4314_v50 = vld [vmem:[%s4535_s11 + $0x400] ss:$16 sps:$4 sm:$0xff]  }
 0x176   : > { %2576 = vmatprep.subr.bf16.mxu0 %v4304_v8  ;;  %2627 = vmatprep.subr.bf16.mxu1 %v4305_v3  ;;  %v4315_v4 = vld [vmem:[%s4535_s11 + $0x600] ss:$16 sps:$4 sm:$0xff]   ;;  %v4316_v8 = vld [vmem:[%s4535_s11 + $0x5e4] ss:$16 sps:$4 sm:$0xff]  }
 0x177   : > { %v4317_v3 = vld [vmem:[%s4535_s11 + $0x7e4] ss:$16 sps:$4 sm:$0xff]  }
 0x179   : > { %2577 = vmatpush1.bf16.msra.mxu0 %v4306_v47  ;;  %2628 = vmatpush1.bf16.msra.mxu1 %v4307_v63  ;;  %v4318_v47 = vld [vmem:[%s4535_s11 + $0x5e0] ss:$16 sps:$4 sm:$0xff]  }
 0x17a   : > { %2578 = vmatprep.subr.bf16.mxu0 %v4308_v21  ;;  %2629 = vmatprep.subr.bf16.mxu1 %v4309_v40  ;;  %v4319_v63 = vld [vmem:[%s4535_s11 + $0x7e0] ss:$16 sps:$4 sm:$0xff]   ;;  %v4320_v21 = vld [vmem:[%s4535_s11 + $0x5c4] ss:$16 sps:$4 sm:$0xff]  }
 0x17b   : > { %v4321_v40 = vld [vmem:[%s4535_s11 + $0x7c4] ss:$16 sps:$4 sm:$0xff]  }
 0x17d   : > { %2579 = vmatpush1.bf16.msra.mxu0 %v4310_v61  ;;  %2630 = vmatpush1.bf16.msra.mxu1 %v4311_v53  ;;  %v4322_v61 = vld [vmem:[%s4535_s11 + $0x5c0] ss:$16 sps:$4 sm:$0xff]  }
 0x17e   : > { %2580 = vmatprep.subr.bf16.mxu0 %v4312_v27  ;;  %2631 = vmatprep.subr.bf16.mxu1 %v4313_v2  ;;  %v4323_v53 = vld [vmem:[%s4535_s11 + $0x7c0] ss:$16 sps:$4 sm:$0xff]   ;;  %v4324_v27 = vld [vmem:[%s4535_s11 + $0x5a4] ss:$16 sps:$4 sm:$0xff]  }
 0x17f   : > { %v4325_v2 = vld [vmem:[%s4535_s11 + $0x7a4] ss:$16 sps:$4 sm:$0xff]  }
 0x181   : > { %2581 = vmatpush1.bf16.msra.mxu0 %v4314_v50  ;;  %2632 = vmatpush1.bf16.msra.mxu1 %v4315_v4  ;;  %v4326_v50 = vld [vmem:[%s4535_s11 + $0x5a0] ss:$16 sps:$4 sm:$0xff]  }
 0x182   : > { %2582 = vmatprep.subr.bf16.mxu0 %v4316_v8  ;;  %2633 = vmatprep.subr.bf16.mxu1 %v4317_v3  ;;  %v4327_v4 = vld [vmem:[%s4535_s11 + $0x7a0] ss:$16 sps:$4 sm:$0xff]   ;;  %v4328_v8 = vld [vmem:[%s4535_s11 + $0x584] ss:$16 sps:$4 sm:$0xff]  }
 0x183   : > { %v4329_v3 = vld [vmem:[%s4535_s11 + $0x784] ss:$16 sps:$4 sm:$0xff]  }
 0x185   : > { %2583 = vmatpush2.bf16.msra.mxu0 %v4318_v47  ;;  %2634 = vmatpush2.bf16.msra.mxu1 %v4319_v63  ;;  %v4330_v47 = vld [vmem:[%s4535_s11 + $0x580] ss:$16 sps:$4 sm:$0xff]  }
 0x186   : > { %2584 = vmatprep.subr.bf16.mxu0 %v4320_v21  ;;  %2635 = vmatprep.subr.bf16.mxu1 %v4321_v40  ;;  %v4331_v63 = vld [vmem:[%s4535_s11 + $0x780] ss:$16 sps:$4 sm:$0xff]   ;;  %v4332_v21 = vld [vmem:[%s4535_s11 + $0x564] ss:$16 sps:$4 sm:$0xff]  }
 0x187   : > { %v4333_v40 = vld [vmem:[%s4535_s11 + $0x764] ss:$16 sps:$4 sm:$0xff]  }
 0x189   : > { %2585 = vmatpush2.bf16.msra.mxu0 %v4322_v61  ;;  %2636 = vmatpush2.bf16.msra.mxu1 %v4323_v53  ;;  %v4334_v61 = vld [vmem:[%s4535_s11 + $0x560] ss:$16 sps:$4 sm:$0xff]  }
 0x18a   : > { %2586 = vmatprep.subr.bf16.mxu0 %v4324_v27  ;;  %2637 = vmatprep.subr.bf16.mxu1 %v4325_v2  ;;  %v4335_v53 = vld [vmem:[%s4535_s11 + $0x760] ss:$16 sps:$4 sm:$0xff]   ;;  %v4336_v27 = vld [vmem:[%s4535_s11 + $0x544] ss:$16 sps:$4 sm:$0xff]  }
 0x18b   : > { %v4337_v2 = vld [vmem:[%s4535_s11 + $0x744] ss:$16 sps:$4 sm:$0xff]  }
 0x18d   : > { %2587 = vmatpush2.bf16.msra.mxu0 %v4326_v50  ;;  %2638 = vmatpush2.bf16.msra.mxu1 %v4327_v4  ;;  %v4338_v50 = vld [vmem:[%s4535_s11 + $0x540] ss:$16 sps:$4 sm:$0xff]  }
 0x18e   : > { %2588 = vmatprep.subr.bf16.mxu0 %v4328_v8  ;;  %2639 = vmatprep.subr.bf16.mxu1 %v4329_v3  ;;  %v4339_v4 = vld [vmem:[%s4535_s11 + $0x740] ss:$16 sps:$4 sm:$0xff]   ;;  %v4340_v8 = vld [vmem:[%s4535_s11 + $0x524] ss:$16 sps:$4 sm:$0xff]  }
 0x18f   : > { %v4341_v3 = vld [vmem:[%s4535_s11 + $0x724] ss:$16 sps:$4 sm:$0xff]  }
 0x191   : > { %2589 = vmatpush2.bf16.msra.mxu0 %v4330_v47  ;;  %2640 = vmatpush2.bf16.msra.mxu1 %v4331_v63  ;;  %v4342_v47 = vld [vmem:[%s4535_s11 + $0x520] ss:$16 sps:$4 sm:$0xff]  }
 0x192   : > { %2590 = vmatprep.subr.bf16.mxu0 %v4332_v21  ;;  %2641 = vmatprep.subr.bf16.mxu1 %v4333_v40  ;;  %v4343_v63 = vld [vmem:[%s4535_s11 + $0x720] ss:$16 sps:$4 sm:$0xff]   ;;  %v4344_v21 = vld [vmem:[%s4535_s11 + $0x504] ss:$16 sps:$4 sm:$0xff]  }
 0x193   : > { %v4345_v40 = vld [vmem:[%s4535_s11 + $0x704] ss:$16 sps:$4 sm:$0xff]  }
 0x195   : > { %2591 = vmatpush2.bf16.msra.mxu0 %v4334_v61  ;;  %2642 = vmatpush2.bf16.msra.mxu1 %v4335_v53  ;;  %v5397_v61 = vcombine.low %v5298_v9, %v5305_v1  ;;  %v5401_v53 = vcombine.low %v5308_v11, %v5311_v5 }
 0x196   : > { %2592 = vmatprep.subr.bf16.mxu0 %v4336_v27  ;;  %2643 = vmatprep.subr.bf16.mxu1 %v4337_v2  ;;  %v638_v27 = vld [vmem:[%s4496_s13 + $0x50] sm:$0xff]  ;;  %v639_v2 = vld [vmem:[%s4496_s13 + $0x58] sm:$0xff] }
 0x197   : > { %6068 = vst [vmem:[#allocation71_spill] sm:$0xff] %v5397_v61  ;;  %6069 = vst [vmem:[#allocation72_spill] sm:$0xff] %v5401_v53  ;;  %v5409_v9 = vcombine.high %v638_v27, %v638_v27  ;;  %v5411_v1 = vcombine.high %v639_v2, %v639_v2 }
 0x199   : > { %2593 = vmatpush2.bf16.msra.mxu0 %v4338_v50  ;;  %2644 = vmatpush2.bf16.msra.mxu1 %v4339_v4  ;;  %v4346_v50 = vld [vmem:[%s4535_s11 + $0x500] ss:$16 sps:$4 sm:$0xff]   ;;  %6070 = vst [vmem:[#allocation73_spill] sm:$0xff] %v5409_v9  ;;  %6071 = vst [vmem:[#allocation74_spill] sm:$0xff] %v5411_v1 }
 0x19a   : > { %2594 = vmatprep.subr.bf16.mxu0 %v4340_v8  ;;  %2645 = vmatprep.subr.bf16.mxu1 %v4341_v3  ;;  %v4347_v4 = vld [vmem:[%s4535_s11 + $0x700] ss:$16 sps:$4 sm:$0xff]   ;;  %v4348_v8 = vld [vmem:[%s4662_s15 + $0xe4] ss:$16 sps:$4 sm:$0xff]  }
 0x19b   : > { %v4349_v3 = vld [vmem:[%s4662_s15 + $0x2e4] ss:$16 sps:$4 sm:$0xff]  }
 0x19d   : > { %2595 = vmatpush2.bf16.msra.mxu0 %v4342_v47  ;;  %2646 = vmatpush2.bf16.msra.mxu1 %v4343_v63  ;;  %v4350_v63 = vld [vmem:[%s4662_s15 + $0xe0] ss:$16 sps:$4 sm:$0xff]  }
 0x19e   : > { %2596 = vmatprep.subr.bf16.mxu0 %v4344_v21  ;;  %2647 = vmatprep.subr.bf16.mxu1 %v4345_v40  ;;  %v4351_v21 = vld [vmem:[%s4662_s15 + $0x2e0] ss:$16 sps:$4 sm:$0xff]  }
 0x1a1   : > { %2597 = vmatpush2.bf16.msra.mxu0 %v4346_v50  ;;  %2648 = vmatpush2.bf16.msra.mxu1 %v4347_v4  ;;  %v4352_v4 = vld [vmem:[%s4662_s15 + $0xc4] ss:$16 sps:$4 sm:$0xff]  }
 0x1a2   : > { %2668 = vmatprep.subr.bf16.mxu0 %v4348_v8  ;;  %2719 = vmatprep.subr.bf16.mxu1 %v4349_v3  ;;  %v4353_v8 = vld [vmem:[%s4662_s15 + $0x2c4] ss:$16 sps:$4 sm:$0xff]  }
 0x1a3   : > { %v2226_v11 = vpop.f32.mrf.mxu0 }
 0x1a4   : > { %v2277_v5 = vpop.f32.mrf.mxu1  ;;  %2599 = vmatmul.mubr.bf16.vlgmr.msra.gmra.mxu0 %v5397_v61  ;;  %2650 = vmatmul.mubr.bf16.vlgmr.msra.gmra.mxu1 %v5401_v53  ;;  %v4354_v53 = vld [vmem:[%s4662_s15 + $0xc0] ss:$16 sps:$4 sm:$0xff]  }
 0x1a5   : > { %v5415_v47 = vadd.f32 %v2277_v5, %v2226_v11  ;;  %2669 = vmatpush1.bf16.msra.mxu0 %v4350_v63  ;;  %2720 = vmatpush1.bf16.msra.mxu1 %v4351_v21  ;;  %v5419_v40 = vpop.f32.mrf.mxu0  ;;  %v5427_v5 = vcombine.low %v638_v27, %v638_v27  ;;  %v5429_v63 = vcombine.low %v639_v2, %v639_v2 }
 0x1a6   : > { %v5421_v50 = vpop.f32.mrf.mxu1  ;;  %2670 = vmatprep.subr.bf16.mxu0 %v4352_v4  ;;  %2721 = vmatprep.subr.bf16.mxu1 %v4353_v8  ;;  %v4355_v4 = vld [vmem:[%s4662_s15 + $0x2c0] ss:$16 sps:$4 sm:$0xff]  }
 0x1a7   : > { %2608 = vmatprep.mubr.bf16.mxu0 %v5409_v9  ;;  %2659 = vmatprep.mubr.bf16.mxu1 %v5411_v1  ;;  %v2230_v3 = vpop.f32.mrf.mxu0  ;;  %6072 = vst [vmem:[#allocation75_spill] sm:$0xff] %v5429_v63  ;;  %v4356_v9 = vld [vmem:[%s4662_s15 + $0xa4] ss:$16 sps:$4 sm:$0xff]  }
 0x1a8   : > { %v2281_v11 = vpop.f32.mrf.mxu1  ;;  %v4357_v1 = vld [vmem:[%s4662_s15 + $0x2a4] ss:$16 sps:$4 sm:$0xff]  }
 0x1a9   : > { %v5431_v21 = vadd.f32 %v2281_v11, %v2230_v3  ;;  %2671 = vmatpush1.bf16.msra.mxu0 %v4354_v53  ;;  %2722 = vmatpush1.bf16.msra.mxu1 %v4355_v4  ;;  %v2232_v8 = vpop.f32.mrf.mxu0  ;;  %v4358_v53 = vld [vmem:[%s4662_s15 + $0xa0] ss:$16 sps:$4 sm:$0xff]  }
 0x1aa   : > { %v2283_v61 = vpop.f32.mrf.mxu1  ;;  %2672 = vmatprep.subr.bf16.mxu0 %v4356_v9  ;;  %2723 = vmatprep.subr.bf16.mxu1 %v4357_v1  ;;  %v4359_v11 = vld [vmem:[%s4662_s15 + $0x2a0] ss:$16 sps:$4 sm:$0xff]   ;;  %v4360_v9 = vld [vmem:[%s4662_s15 + $0x84] ss:$16 sps:$4 sm:$0xff]  }
 0x1ab   : > { %v5437_v27 = vadd.f32 %v2283_v61, %v2232_v8  ;;  %v2236_v2 = vpop.f32.mrf.mxu0  ;;  %v4361_v61 = vld [vmem:[%s4662_s15 + $0x284] ss:$16 sps:$4 sm:$0xff]  }
 0x1ac   : > { %2609 = vmatmul.mubr.bf16.gmra.mxu0 %v5427_v5  ;;  %2660 = vmatmul.mubr.bf16.gmra.mxu1 %v5429_v63  ;;  %v2287_v3 = vpop.f32.mrf.mxu1 }
 0x1ad   : > { %2673 = vmatpush1.bf16.msra.mxu0 %v4358_v53  ;;  %2724 = vmatpush1.bf16.msra.mxu1 %v4359_v11  ;;  %v5443_v4 = vadd.f32 %v2287_v3, %v2236_v2  ;;  %v2238_v1 = vpop.f32.mrf.mxu0  ;;  %v4362_v3 = vld [vmem:[%s4662_s15 + $0x80] ss:$16 sps:$4 sm:$0xff]  }
 0x1ae   : > { %2674 = vmatprep.subr.bf16.mxu0 %v4360_v9  ;;  %2725 = vmatprep.subr.bf16.mxu1 %v4361_v61  ;;  %v2289_v8 = vpop.f32.mrf.mxu1  ;;  %v4363_v11 = vld [vmem:[%s4662_s15 + $0x280] ss:$16 sps:$4 sm:$0xff]   ;;  %v4364_v9 = vld [vmem:[%s4662_s15 + $0x64] ss:$16 sps:$4 sm:$0xff]  }
 0x1af   : > { %v5447_v63 = vadd.f32 %v2289_v8, %v2238_v1  ;;  %2700 = vmatprep.mubr.bf16.mxu0 %v5201_v32  ;;  %2751 = vmatprep.mubr.bf16.mxu1 %v5205_v35  ;;  %v2240_v53 = vpop.f32.mrf.mxu0  ;;  %v4365_v61 = vld [vmem:[%s4662_s15 + $0x264] ss:$16 sps:$4 sm:$0xff]   ;;  %v4366_v8 = vld [vmem:[%s4662_s15 + $0x60] ss:$16 sps:$4 sm:$0xff]  }
 0x1b0   : > { %v2291_v2 = vpop.f32.mrf.mxu1  ;;  %v4367_v35 = vld [vmem:[%s4662_s15 + $0x260] ss:$16 sps:$4 sm:$0xff]   ;;  %v4368_v53 = vld [vmem:[%s4662_s15 + $0x44] ss:$16 sps:$4 sm:$0xff]  }
 0x1b1   : > { %2675 = vmatpush1.bf16.msra.mxu0 %v4362_v3  ;;  %2726 = vmatpush1.bf16.msra.mxu1 %v4363_v11  ;;  %v2241_v1 = vpop.f32.mrf.mxu0  ;;  %v4369_v2 = vld [vmem:[%s4662_s15 + $0x244] ss:$16 sps:$4 sm:$0xff]   ;;  %v4370_v3 = vld [vmem:[%s4662_s15 + $0x40] ss:$16 sps:$4 sm:$0xff]  }
 0x1b2   : > { %2676 = vmatprep.subr.bf16.mxu0 %v4364_v9  ;;  %2727 = vmatprep.subr.bf16.mxu1 %v4365_v61  ;;  %v2292_v32 = vpop.f32.mrf.mxu1  ;;  %v4371_v11 = vld [vmem:[%s4662_s15 + $0x240] ss:$16 sps:$4 sm:$0xff]   ;;  %v4372_v9 = vld [vmem:[%s4662_s15 + $0x24] ss:$16 sps:$4 sm:$0xff]  }
 0x1b3   : > { %v4373_v61 = vld [vmem:[%s4662_s15 + $0x224] ss:$16 sps:$4 sm:$0xff]   ;;  %v4374_v1 = vld [vmem:[%s4662_s15 + $0x20] ss:$16 sps:$4 sm:$0xff]  }
 0x1b4   : > { %v4375_v32 = vld [vmem:[%s4662_s15 + $0x220] ss:$16 sps:$4 sm:$0xff]  }
 0x1b5   : > { %2677 = vmatpush1.bf16.msra.mxu0 %v4366_v8  ;;  %2728 = vmatpush1.bf16.msra.mxu1 %v4367_v35  ;;  %v4376_v8 = vld [vmem:[%s4662_s15 + $0x4] ss:$16 sps:$4 sm:$0xff]  }
 0x1b6   : > { %2678 = vmatprep.subr.bf16.mxu0 %v4368_v53  ;;  %2729 = vmatprep.subr.bf16.mxu1 %v4369_v2  ;;  %v4377_v35 = vld [vmem:[%s4662_s15 + $0x204] ss:$16 sps:$4 sm:$0xff]   ;;  %v4378_v53 = vld [vmem:[%s4662_s15] ss:$16 sps:$4 sm:$0xff]   ;;  %v6087_v2 = vld [vmem:[#allocation15_spill] sm:$0xff] }
 0x1b9   : > { %2679 = vmatpush1.bf16.msra.mxu0 %v4370_v3  ;;  %2730 = vmatpush1.bf16.msra.mxu1 %v4371_v11 }
 0x1ba   : > { %2680 = vmatprep.subr.bf16.mxu0 %v4372_v9  ;;  %2731 = vmatprep.subr.bf16.mxu1 %v4373_v61 }
 0x1bd   : > { %2681 = vmatpush1.bf16.msra.mxu0 %v4374_v1  ;;  %2732 = vmatpush1.bf16.msra.mxu1 %v4375_v32 }
 0x1be   : > { %2682 = vmatprep.subr.bf16.mxu0 %v4376_v8  ;;  %2733 = vmatprep.subr.bf16.mxu1 %v4377_v35  ;;  %v6088_v35 = vld [vmem:[#allocation16_spill] sm:$0xff] }
 0x1c1   : > { %2683 = vmatpush1.bf16.msra.mxu0 %v4378_v53  ;;  %2734 = vmatpush1.bf16.msra.mxu1 %v4770_v12  ;;  %v6089_v53 = vld [vmem:[#allocation17_spill] sm:$0xff] }
 0x1c2   : > { %2684 = vmatprep.subr.bf16.mxu0 %v4773_v13  ;;  %2735 = vmatprep.subr.bf16.mxu1 %v4776_v14  ;;  %v2280_v14 = vadd.f32 %v5421_v50, %v5419_v40  ;;  %v2875_v40 = vmul.f32 %v5333_v62, %v5333_v62 }
 0x1c5   : > { %2685 = vmatpush2.bf16.msra.mxu0 %v4779_v15  ;;  %2736 = vmatpush2.bf16.msra.mxu1 %v4783_v16 }
 0x1c6   : > { %2686 = vmatprep.subr.bf16.mxu0 %v4786_v17  ;;  %2737 = vmatprep.subr.bf16.mxu1 %v4791_v18  ;;  %v6073_v18 = vld [vmem:[#allocation6_spill] sm:$0xff] }
 0x1c9   : > { %2687 = vmatpush2.bf16.msra.mxu0 %v4794_v19  ;;  %2738 = vmatpush2.bf16.msra.mxu1 %v4799_v20  ;;  %v6074_v19 = vld [vmem:[#allocation7_spill] sm:$0xff] }
 0x1ca   : > { %2688 = vmatprep.subr.bf16.mxu0 %v4802_v23  ;;  %2739 = vmatprep.subr.bf16.mxu1 %v4807_v24  ;;  %v6075_v24 = vld [vmem:[#allocation66_spill] sm:$0xff] }
 0x1cd   : > { %2689 = vmatpush2.bf16.msra.mxu0 %v4810_v25  ;;  %2740 = vmatpush2.bf16.msra.mxu1 %v4815_v26  ;;  %v6076_v25 = vld [vmem:[#allocation67_spill] sm:$0xff]  ;;  %v6077_v26 = vld [vmem:[#allocation68_spill] sm:$0xff] }
 0x1ce   : > { %2690 = vmatprep.subr.bf16.mxu0 %v4818_v29  ;;  %2741 = vmatprep.subr.bf16.mxu1 %v4823_v30  ;;  %v2872_v29 = vmul.f32 %v6077_v26, %v6077_v26 }
 0x1d1   : > { %2691 = vmatpush2.bf16.msra.mxu0 %v4828_v33  ;;  %2742 = vmatpush2.bf16.msra.mxu1 %v4831_v34 }
 0x1d2   : > { %2692 = vmatprep.subr.bf16.mxu0 %v4836_v36  ;;  %2743 = vmatprep.subr.bf16.mxu1 %v4839_v37 }
 0x1d5   : > { %2693 = vmatpush2.bf16.msra.mxu0 %v4844_v38  ;;  %2744 = vmatpush2.bf16.msra.mxu1 %v4847_v41  ;;  %v6078_v38 = vld [vmem:[#allocation8_spill] sm:$0xff]  ;;  %v6079_v41 = vld [vmem:[#allocation9_spill] sm:$0xff] }
 0x1d6   : > { %2694 = vmatprep.subr.bf16.mxu0 %v4852_v42  ;;  %2745 = vmatprep.subr.bf16.mxu1 %v4855_v43  ;;  %v2873_v42 = vmul.f32 %v5313_v39, %v5313_v39 }
 0x1d9   : > { %2695 = vmatpush2.bf16.msra.mxu0 %v4860_v45  ;;  %2746 = vmatpush2.bf16.msra.mxu1 %v4863_v46  ;;  %v6080_v46 = vld [vmem:[#allocation10_spill] sm:$0xff] }
 0x1da   : > { %2696 = vmatprep.subr.bf16.mxu0 %v4868_v28  ;;  %2747 = vmatprep.subr.bf16.mxu1 %v4871_v44  ;;  %v6081_v28 = vld [vmem:[#allocation11_spill] sm:$0xff] }
 0x1dd   : > { %2697 = vmatpush2.bf16.msra.mxu0 %v4876_v48  ;;  %2748 = vmatpush2.bf16.msra.mxu1 %v4879_v49 }
 0x1de   : > { %2698 = vmatprep.subr.bf16.mxu0 %v4884_v52  ;;  %2749 = vmatprep.subr.bf16.mxu1 %v4887_v54  ;;  %v6082_v54 = vld [vmem:[#allocation70_spill] sm:$0xff] }
 0x1e1   : > { %2699 = vmatpush2.bf16.msra.mxu0 %v4892_v55  ;;  %2750 = vmatpush2.bf16.msra.mxu1 %v4895_v56  ;;  %v2874_v55 = vmul.f32 %v6082_v54, %v6082_v54 }
 0x1e2   : > { %2770 = vmatprep.subr.bf16.mxu0 %v4900_v57  ;;  %2821 = vmatprep.subr.bf16.mxu1 %v4903_v58  ;;  %v6083_v58 = vld [vmem:[#allocation69_spill] sm:$0xff] }
 0x1e3   : > { %v2328_v12 = vpop.f32.mrf.mxu0 }
 0x1e4   : > { %v2379_v13 = vpop.f32.mrf.mxu1  ;;  %2701 = vmatmul.mubr.bf16.vlgmr.msra.gmra.mxu0 %v5269_v7  ;;  %2752 = vmatmul.mubr.bf16.vlgmr.msra.gmra.mxu1 %v5273_v51  ;;  %v2329_v15 = vadd.f32 %v2328_v12, %v5415_v47  ;;  %v6084_v51 = vld [vmem:[#allocation12_spill] sm:$0xff]  ;;  %v6085_v47 = vld [vmem:[#allocation13_spill] sm:$0xff]  ;;  %v6091_v12 = vld [vmem:[#allocation19_spill] sm:$0xff] }
 0x1e5   : > { %2771 = vmatpush1.bf16.msra.mxu0 %v4908_v59  ;;  %2822 = vmatpush1.bf16.msra.mxu1 %v4911_v60  ;;  %v2330_v16 = vpop.f32.mrf.mxu0 }
 0x1e6   : > { %v2381_v17 = vpop.f32.mrf.mxu1  ;;  %2772 = vmatprep.subr.bf16.mxu0 %v6073_v18  ;;  %2823 = vmatprep.subr.bf16.mxu1 %v6074_v19  ;;  %v5512_v20 = vadd.f32 %v2379_v13, %v2329_v15  ;;  %v2331_v23 = vadd.f32 %v2330_v16, %v2280_v14  ;;  %v2877_v15 = vmul.f32 %v5345_v10, %v5345_v10  ;;  %v6092_v19 = vld [vmem:[#allocation20_spill] sm:$0xff] }
 0x1e7   : > { %2710 = vmatprep.mubr.bf16.mxu0 %v6075_v24  ;;  %2761 = vmatprep.mubr.bf16.mxu1 %v6076_v25  ;;  %v2332_v30 = vpop.f32.mrf.mxu0  ;;  %v6094_v24 = vld [vmem:[#allocation22_spill] sm:$0xff]  ;;  %v6095_v25 = vld [vmem:[#allocation23_spill] sm:$0xff] }
 0x1e8   : > { %v2383_v33 = vpop.f32.mrf.mxu1  ;;  %v2878_v34 = vmul.f32 %v5512_v20, %v5512_v20  ;;  %v5520_v36 = vadd.f32 %v2381_v17, %v2331_v23  ;;  %v2333_v37 = vadd.f32 %v2332_v30, %v5431_v21  ;;  %v6093_v23 = vld [vmem:[#allocation21_spill] sm:$0xff] }
 0x1e9   : > { %2773 = vmatpush1.bf16.msra.mxu0 %v6078_v38  ;;  %2824 = vmatpush1.bf16.msra.mxu1 %v6079_v41  ;;  %v2334_v43 = vpop.f32.mrf.mxu0  ;;  %v6097_v30 = vld [vmem:[#allocation25_spill] sm:$0xff] }
 0x1ea   : > { %v2385_v45 = vpop.f32.mrf.mxu1  ;;  %2774 = vmatprep.subr.bf16.mxu0 %v6080_v46  ;;  %2825 = vmatprep.subr.bf16.mxu1 %v6081_v28  ;;  %v5529_v44 = vadd.f32 %v2878_v34, %v2872_v29  ;;  %v2879_v48 = vmul.f32 %v5520_v36, %v5520_v36  ;;  %v5533_v49 = vadd.f32 %v2383_v33, %v2333_v37  ;;  %v6096_v29 = vld [vmem:[#allocation24_spill] sm:$0xff]  ;;  %v6098_v34 = vld [vmem:[#allocation26_spill] sm:$0xff]  ;;  %v6099_v37 = vld [vmem:[#allocation27_spill] sm:$0xff] }
 0x1eb   : > { %v2335_v52 = vadd.f32 %v2334_v43, %v5437_v27  ;;  %v2338_v56 = vpop.f32.mrf.mxu0  ;;  %v6086_v27 = vld [vmem:[#allocation14_spill] sm:$0xff]  ;;  %v6101_v46 = vld [vmem:[#allocation29_spill] sm:$0xff] }
 0x1ec   : > { %v2389_v57 = vpop.f32.mrf.mxu1  ;;  %2711 = vmatmul.mubr.bf16.gmra.mxu0 %v5300_v22  ;;  %2762 = vmatmul.mubr.bf16.gmra.mxu1 %v6083_v58  ;;  %4160 = vlog2.f32 %v5529_v44  ;;  %v5541_v59 = vadd.f32 %v2879_v48, %v2873_v42  ;;  %v2880_v60 = vmul.f32 %v5533_v49, %v5533_v49  ;;  %v2339_v22 = vadd.f32 %v2338_v56, %v5443_v4  ;;  %v6102_v48 = vld [vmem:[#allocation30_spill] sm:$0xff] }
 0x1ed   : > { %v5545_v7 = vadd.f32 %v2385_v45, %v2335_v52  ;;  %2775 = vmatpush1.bf16.msra.mxu0 %v6084_v51  ;;  %2826 = vmatpush1.bf16.msra.mxu1 %v6085_v47  ;;  %v2340_v50 = vpop.f32.mrf.mxu0  ;;  %v6100_v45 = vld [vmem:[#allocation28_spill] sm:$0xff]  ;;  %v6103_v52 = vld [vmem:[#allocation31_spill] sm:$0xff]  ;;  %vm2908_vm1 = vcmp.gt.f32.partialorder %v5529_v44, 0.0 }
 0x1ee   : > { %v2391_v21 = vpop.f32.mrf.mxu1  ;;  %2776 = vmatprep.subr.bf16.mxu0 %v6086_v27  ;;  %2827 = vmatprep.subr.bf16.mxu1 %v6087_v2  ;;  %4162 = vlog2.f32 %v5541_v59  ;;  %v5555_v3 = vadd.f32 %v2880_v60, %v2874_v55  ;;  %v2341_v9 = vadd.f32 %v2340_v50, %v5447_v63  ;;  %v5562_v4 = vadd.f32 %v2389_v57, %v2339_v22  ;;  %v6105_v22 = vld [vmem:[#allocation33_spill] sm:$0xff]  ;;  %v6106_v50 = vld [vmem:[#allocation34_spill] sm:$0xff] }
 0x1ef   : > { %v2881_v11 = vmul.f32 %v5545_v7, %v5545_v7  ;;  %2802 = vmatprep.mubr.bf16.mxu0 %v5325_v6  ;;  %2853 = vmatprep.mubr.bf16.mxu1 %v5329_v0  ;;  %v2342_v61 = vpop.f32.mrf.mxu0  ;;  %v2876_v63 = vmul.f32 %v5341_v31, %v5341_v31  ;;  %v6090_v0 = vld [vmem:[#allocation18_spill] sm:$0xff]  ;;  %vm2909_vm2 = vcmp.gt.f32.partialorder %v5541_v59, 0.0 }
 0x1f0   : > { %v2393_v1 = vpop.f32.mrf.mxu1  ;;  %4164 = vlog2.f32 %v5555_v3  ;;  %v5567_v8 = vadd.f32 %v2391_v21, %v2341_v9  ;;  %v2882_v6 = vmul.f32 %v5562_v4, %v5562_v4  ;;  %v6107_v21 = vld [vmem:[#allocation35_spill] sm:$0xff]  ;;  %vm2910_vm3 = vcmp.gt.f32.partialorder %v5555_v3, 0.0 }
 0x1f1   : > { %v5565_v32 = vadd.f32 %v2881_v11, %v2875_v40  ;;  %2777 = vmatpush1.bf16.msra.mxu0 %v6088_v35  ;;  %2828 = vmatpush1.bf16.msra.mxu1 %v6089_v53  ;;  %v2343_v13 = vpop.f32.mrf.mxu0  ;;  %v6104_v40 = vld [vmem:[#allocation32_spill] sm:$0xff] }
 0x1f2   : > { %2778 = vmatprep.subr.bf16.mxu0 %v6090_v0  ;;  %2829 = vmatprep.subr.bf16.mxu1 %v6091_v12  ;;  %v2394_v14 = vpop.f32.mrf.mxu1  ;;  %v2883_v16 = vmul.f32 %v5567_v8, %v5567_v8  ;;  %v5582_v17 = vadd.f32 %v2882_v6, %v2876_v63  ;;  %v6108_v53 = vld [vmem:[#allocation36_spill] sm:$0xff]  ;;  %v6109_v63 = vld [vmem:[#allocation37_spill] sm:$0xff]  ;;  %v6110_v0 = vld [vmem:[#allocation38_spill] sm:$0xff] }
 0x1f3   : > { %4166 = vlog2.f32 %v5565_v32  ;;  %v6111_v12 = vld [vmem:[#allocation39_spill] sm:$0xff]  ;;  %vm2911_vm4 = vcmp.gt.f32.partialorder %v5565_v32, 0.0 }
 0x1f4   : > { %v5584_v18 = vadd.f32 %v2883_v16, %v2877_v15  ;;  %4168 = vlog2.f32 %v5582_v17  ;;  %v6112_v16 = vld [vmem:[#allocation40_spill] sm:$0xff]  ;;  %vm2912_vm5 = vcmp.gt.f32.partialorder %v5582_v17, 0.0 }
 0x1f5   : > { %2779 = vmatpush1.bf16.msra.mxu0 %v6092_v19  ;;  %2830 = vmatpush1.bf16.msra.mxu1 %v6093_v23  ;;  %v6113_v19 = vld [vmem:[#allocation41_spill] sm:$0xff]  ;;  %v6114_v23 = vld [vmem:[#allocation42_spill] sm:$0xff] }
 0x1f6   : > { %2780 = vmatprep.subr.bf16.mxu0 %v6094_v24  ;;  %2831 = vmatprep.subr.bf16.mxu1 %v6095_v25  ;;  %4170 = vlog2.f32 %v5584_v18  ;;  %v6115_v24 = vld [vmem:[#allocation43_spill] sm:$0xff]  ;;  %v6116_v25 = vld [vmem:[#allocation44_spill] sm:$0xff]  ;;  %vm2913_vm6 = vcmp.gt.f32.partialorder %v5584_v18, 0.0 }
 0x1f9   : > { %2781 = vmatpush1.bf16.msra.mxu0 %v6096_v29  ;;  %2832 = vmatpush1.bf16.msra.mxu1 %v6097_v30  ;;  %v4161_v33 = vpop.eup %4160  ;;  %v6117_v29 = vld [vmem:[#allocation45_spill] sm:$0xff] }
 0x1fa   : > { %2782 = vmatprep.subr.bf16.mxu0 %v6098_v34  ;;  %2833 = vmatprep.subr.bf16.mxu1 %v6099_v37  ;;  %v5596_v38 = vmul.f32 0.6931472, %v4161_v33  ;;  %v6118_v33 = vld [vmem:[#allocation46_spill] sm:$0xff]  ;;  %v6119_v34 = vld [vmem:[#allocation47_spill] sm:$0xff] }
 0x1fb   : > { %v4163_v41 = vpop.eup %4162 }
 0x1fc   : > { %v2944_v42 = vmul.f32 0.15, %v5596_v38  ;;  %v5599_v43 = vmul.f32 0.6931472, %v4163_v41  ;;  %v6120_v41 = vld [vmem:[#allocation48_spill] sm:$0xff] }
 0x1fd   : > { %2783 = vmatpush1.bf16.msra.mxu0 %v6100_v45  ;;  %2834 = vmatpush1.bf16.msra.mxu1 %v6101_v46  ;;  %v4165_v28 = vpop.eup %4164 }
 0x1fe   : > { %2784 = vmatprep.subr.bf16.mxu0 %v6102_v48  ;;  %2835 = vmatprep.subr.bf16.mxu1 %v6103_v52  ;;  %v2950_v55 = vmul.f32 1.442695, %v2944_v42  ;;  %v2945_v56 = vmul.f32 0.15, %v5599_v43  ;;  %v5606_v57 = vmul.f32 0.6931472, %v4165_v28 }
 0x1ff   : > { %v6121_v42 = vld [vmem:[#allocation49_spill] sm:$0xff]  ;;  %v6122_v48 = vld [vmem:[#allocation50_spill] sm:$0xff]  ;;  %v6123_v52 = vld [vmem:[#allocation51_spill] sm:$0xff] }
 0x200   : > { %v4167_v58 = vpop.eup %4166  ;;  %4172 = vpow2.f32 %v2950_v55  ;;  %v2952_v60 = vmul.f32 1.442695, %v2945_v56  ;;  %v2946_v51 = vmul.f32 0.15, %v5606_v57 }
 0x201   : > { %v5609_v47 = vmul.f32 0.6931472, %v4167_v58  ;;  %2785 = vmatpush1.bf16.msra.mxu0 %v6104_v40  ;;  %2836 = vmatpush1.bf16.msra.mxu1 %v6105_v22  ;;  %v4169_v27 = vpop.eup %4168  ;;  %v6125_v40 = vld [vmem:[#allocation53_spill] sm:$0xff]  ;;  %v6126_v22 = vld [vmem:[#allocation54_spill] sm:$0xff] }
 0x202   : > { %2786 = vmatprep.subr.bf16.mxu0 %v6106_v50  ;;  %2837 = vmatprep.subr.bf16.mxu1 %v6107_v21  ;;  %4174 = vpow2.f32 %v2952_v60  ;;  %v2954_v2 = vmul.f32 1.442695, %v2946_v51  ;;  %v5616_v61 = vmul.f32 0.6931472, %v4169_v27  ;;  %v6124_v51 = vld [vmem:[#allocation52_spill] sm:$0xff]  ;;  %v6127_v50 = vld [vmem:[#allocation55_spill] sm:$0xff] }
 0x203   : > { %v2947_v11 = vmul.f32 0.15, %v5609_v47  ;;  %v4171_v9 = vpop.eup %4170 }
 0x204   : > { %4176 = vpow2.f32 %v2954_v2  ;;  %v5618_v35 = vmul.f32 0.6931472, %v4171_v9  ;;  %v2948_v6 = vmul.f32 0.15, %v5616_v61 }
 0x205   : > { %v2956_v1 = vmul.f32 1.442695, %v2947_v11  ;;  %2787 = vmatpush2.bf16.msra.mxu0 %v6108_v53  ;;  %2838 = vmatpush2.bf16.msra.mxu1 %v6109_v63  ;;  %v6129_v53 = vld [vmem:[#allocation57_spill] sm:$0xff]  ;;  %v6130_v63 = vld [vmem:[#allocation58_spill] sm:$0xff] }
 0x206   : > { %2788 = vmatprep.subr.bf16.mxu0 %v6110_v0  ;;  %2839 = vmatprep.subr.bf16.mxu1 %v6111_v12  ;;  %v2949_v13 = vmul.f32 0.15, %v5618_v35  ;;  %v2958_v14 = vmul.f32 1.442695, %v2948_v6  ;;  %v6131_v6 = vld [vmem:[#allocation59_spill] sm:$0xff]  ;;  %v6132_v12 = vld [vmem:[#allocation60_spill] sm:$0xff] }
 0x207   : > { %4178 = vpow2.f32 %v2956_v1  ;;  %v6128_v1 = vld [vmem:[#allocation56_spill] sm:$0xff] }
 0x208   : > { %v2960_v15 = vmul.f32 1.442695, %v2949_v13  ;;  %4180 = vpow2.f32 %v2958_v14  ;;  %v6133_v13 = vld [vmem:[#allocation61_spill] sm:$0xff]  ;;  %v6134_v14 = vld [vmem:[#allocation62_spill] sm:$0xff] }
 0x209   : > { %2789 = vmatpush2.bf16.msra.mxu0 %v6112_v16  ;;  %2840 = vmatpush2.bf16.msra.mxu1 %v6113_v19  ;;  %v6136_v16 = vld [vmem:[#allocation64_spill] sm:$0xff]  ;;  %v6137_v19 = vld [vmem:[#allocation65_spill] sm:$0xff] }
 0x20a   : > { %2790 = vmatprep.subr.bf16.mxu0 %v6114_v23  ;;  %2841 = vmatprep.subr.bf16.mxu1 %v6115_v24  ;;  %4182 = vpow2.f32 %v2960_v15  ;;  %v6135_v15 = vld [vmem:[#allocation63_spill] sm:$0xff] }
 0x20d   : > { %2791 = vmatpush2.bf16.msra.mxu0 %v6116_v25  ;;  %2842 = vmatpush2.bf16.msra.mxu1 %v6117_v29  ;;  %v4173_v30 = vpop.eup %4172  ;;  %v6138_v25 = vld [vmem:[#allocation71_spill] sm:$0xff]  ;;  %v6139_v29 = vld [vmem:[#allocation72_spill] sm:$0xff] }
 0x20e   : > { %2792 = vmatprep.subr.bf16.mxu0 %v6118_v33  ;;  %2843 = vmatprep.subr.bf16.mxu1 %v6119_v34  ;;  %v5640_v45 = vsel %vm2908_vm1, %v4173_v30, 0.0  ;;  %v6140_v33 = vld [vmem:[#allocation73_spill] sm:$0xff]  ;;  %v6141_v34 = vld [vmem:[#allocation74_spill] sm:$0xff] }
 0x20f   : > { %v4175_v37 = vpop.eup %4174 }
 0x210   : > { %v5644_v46 = vsel %vm2909_vm2, %v4175_v37, 0.0 }
 0x211   : > { %2793 = vmatpush2.bf16.msra.mxu0 %v6120_v41  ;;  %2844 = vmatpush2.bf16.msra.mxu1 %v6121_v42  ;;  %v4177_v28 = vpop.eup %4176  ;;  %v3164_v55 = vadd.f32 %v5644_v46, %v5640_v45 }
 0x212   : > { %2794 = vmatprep.subr.bf16.mxu0 %v6122_v48  ;;  %2845 = vmatprep.subr.bf16.mxu1 %v6123_v52  ;;  %v5654_v58 = vsel %vm2910_vm3, %v4177_v28, 0.0 }
 0x213   : > { %3165 = vadd.xlane.f32.xlu1 %v3164_v55 }
 0x214   : > { %v4179_v56 = vpop.eup %4178 }
 0x215   : > { %v5658_v60 = vsel %vm2911_vm4, %v4179_v56, 0.0  ;;  %2795 = vmatpush2.bf16.msra.mxu0 %v6124_v51  ;;  %2846 = vmatpush2.bf16.msra.mxu1 %v6125_v40  ;;  %v4181_v27 = vpop.eup %4180  ;;  %v6142_v40 = vld [vmem:[#allocation75_spill] sm:$0xff] }
 0x216   : > { %2796 = vmatprep.subr.bf16.mxu0 %v6126_v22  ;;  %2847 = vmatprep.subr.bf16.mxu1 %v6127_v50  ;;  %v5666_v21 = vadd.f32 %v5658_v60, %v5654_v58  ;;  %v5672_v11 = vsel %vm2912_vm5, %v4181_v27, 0.0 }
 0x217   : > { %v4183_v2 = vpop.eup %4182 }
 0x218   : > { %v5676_v9 = vsel %vm2913_vm6, %v4183_v2, 0.0 }
 0x219   : > { %2797 = vmatpush2.bf16.msra.mxu0 %v6128_v1  ;;  %2848 = vmatpush2.bf16.msra.mxu1 %v6129_v53  ;;  %v5684_v0 = vadd.f32 %v5676_v9, %v5672_v11 }
 0x21a   : > { %2798 = vmatprep.subr.bf16.mxu0 %v6130_v63  ;;  %2849 = vmatprep.subr.bf16.mxu1 %v6131_v6 }
 0x21d   : > { %2799 = vmatpush2.bf16.msra.mxu0 %v6132_v12  ;;  %2850 = vmatpush2.bf16.msra.mxu1 %v6133_v13 }
 0x21e   : > { %2800 = vmatprep.subr.bf16.mxu0 %v6134_v14  ;;  %2851 = vmatprep.subr.bf16.mxu1 %v6135_v15 }
 0x221   : > { %2801 = vmatpush2.bf16.msra.mxu0 %v6136_v16  ;;  %2852 = vmatpush2.bf16.msra.mxu1 %v6137_v19 }
 0x223   : > { %v2498_v23 = vpop.f32.mrf.mxu0 }
 0x224   : > { %v2549_v24 = vpop.f32.mrf.mxu1  ;;  %2803 = vmatmul.mubr.bf16.vlgmr.msra.gmra.mxu0 %v6138_v25  ;;  %2854 = vmatmul.mubr.bf16.vlgmr.msra.gmra.mxu1 %v6139_v29 }
 0x225   : > { %v2550_v30 = vadd.f32 %v2549_v24, %v2498_v23  ;;  %2812 = vmatprep.mubr.bf16.mxu0 %v6140_v33  ;;  %2863 = vmatprep.mubr.bf16.mxu1 %v6141_v34  ;;  %v2500_v37 = vpop.f32.mrf.mxu0 }
 0x226   : > { %v2551_v41 = vpop.f32.mrf.mxu1 }
 0x227   : > { %v2552_v42 = vadd.f32 %v2551_v41, %v2500_v37  ;;  %v2502_v28 = vpop.f32.mrf.mxu0 }
 0x228   : > { %v2553_v48 = vpop.f32.mrf.mxu1 }
 0x229   : > { %v2554_v52 = vadd.f32 %v2553_v48, %v2502_v28  ;;  %v2504_v55 = vpop.f32.mrf.mxu0 }
 0x22a   : > { %v2555_v56 = vpop.f32.mrf.mxu1 }
 0x22b   : > { %v2556_v51 = vadd.f32 %v2555_v56, %v2504_v55  ;;  %v2508_v22 = vpop.f32.mrf.mxu0 }
 0x22c   : > { %2813 = vmatmul.mubr.bf16.gmra.mxu0 %v5427_v5  ;;  %2864 = vmatmul.mubr.bf16.gmra.mxu1 %v6142_v40  ;;  %v2559_v50 = vpop.f32.mrf.mxu1 }
 0x22d   : > { %v2560_v27 = vadd.f32 %v2559_v50, %v2508_v22  ;;  %v2510_v2 = vpop.f32.mrf.mxu0 }
 0x22e   : > { %v2561_v1 = vpop.f32.mrf.mxu1 }
 0x22f   : > { %v2562_v53 = vadd.f32 %v2561_v1, %v2510_v2  ;;  %v2512_v63 = vpop.f32.mrf.mxu0 }
 0x230   : > { %v2563_v6 = vpop.f32.mrf.mxu1 }
 0x231   : > { %v2513_v12 = vpop.f32.mrf.mxu0 }
 0x232   : > { %v2564_v13 = vpop.f32.mrf.mxu1 }
 0x264   : > { %v2600_v14 = vpop.f32.mrf.mxu0  ;;  %v2651_v15 = vpop.f32.mrf.mxu1 }
 0x265   : > { %v2601_v16 = vadd.f32 %v2600_v14, %v2550_v30  ;;  %v3161_v14 = vld [vmem:[#allocation5] sm:$0xff] }
 0x266   : > { %v2602_v19 = vpop.f32.mrf.mxu0  ;;  %v2653_v23 = vpop.f32.mrf.mxu1 }
 0x267   : > { %v2652_v24 = vadd.f32 %v2651_v15, %v2601_v16  ;;  %v2603_v25 = vadd.f32 %v2602_v19, %v2552_v42 }
 0x268   : > { %v2604_v5 = vpop.f32.mrf.mxu0  ;;  %v2655_v29 = vpop.f32.mrf.mxu1 }
 0x269   : > { %v5698_v33 = vadd.f32 %v2653_v23, %v2603_v25  ;;  %v2605_v34 = vadd.f32 %v2604_v5, %v2554_v52 }
 0x26a   : > { %v2606_v37 = vpop.f32.mrf.mxu0  ;;  %v2657_v41 = vpop.f32.mrf.mxu1 }
 0x26b   : > { %v5700_v28 = vadd.f32 %v2655_v29, %v2605_v34  ;;  %v2607_v48 = vadd.f32 %v2606_v37, %v2556_v51 }
 0x26c   : > { %v2610_v55 = vpop.f32.mrf.mxu0  ;;  %v2661_v56 = vpop.f32.mrf.mxu1 }
 0x26d   : > { %v5704_v40 = vmul.f32 %v5700_v28, %v6082_v54  ;;  %v5706_v30 = vadd.f32 %v2657_v41, %v2607_v48  ;;  %v2611_v22 = vadd.f32 %v2610_v55, %v2560_v27 }
 0x26e   : > { %v2612_v42 = vpop.f32.mrf.mxu0  ;;  %v2663_v50 = vpop.f32.mrf.mxu1 }
 0x26f   : > { %v5710_v2 = vmul.f32 %v5706_v30, %v5333_v62  ;;  %v2613_v52 = vadd.f32 %v2612_v42, %v2562_v53  ;;  %v5712_v1 = vadd.f32 %v2661_v56, %v2611_v22 }
 0x270   : > { %v2614_v63 = vpop.f32.mrf.mxu0  ;;  %v2665_v51 = vpop.f32.mrf.mxu1 }
 0x271   : > { %v5716_v6 = vmul.f32 %v5712_v1, %v5341_v31  ;;  %v5718_v54 = vadd.f32 %v2663_v50, %v2613_v52 }
 0x272   : > { %v2615_v12 = vpop.f32.mrf.mxu0  ;;  %v2666_v13 = vpop.f32.mrf.mxu1 }
 0x273   : > { %v5722_v27 = vmul.f32 %v5718_v54, %v5345_v10 }
 0x29c   : > { %v3166_v62 = vpop.xlane.xlu1 %3165 }
 0x29d   : > { %v3173_v53 = vadd.f32 %v3166_v62, %v3161_v14 }
 0x29f   : > { %3176 = vst.msk [vmem:[#allocation5] sm:$0xff] %vm3121_vm7, %v3173_v53 }
 0x2a4   : > { %v2702_v15 = vpop.f32.mrf.mxu0  ;;  %v2753_v16 = vpop.f32.mrf.mxu1 }
 0x2a5   : > { %v2754_v19 = vadd.f32 %v2753_v16, %v2702_v15 }
 0x2a6   : > { %v2704_v23 = vpop.f32.mrf.mxu0  ;;  %v2755_v31 = vpop.f32.mrf.mxu1 }
 0x2a7   : > { %v2756_v14 = vadd.f32 %v2755_v31, %v2704_v23 }
 0x2a8   : > { %v2706_v25 = vpop.f32.mrf.mxu0  ;;  %v2757_v5 = vpop.f32.mrf.mxu1 }
 0x2a9   : > { %v2758_v29 = vadd.f32 %v2757_v5, %v2706_v25  ;;  %v2890_v5 = vmul.f32 %v2652_v24, %v2652_v24 }
 0x2aa   : > { %v2708_v34 = vpop.f32.mrf.mxu0  ;;  %v2759_v37 = vpop.f32.mrf.mxu1 }
 0x2ab   : > { %v2760_v41 = vadd.f32 %v2759_v37, %v2708_v34  ;;  %v3016_v34 = vmul.f32 %v2652_v24, %v6077_v26 }
 0x2ac   : > { %v2712_v48 = vpop.f32.mrf.mxu0  ;;  %v2763_v10 = vpop.f32.mrf.mxu1 }
 0x2ad   : > { %v2764_v55 = vadd.f32 %v2763_v10, %v2712_v48 }
 0x2ae   : > { %v2714_v56 = vpop.f32.mrf.mxu0  ;;  %v2765_v22 = vpop.f32.mrf.mxu1 }
 0x2af   : > { %v2766_v42 = vadd.f32 %v2765_v22, %v2714_v56 }
 0x2b0   : > { %v2716_v50 = vpop.f32.mrf.mxu0  ;;  %v2767_v52 = vpop.f32.mrf.mxu1 }
 0x2b2   : > { %v2717_v63 = vpop.f32.mrf.mxu0  ;;  %v2768_v51 = vpop.f32.mrf.mxu1 }
 0x2e4   : > { %v2804_v12 = vpop.f32.mrf.mxu0  ;;  %v2855_v13 = vpop.f32.mrf.mxu1 }
 0x2e5   : > { %v2805_v62 = vadd.f32 %v2804_v12, %v2754_v19  ;;  %v2891_v19 = vmul.f32 %v5698_v33, %v5698_v33 }
 0x2e6   : > { %v2806_v53 = vpop.f32.mrf.mxu0  ;;  %v2857_v15 = vpop.f32.mrf.mxu1 }
 0x2e7   : > { %v2856_v16 = vadd.f32 %v2855_v13, %v2805_v62  ;;  %v2807_v25 = vadd.f32 %v2806_v53, %v2756_v14  ;;  %v2893_v62 = vmul.f32 %v5706_v30, %v5706_v30 }
 0x2e8   : > { %v2808_v37 = vpop.f32.mrf.mxu0  ;;  %v2859_v48 = vpop.f32.mrf.mxu1 }
 0x2e9   : > { %v2896_v10 = vmul.f32 %v2856_v16, %v2856_v16  ;;  %v3022_v56 = vmul.f32 %v2856_v16, %v5512_v20  ;;  %v5727_v22 = vadd.f32 %v2857_v15, %v2807_v25  ;;  %v2809_v50 = vadd.f32 %v2808_v37, %v2758_v29 }
 0x2ea   : > { %v2810_v52 = vpop.f32.mrf.mxu0  ;;  %v2861_v63 = vpop.f32.mrf.mxu1  ;;  %v2892_v20 = vmul.f32 %v5700_v28, %v5700_v28 }
 0x2eb   : > { %v5731_v23 = vadd.f32 %v2896_v10, %v2890_v5  ;;  %v5733_v31 = vadd.f32 %v3022_v56, %v3016_v34  ;;  %v2897_v26 = vmul.f32 %v5727_v22, %v5727_v22  ;;  %v2860_v24 = vadd.f32 %v2859_v48, %v2809_v50 }
 0x2ec   : > { %v2811_v51 = vadd.f32 %v2810_v52, %v2760_v41  ;;  %v2814_v12 = vpop.f32.mrf.mxu0  ;;  %v2865_v13 = vpop.f32.mrf.mxu1  ;;  %v2894_v41 = vmul.f32 %v5712_v1, %v5712_v1  ;;  %v2895_v56 = vmul.f32 %v5718_v54, %v5718_v54 }
 0x2ed   : > { %4184 = vlog2.f32 %v5731_v23  ;;  %v5740_v29 = vadd.f32 %v2897_v26, %v2891_v19  ;;  %v2815_v14 = vadd.f32 %v2814_v12, %v2764_v55  ;;  %v2898_v53 = vmul.f32 %v2860_v24, %v2860_v24 }
 0x2ee   : > { %v3024_v15 = vmul.f32 %v2860_v24, %v5533_v49  ;;  %v2862_v16 = vadd.f32 %v2861_v63, %v2811_v51  ;;  %v2816_v25 = vpop.f32.mrf.mxu0  ;;  %v2867_v5 = vpop.f32.mrf.mxu1  ;;  %vm2914_vm0 = vcmp.gt.f32.partialorder %v5731_v23, 0.0 }
 0x2ef   : > { %4186 = vlog2.f32 %v5740_v29  ;;  %v2866_v28 = vadd.f32 %v2865_v13, %v2815_v14  ;;  %v2817_v34 = vadd.f32 %v2816_v25, %v2766_v42  ;;  %v5748_v37 = vadd.f32 %v2898_v53, %v2892_v20 }
 0x2f0   : > { %v5751_v55 = vadd.f32 %v3024_v15, %v5704_v40  ;;  %v2899_v48 = vmul.f32 %v2862_v16, %v2862_v16  ;;  %v3025_v30 = vmul.f32 %v2862_v16, %v5545_v7  ;;  %v2818_v10 = vpop.f32.mrf.mxu0  ;;  %v2869_v49 = vpop.f32.mrf.mxu1 }
 0x2f1   : > { %v2900_v50 = vmul.f32 %v2866_v28, %v2866_v28  ;;  %v3026_v1 = vmul.f32 %v2866_v28, %v5562_v4  ;;  %v2868_v52 = vadd.f32 %v2867_v5, %v2817_v34  ;;  %vm2916_vm8 = vcmp.gt.f32.partialorder %v5748_v37, 0.0 }
 0x2f2   : > { %4188 = vlog2.f32 %v5748_v37  ;;  %v5759_v42 = vadd.f32 %v2899_v48, %v2893_v62  ;;  %v5762_v40 = vadd.f32 %v3025_v30, %v5710_v2  ;;  %v2819_v63 = vpop.f32.mrf.mxu0  ;;  %v2870_v7 = vpop.f32.mrf.mxu1  ;;  %vm5768_vm9 = vmand %vm2910_vm3, %vm2916_vm8  ;;  %vm2915_vm3 = vcmp.gt.f32.partialorder %v5740_v29, 0.0 }
 0x2f3   : > { %v5772_v4 = vadd.f32 %v2900_v50, %v2894_v41  ;;  %v5775_v19 = vadd.f32 %v3026_v1, %v5716_v6  ;;  %v2901_v26 = vmul.f32 %v2868_v52, %v2868_v52  ;;  %v3027_v24 = vmul.f32 %v2868_v52, %v5567_v8 }
 0x2f4   : > { %vm2917_vm10 = vcmp.gt.f32.partialorder %v5759_v42, 0.0  ;;  %4190 = vlog2.f32 %v5759_v42 }
 0x2f5   : > { %vm5784_vm11 = vmand %vm2911_vm4, %vm2917_vm10  ;;  %vm2918_vm12 = vcmp.gt.f32.partialorder %v5772_v4, 0.0  ;;  %4192 = vlog2.f32 %v5772_v4  ;;  %v5790_v2 = vadd.f32 %v2901_v26, %v2895_v56  ;;  %v5793_v8 = vadd.f32 %v3027_v24, %v5722_v27 }
 0x2f6   : > { %vm5799_vm13 = vmand %vm2912_vm5, %vm2918_vm12 }
 0x2f7   : > { %vm2919_vm14 = vcmp.gt.f32.partialorder %v5790_v2, 0.0  ;;  %4194 = vlog2.f32 %v5790_v2  ;;  %vm3034_vm4 = vmand %vm2908_vm1, %vm2914_vm0 }
 0x2f8   : > { %vm5809_vm15 = vmand %vm2913_vm6, %vm2919_vm14 }
 0x2f9   : > { %vm3035_vm1 = vmand %vm2909_vm2, %vm2915_vm3 }
 0x2fa   : > { %v4185_v27 = vpop.eup %4184 }
 0x2fb   : > { %v2933_v51 = vmul.f32 0.6931472, %v4185_v27 }
 0x2fc   : > { %v4187_v12 = vpop.eup %4186 }
 0x2fd   : > { %v2968_v17 = vmul.f32 0.15, %v2933_v51  ;;  %v3040_v13 = vadd.f32 %v2933_v51, %v5596_v38  ;;  %v2935_v20 = vmul.f32 0.6931472, %v4187_v12 }
 0x2ff   : > { %v4189_v14 = vpop.eup %4188  ;;  %v2974_v62 = vmul.f32 1.442695, %v2968_v17  ;;  %v3046_v53 = vmul.f32 -0.35, %v3040_v13  ;;  %v2969_v15 = vmul.f32 0.15, %v2935_v20  ;;  %v3041_v16 = vadd.f32 %v2935_v20, %v5599_v43 }
 0x300   : > { %v2937_v25 = vmul.f32 0.6931472, %v4189_v14 }
 0x301   : > { %v4191_v5 = vpop.eup %4190  ;;  %4196 = vpow2.f32 %v2974_v62  ;;  %v3052_v18 = vmul.f32 1.442695, %v3046_v53  ;;  %v2976_v41 = vmul.f32 1.442695, %v2969_v15  ;;  %v3047_v28 = vmul.f32 -0.35, %v3041_v16 }
 0x302   : > { %v4193_v34 = vpop.eup %4192  ;;  %v2970_v48 = vmul.f32 0.15, %v2937_v25  ;;  %v3042_v30 = vadd.f32 %v2937_v25, %v5606_v57  ;;  %v2939_v10 = vmul.f32 0.6931472, %v4191_v5  ;;  %v3023_v15 = vmul.f32 %v5727_v22, %v5520_v36 }
 0x303   : > { %4198 = vpow2.f32 %v3052_v18  ;;  %v3054_v38 = vmul.f32 1.442695, %v3047_v28  ;;  %v2941_v49 = vmul.f32 0.6931472, %v4193_v34  ;;  %v3070_v16 = vmul.f32 %v5640_v45, %v5640_v45 }
 0x304   : > { %v4195_v56 = vpop.eup %4194  ;;  %4200 = vpow2.f32 %v2976_v41  ;;  %v2978_v50 = vmul.f32 1.442695, %v2970_v48  ;;  %v3048_v1 = vmul.f32 -0.35, %v3042_v30  ;;  %v2971_v52 = vmul.f32 0.15, %v2939_v10 }
 0x305   : > { %4202 = vpow2.f32 %v3054_v38  ;;  %v3043_v43 = vadd.f32 %v2939_v10, %v5609_v47  ;;  %v2972_v63 = vmul.f32 0.15, %v2941_v49  ;;  %v3044_v7 = vadd.f32 %v2941_v49, %v5616_v61 }
 0x306   : > { %4204 = vpow2.f32 %v2978_v50  ;;  %v3056_v26 = vmul.f32 1.442695, %v3048_v1  ;;  %v2980_v24 = vmul.f32 1.442695, %v2971_v52  ;;  %v2943_v27 = vmul.f32 0.6931472, %v4195_v56 }
 0x307   : > { %v3049_v57 = vmul.f32 -0.35, %v3043_v43  ;;  %v2982_v51 = vmul.f32 1.442695, %v2972_v63  ;;  %v3050_v12 = vmul.f32 -0.35, %v3044_v7  ;;  %v3017_v18 = vmul.f32 %v5698_v33, %v5313_v39 }
 0x308   : > { %4206 = vpow2.f32 %v3056_v26  ;;  %v2973_v17 = vmul.f32 0.15, %v2943_v27  ;;  %v3045_v13 = vadd.f32 %v2943_v27, %v5618_v35  ;;  %v3071_v35 = vmul.f32 %v5644_v46, %v5644_v46 }
 0x309   : > { %4208 = vpow2.f32 %v2980_v24  ;;  %v3058_v20 = vmul.f32 1.442695, %v3049_v57  ;;  %v3060_v14 = vmul.f32 1.442695, %v3050_v12  ;;  %v3072_v22 = vmul.f32 %v5654_v58, %v5654_v58 }
 0x30a   : > { %4210 = vpow2.f32 %v2982_v51  ;;  %v2984_v62 = vmul.f32 1.442695, %v2973_v17  ;;  %v3051_v47 = vmul.f32 -0.35, %v3045_v13  ;;  %v3073_v34 = vmul.f32 %v5658_v60, %v5658_v60 }
 0x30b   : > { %4212 = vpow2.f32 %v3058_v20  ;;  %v5838_v48 = vmul.f32 %v5672_v11, %v5672_v11  ;;  %v5842_v39 = vmul.f32 %v5676_v9, %v5676_v9  ;;  %v3029_v44 = vadd.f32 %v3023_v15, %v3017_v18 }
 0x30c   : > { %4214 = vpow2.f32 %v3060_v14  ;;  %v3062_v61 = vmul.f32 1.442695, %v3051_v47 }
 0x30d   : > { %4216 = vpow2.f32 %v2984_v62 }
 0x30e   : > { %v4197_v53 = vpop.eup %4196  ;;  %4218 = vpow2.f32 %v3062_v61 }
 0x30f   : > { %v2986_v25 = vsel %vm2914_vm0, %v4197_v53, 0.0 }
 0x310   : > { %v4199_v5 = vpop.eup %4198  ;;  %v2992_v23 = vsub.f32 %v5640_v45, %v2986_v25  ;;  %v3076_v36 = vmul.f32 %v2986_v25, %v2986_v25 }
 0x311   : > { %v4201_v41 = vpop.eup %4200  ;;  %v3064_v28 = vsel %vm3034_vm4, %v4199_v5, 0.0 }
 0x312   : > { %v4203_v45 = vpop.eup %4202  ;;  %v2987_v33 = vsel %vm2915_vm3, %v4201_v41, 0.0  ;;  %v2998_v30 = vmul.f32 %v2992_v23, %v2992_v23  ;;  %v3088_v10 = vmul.f32 2.0, %v3064_v28  ;;  %v3004_v1 = vmax.f32 %v2992_v23, 0.0 }
 0x313   : > { %v4205_v38 = vpop.eup %4204  ;;  %v2993_v49 = vsub.f32 %v5644_v46, %v2987_v33  ;;  %v3077_v56 = vmul.f32 %v2987_v33, %v2987_v33  ;;  %v3065_v50 = vsel %vm3035_vm1, %v4203_v45, 0.0  ;;  %v3082_v52 = vadd.f32 %v3076_v36, %v3070_v16 }
 0x314   : > { %v3089_v43 = vmul.f32 2.0, %v3065_v50  ;;  %v3094_v63 = vmul.f32 %v3088_v10, %v5733_v31  ;;  %v2988_v7 = vsel %vm2916_vm8, %v4205_v38, 0.0  ;;  %v3010_v59 = vmul.f32 %v3004_v1, %v3004_v1 }
 0x315   : > { %v4207_v26 = vpop.eup %4206  ;;  %v2999_v24 = vmul.f32 %v2993_v49, %v2993_v49  ;;  %v3083_v29 = vadd.f32 %v3077_v56, %v3071_v35  ;;  %v3005_v27 = vmax.f32 %v2993_v49, 0.0  ;;  %v2994_v46 = vsub.f32 %v5654_v58, %v2988_v7 }
 0x316   : > { %v4209_v57 = vpop.eup %4208  ;;  %v3095_v51 = vmul.f32 %v3089_v43, %v3029_v44  ;;  %v3100_v12 = vsub.f32 %v3082_v52, %v3094_v63  ;;  %v3066_v17 = vsel %vm5768_vm9, %v4207_v26, 0.0  ;;  %v3078_v37 = vmul.f32 %v2988_v7, %v2988_v7 }
 0x317   : > { %v4211_v13 = vpop.eup %4210  ;;  %v3109_v20 = vadd.f32 %v2999_v24, %v2998_v30  ;;  %v3011_v14 = vmul.f32 %v3005_v27, %v3005_v27  ;;  %v2989_v31 = vsel %vm2917_vm10, %v4209_v57, 0.0  ;;  %v3006_v53 = vmax.f32 %v2994_v46, 0.0 }
 0x318   : > { %v4213_v62 = vpop.eup %4212  ;;  %v3101_v47 = vsub.f32 %v3083_v29, %v3095_v51  ;;  %v2995_v61 = vsub.f32 %v5658_v60, %v2989_v31  ;;  %v3000_v15 = vmul.f32 %v2994_v46, %v2994_v46  ;;  %v2990_v58 = vsel %vm2918_vm12, %v4211_v13, 0.0 }
 0x319   : > { %v4215_v35 = vpop.eup %4214  ;;  %3110 = vadd.xlane.f32.xlu0 %v3109_v20  ;;  %v3146_v16 = vadd.f32 %v3011_v14, %v3010_v59  ;;  %v3067_v54 = vsel %vm5784_vm11, %v4213_v62, 0.0  ;;  %v3079_v25 = vmul.f32 %v2989_v31, %v2989_v31  ;;  %v3012_v23 = vmul.f32 %v3006_v53, %v3006_v53  ;;  %v3107_v62 = vld [vmem:[#allocation2 + $0x8] sm:$0xff]  ;;  %v3108_v53 = vld [vmem:[#allocation2 + $0x10] sm:$0xff] }
 0x31a   : > { %v4217_v5 = vpop.eup %4216  ;;  %v3128_v42 = vadd.f32 %v3101_v47, %v3100_v12  ;;  %v3007_v18 = vmax.f32 %v2995_v61, 0.0  ;;  %v3001_v36 = vmul.f32 %v2995_v61, %v2995_v61  ;;  %v2996_v28 = vsub.f32 %v5672_v11, %v2990_v58 }
 0x31b   : > { %v4219_v41 = vpop.eup %4218  ;;  %v2991_v60 = vsel %vm2919_vm14, %v4217_v5, 0.0  ;;  %v3084_v45 = vadd.f32 %v3078_v37, %v3072_v22  ;;  %v3085_v44 = vadd.f32 %v3079_v25, %v3073_v34  ;;  %v3090_v30 = vmul.f32 2.0, %v3066_v17  ;;  %v3143_v17 = vld [vmem:[#allocation4] sm:$0xff]  ;;  %v3144_v37 = vld [vmem:[#allocation4 + $0x8] sm:$0xff]  ;;  %v3127_v25 = vld [vmem:[#allocation3 + $0x10] sm:$0xff] }
 0x31c   : > { %3129 = vadd.xlane.f32.xlu1 %v3128_v42  ;;  %v3013_v4 = vmul.f32 %v3007_v18, %v3007_v18  ;;  %v3112_v33 = vadd.f32 %v3001_v36, %v3000_v15  ;;  %v2997_v3 = vsub.f32 %v5676_v9, %v2991_v60  ;;  %v3002_v10 = vmul.f32 %v2996_v28, %v2996_v28  ;;  %v3126_v15 = vld [vmem:[#allocation3 + $0x8] sm:$0xff] }
 0x31d   : > { %3147 = vadd.xlane.f32.xlu0 %v3146_v16  ;;  %v3091_v38 = vmul.f32 2.0, %v3067_v54  ;;  %v3068_v49 = vsel %vm5799_vm13, %v4215_v35, 0.0  ;;  %v3069_v2 = vsel %vm5809_vm15, %v4219_v41, 0.0  ;;  %v3096_v11 = vmul.f32 %v3090_v30, %v5751_v55  ;;  %v3145_v5 = vld [vmem:[#allocation4 + $0x10] sm:$0xff]  ;;  %v3163_v41 = vld [vmem:[#allocation5 + $0x10] sm:$0xff] }
 0x31e   : > { %v3149_v56 = vadd.f32 %v3013_v4, %v3012_v23  ;;  %v3003_v50 = vmul.f32 %v2997_v3, %v2997_v3  ;;  %v3080_v22 = vmul.f32 %v2990_v58, %v2990_v58  ;;  %v3081_v1 = vmul.f32 %v2991_v60, %v2991_v60  ;;  %v3162_v60 = vld [vmem:[#allocation5 + $0x8] sm:$0xff] }
 0x31f   : > { %v3097_v34 = vmul.f32 %v3091_v38, %v5762_v40  ;;  %v3092_v52 = vmul.f32 2.0, %v3068_v49  ;;  %v3093_v9 = vmul.f32 2.0, %v3069_v2  ;;  %v3102_v63 = vsub.f32 %v3084_v45, %v3096_v11 }
 0x320   : > { %3150 = vadd.xlane.f32.xlu1 %v3149_v56  ;;  %v3115_v43 = vadd.f32 %v3003_v50, %v3002_v10  ;;  %v3086_v7 = vadd.f32 %v3080_v22, %v5838_v48  ;;  %v3008_v6 = vmax.f32 %v2996_v28, 0.0  ;;  %v3087_v32 = vadd.f32 %v3081_v1, %v5842_v39  ;;  %v3106_v48 = vld [vmem:[#allocation2] sm:$0xff] }
 0x321   : > { %3113 = vadd.xlane.f32.xlu0 %v3112_v33  ;;  %v3103_v26 = vsub.f32 %v3085_v44, %v3097_v34  ;;  %v3098_v24 = vmul.f32 %v3092_v52, %v5775_v19  ;;  %v3099_v55 = vmul.f32 %v3093_v9, %v5793_v8  ;;  %v3009_v29 = vmax.f32 %v2997_v3, 0.0  ;;  %v3125_v8 = vld [vmem:[#allocation3] sm:$0xff] }
 0x322   : > { %v3014_v57 = vmul.f32 %v3008_v6, %v3008_v6 }
 0x323   : > { %v3131_v27 = vadd.f32 %v3103_v26, %v3102_v63  ;;  %v3104_v40 = vsub.f32 %v3086_v7, %v3098_v24  ;;  %v3105_v59 = vsub.f32 %v3087_v32, %v3099_v55  ;;  %v3015_v51 = vmul.f32 %v3009_v29, %v3009_v29 }
 0x324   : > { %3116 = vadd.xlane.f32.xlu1 %v3115_v43 }
 0x325   : > { %3132 = vadd.xlane.f32.xlu0 %v3131_v27  ;;  %v3134_v12 = vadd.f32 %v3105_v59, %v3104_v40  ;;  %v3152_v46 = vadd.f32 %v3015_v51, %v3014_v57 }
 0x328   : > { %3135 = vadd.xlane.f32.xlu1 %v3134_v12 }
 0x329   : > { %3153 = vadd.xlane.f32.xlu0 %v3152_v46 }
 0x32c   : > { %3171 = vadd.xlane.f32.xlu1 %v5684_v0 }
 0x32d   : > { %3168 = vadd.xlane.f32.xlu0 %v5666_v21 }
 0x3a2   : > { %v3111_v19 = vpop.xlane.xlu0 %3110 }
 0x3a3   : > { %v3118_v39 = vadd.f32 %v3111_v19, %v3106_v48 }
 0x3a5   : > { %3122 = vst.msk [vmem:[#allocation2] sm:$0xff] %vm3121_vm7, %v3118_v39  ;;  %v3130_v13 = vpop.xlane.xlu1 %3129 }
 0x3a6   : > { %v3137_v20 = vadd.f32 %v3130_v13, %v3125_v8  ;;  %v3148_v14 = vpop.xlane.xlu0 %3147 }
 0x3a7   : > { %v3155_v31 = vadd.f32 %v3148_v14, %v3143_v17 }
 0x3a8   : > { %3140 = vst.msk [vmem:[#allocation3] sm:$0xff] %vm3121_vm7, %v3137_v20 }
 0x3a9   : > { %3158 = vst.msk [vmem:[#allocation4] sm:$0xff] %vm3121_vm7, %v3155_v31  ;;  %v3151_v0 = vpop.xlane.xlu1 %3150 }
 0x3aa   : > { %v3156_v47 = vadd.f32 %v3151_v0, %v3144_v37  ;;  %v3114_v21 = vpop.xlane.xlu0 %3113 }
 0x3ab   : > { %v3119_v61 = vadd.f32 %v3114_v21, %v3107_v62 }
 0x3ac   : > { %3159 = vst.msk [vmem:[#allocation4 + $0x8] sm:$0xff] %vm3121_vm7, %v3156_v47 }
 0x3ad   : > { %3123 = vst.msk [vmem:[#allocation2 + $0x8] sm:$0xff] %vm3121_vm7, %v3119_v61  ;;  %v3117_v35 = vpop.xlane.xlu1 %3116 }
 0x3ae   : > { %v3120_v16 = vadd.f32 %v3117_v35, %v3108_v53  ;;  %v3133_v58 = vpop.xlane.xlu0 %3132 }
 0x3af   : > { %v3138_v54 = vadd.f32 %v3133_v58, %v3126_v15 }
 0x3b0   : > { %3124 = vst.msk [vmem:[#allocation2 + $0x10] sm:$0xff] %vm3121_vm7, %v3120_v16 }
 0x3b1   : > { %3141 = vst.msk [vmem:[#allocation3 + $0x8] sm:$0xff] %vm3121_vm7, %v3138_v54  ;;  %v3136_v42 = vpop.xlane.xlu1 %3135 }
 0x3b2   : > { %v3139_v18 = vadd.f32 %v3136_v42, %v3127_v25  ;;  %v3154_v23 = vpop.xlane.xlu0 %3153 }
 0x3b3   : > { %v3157_v36 = vadd.f32 %v3154_v23, %v3145_v5 }
 0x3b4   : > { %3142 = vst.msk [vmem:[#allocation3 + $0x10] sm:$0xff] %vm3121_vm7, %v3139_v18 }
 0x3b5   : > { %3160 = vst.msk [vmem:[#allocation4 + $0x10] sm:$0xff] %vm3121_vm7, %v3157_v36  ;;  %v3172_v28 = vpop.xlane.xlu1 %3171  ;;  %3182 = sbr.rel (%p3705_p8) target bundleno = 1180 (0x49c), region = 52 }
 0x3b6   : > { %v3175_v45 = vadd.f32 %v3172_v28, %v3163_v41  ;;  %v3169_v44 = vpop.xlane.xlu0 %3168 }
 0x3b7   : > { %v3174_v4 = vadd.f32 %v3169_v44, %v3162_v60 }
 0x3b8   : > { %3178 = vst.msk [vmem:[#allocation5 + $0x10] sm:$0xff] %vm3121_vm7, %v3175_v45 }
 0x3b9   : > { %3177 = vst.msk [vmem:[#allocation5 + $0x8] sm:$0xff] %vm3121_vm7, %v3174_v4 }
 0x3ba   : > { %v3217_v33 = vld [vmem:[#allocation4] sm:$0xff]  ;;  %v3218_v3 = vld [vmem:[#allocation4 + $0x8] sm:$0xff]  ;;  %v3234_v2 = vld [vmem:[%s4501_s16] sm:$0xff]  ;;  %v4420_v61 = vmov 0.0  }
 0x3bb   : > { %v3220_v10 = vsel %vm3121_vm7, %v3217_v33, 0.0  ;;  %v3221_v38 = vsel %vm3121_vm7, %v3218_v3, 0.0  ;;  %v3235_v56 = vld [vmem:[%s4501_s16 + $0x8] sm:$0xff]  ;;  %v3236_v50 = vld [vmem:[%s4501_s16 + $0x10] sm:$0xff]  ;;  %v3183_v22 = vld [vmem:[#allocation2] sm:$0xff]  ;;  %v3237_v52 = vadd.f32 %v3234_v2, %v3217_v33 }
 0x3bc   : > { %v3219_v30 = vld [vmem:[#allocation4 + $0x10] sm:$0xff]  ;;  %v3222_v11 = vadd.f32 %v3221_v38, %v3220_v10  ;;  %v3184_v34 = vld [vmem:[#allocation2 + $0x8] sm:$0xff]  ;;  %v3185_v1 = vld [vmem:[#allocation2 + $0x10] sm:$0xff]  ;;  %v3186_v9 = vsel %vm3121_vm7, %v3183_v22, 0.0  ;;  %v3238_v57 = vadd.f32 %v3235_v56, %v3218_v3 }
 0x3bd   : > { %v3223_v49 = vsel %vm3121_vm7, %v3219_v30, 0.0  ;;  %v3187_v43 = vsel %vm3121_vm7, %v3184_v34, 0.0  ;;  %v3189_v63 = vsel %vm3121_vm7, %v3185_v1, 0.0  ;;  %v3200_v7 = vld [vmem:[#allocation3] sm:$0xff]  ;;  %v3201_v6 = vld [vmem:[#allocation3 + $0x8] sm:$0xff]  ;;  %v3202_v26 = vld [vmem:[#allocation3 + $0x10] sm:$0xff]  ;;  %v3239_v51 = vadd.f32 %v3236_v50, %v3219_v30 }
 0x3be   : > { %v3224_v32 = vadd.f32 %v3223_v49, %v3222_v11  ;;  %v3188_v24 = vadd.f32 %v3187_v43, %v3186_v9  ;;  %v3203_v55 = vsel %vm3121_vm7, %v3200_v7, 0.0  ;;  %v3204_v29 = vsel %vm3121_vm7, %v3201_v6, 0.0  ;;  %v3240_v27 = vld [vmem:[#allocation5] sm:$0xff]  ;;  %v3243_v48 = vld [vmem:[%s4506_s19] sm:$0xff]  ;;  %v3245_v39 = vld [vmem:[%s4506_s19 + $0x10] sm:$0xff] }
 0x3bf   : > { %v3242_v59 = vld [vmem:[#allocation5 + $0x10] sm:$0xff]  ;;  %v3205_v12 = vadd.f32 %v3204_v29, %v3203_v55  ;;  %v3206_v46 = vsel %vm3121_vm7, %v3202_v26, 0.0  ;;  %v3244_v19 = vld [vmem:[%s4506_s19 + $0x8] sm:$0xff]  ;;  %v3246_v17 = vadd.f32 %v3243_v48, %v3240_v27  ;;  %v3275_v6 = vlaneseq }
 0x3c0   : > { %v3241_v40 = vld [vmem:[#allocation5 + $0x8] sm:$0xff]  ;;  %3225 = vadd.xlane.f32.xlu1 %v3224_v32  ;;  %v3190_v8 = vadd.f32 %v3189_v63, %v3188_v24  ;;  %v3248_v20 = vadd.f32 %v3245_v39, %v3242_v59 }
 0x3c1   : > { %v3247_v13 = vadd.f32 %v3244_v19, %v3241_v40  ;;  %v3207_v14 = vadd.f32 %v3206_v46, %v3205_v12  ;;  %v3249_v31 = vmul.f32 0.1, %v3246_v17  ;;  %v3276_v26 = vshrl.u32 %v3275_v6, 7 }
 0x3c2   : > { %3191 = vadd.xlane.f32.xlu0 %v3190_v8  ;;  %v3251_v62 = vmul.f32 0.1, %v3248_v20  ;;  %v3278_v32 = vand.u32 127, %v3275_v6 }
 0x3c3   : > { %v3250_v37 = vmul.f32 0.1, %v3247_v13  ;;  %v3252_v0 = vsub.f32 %v3237_v52, %v3249_v31 }
 0x3c4   : > { %v3254_v21 = vsub.f32 %v3239_v51, %v3251_v62  ;;  %vm3286_vm8 = vcmp.eq.s32.totalorder %v3278_v32, 3  ;;  %vm3284_vm9 = vcmp.eq.s32.totalorder %v3278_v32, 2  ;;  %vm3282_vm10 = vcmp.eq.s32.totalorder %v3278_v32, 1 }
 0x3c5   : > { %v3253_v47 = vsub.f32 %v3238_v57, %v3250_v37  ;;  %vm3255_vm2 = vcmp.gt.f32.partialorder %v3252_v0, 0.0  ;;  %vm3280_vm11 = vcmp.eq.s32.totalorder %v3278_v32, 0 }
 0x3c6   : > { %3208 = vadd.xlane.f32.xlu0 %v3207_v14  ;;  %vm3257_vm6 = vcmp.gt.f32.partialorder %v3254_v21, 0.0  ;;  %v3258_v53 = vsel %vm3255_vm2, 1.0, %v4420_v61 }
 0x3c7   : > { %vm3256_vm5 = vcmp.gt.f32.partialorder %v3253_v47, 0.0  ;;  %v3260_v35 = vsel %vm3257_vm6, 1.0, %v4420_v61  ;;  %v3261_v16 = vsel %vm3121_vm7, %v3258_v53, 0.0 }
 0x3c8   : > { %v3259_v15 = vsel %vm3256_vm5, 1.0, %v4420_v61  ;;  %v3264_v54 = vsel %vm3121_vm7, %v3260_v35, 0.0 }
 0x3c9   : > { %v3262_v58 = vsel %vm3121_vm7, %v3259_v15, 0.0  ;;  %vm3279_vm7 = vcmp.eq.s32.totalorder %v3276_v26, 0 }
 0x3ca   : > { %v3263_v25 = vadd.f32 %v3262_v58, %v3261_v16  ;;  %vm3287_vm12 = vmand %vm3279_vm7, %vm3286_vm8 }
 0x3cb   : > { %vm3285_vm13 = vmand %vm3279_vm7, %vm3284_vm9 }
 0x3cc   : > { %v3265_v5 = vadd.f32 %v3264_v54, %v3263_v25  ;;  %vm3283_vm14 = vmand %vm3279_vm7, %vm3282_vm10 }
 0x3cd   : > { %vm3281_vm15 = vmand %vm3279_vm7, %vm3280_vm11 }
 0x3ce   : > { %3266 = vadd.xlane.f32.xlu1 %v3265_v5 }
 0x449   : > { %v3226_v42 = vpop.xlane.xlu1 %3225 }
 0x44a   : > { %v3227_v18 = vrot.slane %v3226_v42, 4 }
 0x44b   : > { %v3192_v23 = vpop.xlane.xlu0 %3191 }
 0x44c   : > { %v3228_v36 = vadd.f32 %v3227_v18, %v3226_v42  ;;  %v3193_v41 = vrot.slane %v3192_v23, 4 }
 0x44e   : > { %v3194_v60 = vadd.f32 %v3193_v41, %v3192_v23  ;;  %v3229_v28 = vrot.slane %v3228_v36, 2 }
 0x44f   : > { %v3209_v45 = vpop.xlane.xlu0 %3208 }
 0x450   : > { %v3195_v44 = vrot.slane %v3194_v60, 2  ;;  %v3210_v4 = vrot.slane %v3209_v45, 4  ;;  %v3230_v30 = vadd.f32 %v3229_v28, %v3228_v36 }
 0x452   : > { %v3211_v33 = vadd.f32 %v3210_v4, %v3209_v45  ;;  %v3196_v3 = vadd.f32 %v3195_v44, %v3194_v60  ;;  %v3231_v11 = vrot.slane %v3230_v30, 1 }
 0x454   : > { %v3212_v10 = vrot.slane %v3211_v33, 2  ;;  %v3197_v38 = vrot.slane %v3196_v3, 1  ;;  %v3232_v9 = vadd.f32 %v3231_v11, %v3230_v30 }
 0x456   : > { %v3213_v49 = vadd.f32 %v3212_v10, %v3211_v33  ;;  %v3198_v56 = vadd.f32 %v3197_v38, %v3196_v3 }
 0x457   : > { %v3267_v2 = vpop.xlane.xlu1 %3266 }
 0x458   : > { %v3268_v50 = vrot.slane %v3267_v2, 4  ;;  %3710 = vpush %v3198_v56  ;;  %v3214_v22 = vrot.slane %v3213_v49, 1 }
 0x45a   : > { %v3269_v34 = vadd.f32 %v3268_v50, %v3267_v2  ;;  %v3215_v1 = vadd.f32 %v3214_v22, %v3213_v49 }
 0x45c   : > { %v3270_v52 = vrot.slane %v3269_v34, 2  ;;  %3712 = vpush %v3215_v1 }
 0x45d   : > { %3714 = vpush %v3232_v9 }
 0x45e   : > { %v3271_v43 = vadd.f32 %v3270_v52, %v3269_v34 }
 0x460   : > { %v3272_v63 = vrot.slane %v3271_v43, 1 }
 0x462   : > { %v3273_v7 = vadd.f32 %v3272_v63, %v3271_v43 }
 0x464   : > { %3716 = vpush %v3273_v7 }
 0x489   : > { %s3711_s21 = spop %3710 }
 0x48a   : > { %v3294_v59 = vstv %s3711_s21 }
 0x48d   : > { %s3713_s10 = spop %3712 }
 0x48e   : > { %s3715_s13 = spop %3714  ;;  %v3292_v27 = vstv %s3713_s10 }
 0x48f   : > { %v3290_v55 = vstv %s3715_s13 }
 0x495   : > { %s3717_s16 = spop %3716 }
 0x496   : > { %v3288_v24 = vstv %s3717_s16 }
 0x497   : > { %v3289_v29 = vsel %vm3287_vm12, %v3288_v24, 0.0 }
 0x498   : > { %v3291_v40 = vsel %vm3285_vm13, %v3290_v55, %v3289_v29 }
 0x499   : > { %v3293_v57 = vsel %vm3283_vm14, %v3292_v27, %v3291_v40 }
 0x49a   : > { %v3295_v51 = vsel %vm3281_vm15, %v3294_v59, %v3293_v57 }
 0x49b   : > { %3296 = vst [vmem:[%s4511_s28] sm:$0xff] %v3295_v51 }
 0x49c PF: > { %s16_s25 = sadd.s32 1, %s4417_s25   ;;  %s6151_s21 = smov %s4409_s23 }
 0x49d   : > { %p13_p9 = scmp.ge.s32.totalorder %s16_s25, 6   ;;  %s6152_s22 = smov %s4413_s24 }
 0x49e   : > { %s6153_s23 = smov %s6156_s26  ;;  %s6154_s24 = smov %s6160_s27 }
 0x49f   :  { %15 = sbr.rel (!%p13_p9) target bundleno = 3 (0x3), region = 93 }

</bundles_post_ra>
